<compile_context>
chip_gen: v6e
topology: v6e:2x2x1
jax: 0.10.0
libtpu: 0.0.40
codegen_flags: <defaults>
</compile_context>

<pallas_src>
import functools

import jax
import jax.numpy as jnp
from jax import lax
from jax.experimental import pallas as pl
from jax.experimental.pallas import tpu as pltpu


def _round_up(x, m):
    return (x + m - 1) // m * m


def _sigmoid(z):
    # Exact identity sigmoid(z) = 0.5*(tanh(z/2) + 1): one EUP push per gate
    # instead of exp + reciprocal (5 transcendentals/step funnel through one EUP).
    return 0.5 * jnp.tanh(0.5 * z) + 0.5


def _lstm_kernel(x_ref, wx_ref, wh_ref, b_ref, h0_ref, c0_ref,
                 h_out_ref, c_out_ref,
                 h_scr, c_scr, xg_scr, g_scr,
                 *, T_CHUNK, B_TILE, H_pad, seq_len, needs_mask):
    tc = pl.program_id(1)                  # time-chunk index (sequential axis)

    @pl.when(tc == 0)
    def _():
        h_scr[...] = h0_ref[...].astype(jnp.float32)
        c_scr[...] = c0_ref[...].astype(jnp.float32)

    # ---- chunk-level input projection: one MXU call, M = T_CHUNK*B_TILE --------
    # (bias broadcast happens once per chunk, not once per timestep)
    xg_scr[...] = (jnp.dot(x_ref[...], wx_ref[...],
                           preferred_element_type=jnp.float32) + b_ref[...])

    def step(lt, carry):
        h, c = carry
        # Recurrent critical path: gates = xgates[lt] + h @ W_h, staged in VMEM and
        # consumed gate-by-gate (never holds the full 4*H tensor in vregs).
        g_scr[...] = (xg_scr[pl.ds(lt * B_TILE, B_TILE), :]
                      + jnp.dot(h.astype(wh_ref.dtype), wh_ref[...],
                                preferred_element_type=jnp.float32))

        i_t = _sigmoid(g_scr[:, 0 * H_pad:1 * H_pad])
        f_t = _sigmoid(g_scr[:, 1 * H_pad:2 * H_pad])
        g_t = jnp.tanh(g_scr[:, 2 * H_pad:3 * H_pad])
        o_t = _sigmoid(g_scr[:, 3 * H_pad:4 * H_pad])

        c_new = f_t * c + i_t * g_t
        h_new = o_t * jnp.tanh(c_new)

        if needs_mask:   # only traced when seq_len is not a multiple of T_CHUNK
            valid = (tc * T_CHUNK + lt) < seq_len
            c_new = jnp.where(valid, c_new, c)
            h_new = jnp.where(valid, h_new, h)
        return h_new, c_new

    h, c = lax.fori_loop(0, T_CHUNK, step, (h_scr[...], c_scr[...]), unroll=True)
    h_scr[...] = h
    c_scr[...] = c

    @pl.when(tc == pl.num_programs(1) - 1)
    def _():
        h_out_ref[...] = h.astype(h_out_ref.dtype)
        c_out_ref[...] = c.astype(c_out_ref.dtype)


def lstm_forward(x, init_states, W_x, W_h, b, *,
                 compute_dtype=jnp.float32, t_chunk=8, b_tile=128):
    """x: (seq_len, batch, input_dim); init_states = (h0, c0) each (batch, hidden)."""
    h0, c0 = init_states
    seq_len, batch, input_dim = x.shape
    hidden = h0.shape[-1]

    # --- padded / tiled geometry -------------------------------------------
    I_pad = _round_up(input_dim, 128)
    H_pad = _round_up(hidden, 128)
    B_pad = _round_up(batch, 8)
    # >= 2 batch tiles whenever the padded batch permits -> v7x megacore gets work.
    B_TILE = min(b_tile, _round_up(pl.cdiv(B_pad, 2), 8))
    B_pad = _round_up(B_pad, B_TILE)
    n_b = B_pad // B_TILE
    T_CHUNK = max(1, min(t_chunk, seq_len))        # v6e: sweep t_chunk 8 -> 16 -> 32
    T_pad = _round_up(seq_len, T_CHUNK)
    n_t = T_pad // T_CHUNK
    needs_mask = (T_pad != seq_len)

    # --- pad weights so each gate occupies its own H_pad-wide lane block ----
    def pad_gate_cols(W, rows, rows_pad):
        Wp = jnp.zeros((rows_pad, 4 * H_pad), jnp.float32)
        W = W.astype(jnp.float32)
        for k in range(4):
            Wp = Wp.at[:rows, k * H_pad:k * H_pad + hidden].set(
                W[:, k * hidden:(k + 1) * hidden])
        return Wp

    Wx_p = pad_gate_cols(W_x, input_dim, I_pad).astype(compute_dtype)
    Wh_p = pad_gate_cols(W_h, hidden, H_pad).astype(compute_dtype)

    b2 = b.reshape(1, 4 * hidden).astype(jnp.float32)
    b_p = jnp.zeros((1, 4 * H_pad), jnp.float32)
    for k in range(4):
        b_p = b_p.at[:, k * H_pad:k * H_pad + hidden].set(
            b2[:, k * hidden:(k + 1) * hidden])

    # --- pad activations / states (zero padding is inert: zero weight/bias cols
    #     give sigmoid(0)=0.5 multiplying zero-initialized padded state lanes) ---
    x_p = jnp.zeros((T_pad, B_pad, I_pad), compute_dtype)
    x_p = x_p.at[:seq_len, :batch, :input_dim].set(x.astype(compute_dtype))
    # Contiguous per-chunk slab layout: (n_b, n_t, T_CHUNK*B_TILE, I_pad).
    x_r = (x_p.reshape(n_t, T_CHUNK, n_b, B_TILE, I_pad)
              .transpose(2, 0, 1, 3, 4)
              .reshape(n_b, n_t, T_CHUNK * B_TILE, I_pad))

    h0_p = jnp.zeros((B_pad, H_pad), jnp.float32).at[:batch, :hidden].set(
        h0.astype(jnp.float32))
    c0_p = jnp.zeros((B_pad, H_pad), jnp.float32).at[:batch, :hidden].set(
        c0.astype(jnp.float32))

    out_dtype = h0.dtype

    # --- explicit VMEM budget (weights worst-case 2x + 2x x-chunk + scratch) ----
    cd = jnp.dtype(compute_dtype).itemsize
    est = (2 * (I_pad + H_pad) * 4 * H_pad * cd        # W_x + W_h (worst-case 2x buf)
           + 2 * T_CHUNK * B_TILE * I_pad * cd         # double-buffered x chunk
           + (T_CHUNK + 1) * B_TILE * 4 * H_pad * 4    # xgates + per-step gates scratch
           + 2 * B_TILE * H_pad * 4                    # h/c carry scratch
           + 8 * B_TILE * H_pad * 4                    # h0/c0 + outputs
           + 4 * H_pad * 4)                            # bias
    vmem_limit = min(max(int(1.25 * est) + (2 << 20), 32 << 20), 64 << 20)

    kernel = functools.partial(
        _lstm_kernel, T_CHUNK=T_CHUNK, B_TILE=B_TILE, H_pad=H_pad,
        seq_len=seq_len, needs_mask=needs_mask)

    def build(single_buffer_resident):
        res = ({"pipeline_mode": pl.Buffered(1)} if single_buffer_resident else {})
        return pl.pallas_call(
            kernel,
            out_shape=(jax.ShapeDtypeStruct((B_pad, H_pad), out_dtype),
                       jax.ShapeDtypeStruct((B_pad, H_pad), out_dtype)),
            grid_spec=pltpu.PrefetchScalarGridSpec(
                num_scalar_prefetch=0,
                grid=(n_b, n_t),
                in_specs=[
                    # x chunk: one contiguous (T_CHUNK*B_TILE, I_pad) slab per step
                    pl.BlockSpec((None, None, T_CHUNK * B_TILE, I_pad),
                                 lambda bi, ti: (bi, ti, 0, 0)),
                    # W_x: used once per chunk by the hoisted projection
                    pl.BlockSpec((I_pad, 4 * H_pad), lambda bi, ti: (0, 0), **res),
                    # W_h: resident recurrent weight
                    pl.BlockSpec((H_pad, 4 * H_pad), lambda bi, ti: (0, 0), **res),
                    # bias
                    pl.BlockSpec((1, 4 * H_pad), lambda bi, ti: (0, 0), **res),
                    # h0 / c0: fetched once per batch tile (constant over time axis)
                    pl.BlockSpec((B_TILE, H_pad), lambda bi, ti: (bi, 0), **res),
                    pl.BlockSpec((B_TILE, H_pad), lambda bi, ti: (bi, 0), **res),
                ],
                out_specs=[
                    pl.BlockSpec((B_TILE, H_pad), lambda bi, ti: (bi, 0)),
                    pl.BlockSpec((B_TILE, H_pad), lambda bi, ti: (bi, 0)),
                ],
                scratch_shapes=[
                    pltpu.VMEM((B_TILE, H_pad), jnp.float32),                 # h carry
                    pltpu.VMEM((B_TILE, H_pad), jnp.float32),                 # c carry
                    pltpu.VMEM((T_CHUNK * B_TILE, 4 * H_pad), jnp.float32),   # xgates
                    pltpu.VMEM((B_TILE, 4 * H_pad), jnp.float32),             # gates
                ],
            ),
            compiler_params=pltpu.CompilerParams(
                dimension_semantics=("parallel", "arbitrary"),
                vmem_limit_bytes=vmem_limit),
        )

    args = (x_r, Wx_p, Wh_p, b_p, h0_p, c0_p)
    try:
        h_out_p, c_out_p = build(True)(*args)
    except Exception:
        # pipeline_mode=pl.Buffered(1) not supported by this jax/libtpu version:
        # fall back to default double buffering (costs one extra resident-W copy).
        h_out_p, c_out_p = build(False)(*args)

    h_T = h_out_p[:batch, :hidden]
    c_T = c_out_p[:batch, :hidden]
    # PyTorch module returns (h_t, (h_t, c_t))
    return h_T, (h_T, c_T)


def xavier_uniform(key, shape, dtype=jnp.float32):
    fan_in, fan_out = shape
    bound = jnp.sqrt(6.0 / (fan_in + fan_out))
    return jax.random.uniform(key, shape, dtype, minval=-bound, maxval=bound)


def init_params(key, input_dim, hidden_dim):
    keys = jax.random.split(key, 8)
    W_ii = xavier_uniform(keys[0], (input_dim, hidden_dim))
    W_if = xavier_uniform(keys[1], (input_dim, hidden_dim))
    W_ig = xavier_uniform(keys[2], (input_dim, hidden_dim))
    W_io = xavier_uniform(keys[3], (input_dim, hidden_dim))
    W_hi = xavier_uniform(keys[4], (hidden_dim, hidden_dim))
    W_hf = xavier_uniform(keys[5], (hidden_dim, hidden_dim))
    W_hg = xavier_uniform(keys[6], (hidden_dim, hidden_dim))
    W_ho = xavier_uniform(keys[7], (hidden_dim, hidden_dim))
    # biases are zero-initialized (nn.init.zeros_ for 1-D params)
    b = jnp.zeros((1, 4 * hidden_dim), jnp.float32)
    W_x = jnp.concatenate([W_ii, W_if, W_ig, W_io], axis=1)  # (input_dim, 4H)
    W_h = jnp.concatenate([W_hi, W_hf, W_hg, W_ho], axis=1)  # (hidden, 4H)
    return W_x, W_h, b


def lstm_reference(x, init_states, W_x, W_h, b):
    """Pure-JAX reference mirroring the PyTorch forward."""
    h_t, c_t = init_states
    H = h_t.shape[-1]
    for t in range(x.shape[0]):
        gates = x[t] @ W_x + h_t @ W_h + b
        i_t = jax.nn.sigmoid(gates[:, 0 * H:1 * H])
        f_t = jax.nn.sigmoid(gates[:, 1 * H:2 * H])
        g_t = jnp.tanh(gates[:, 2 * H:3 * H])
        o_t = jax.nn.sigmoid(gates[:, 3 * H:4 * H])
        c_t = f_t * c_t + i_t * g_t
        h_t = o_t * jnp.tanh(c_t)
    return h_t, (h_t, c_t)


if __name__ == "__main__":
    seq_len, batch, input_dim, hidden_dim = 8, 2, 4, 32

    key = jax.random.PRNGKey(0)
    k_x, k_h, k_c, k_p = jax.random.split(key, 4)

    x = jax.random.normal(k_x, (seq_len, batch, input_dim), jnp.float32)
    h0 = jax.random.normal(k_h, (batch, hidden_dim), jnp.float32)
    c0 = jax.random.normal(k_c, (batch, hidden_dim), jnp.float32)
    W_x, W_h, b = init_params(k_p, input_dim, hidden_dim)

    h_ref, (_, c_ref) = lstm_reference(x, (h0, c0), W_x, W_h, b)

    # f32 MXU path: matches the PyTorch module to f32 rounding.
    h_T, (_, c_T) = lstm_forward(x, (h0, c0), W_x, W_h, b,
                                 compute_dtype=jnp.float32)
    jax.block_until_ready((h_T, c_T))
    assert jnp.allclose(h_T, h_ref, atol=1e-4, rtol=1e-4)
    assert jnp.allclose(c_T, c_ref, atol=1e-4, rtol=1e-4)

    # bf16 MXU path: bf16 weights/x on the MXU, f32 accumulation + f32 carry.
    h_b, (_, c_b) = lstm_forward(x, (h0, c0), W_x, W_h, b,
                                 compute_dtype=jnp.bfloat16)
    jax.block_until_ready((h_b, c_b))
    assert jnp.allclose(h_b, h_ref, atol=3e-2, rtol=3e-2)
    assert jnp.allclose(c_b, c_ref, atol=3e-2, rtol=3e-2)

    print("KERNEL_OK")
</pallas_src>

<mosaic_0001>
module attributes {stable_mosaic.version = 11 : i64} {
  func.func @_lstm_kernel(%arg0: i32, %arg1: i32, %arg2: memref<1x1x64x128xf32, #tpu.memory_space<vmem>>, %arg3: memref<128x512xf32, #tpu.memory_space<vmem>>, %arg4: memref<128x512xf32, #tpu.memory_space<vmem>>, %arg5: memref<1x512xf32, #tpu.memory_space<vmem>>, %arg6: memref<8x128xf32, #tpu.memory_space<vmem>>, %arg7: memref<8x128xf32, #tpu.memory_space<vmem>>, %arg8: memref<8x128xf32, #tpu.memory_space<vmem>>, %arg9: memref<8x128xf32, #tpu.memory_space<vmem>>, %arg10: memref<8x128xf32, #tpu.memory_space<vmem>>, %arg11: memref<8x128xf32, #tpu.memory_space<vmem>>, %arg12: memref<64x512xf32, #tpu.memory_space<vmem>>, %arg13: memref<8x512xf32, #tpu.memory_space<vmem>>) attributes {dimension_semantics = [#tpu.dimension_semantics<parallel>, #tpu.dimension_semantics<arbitrary>], iteration_bounds = array<i64: 1, 1>, scalar_prefetch = 0 : i64, scratch_operands = 4 : i64, tpu.core_type = #tpu.core_type<tc>, window_params = [{transform_indices = @transform_0, window_bounds = array<i64: 1, 1, 64, 128>}, {pipeline_mode = #tpu.pipeline_mode<synchronous>, transform_indices = @transform_1, window_bounds = array<i64: 128, 512>}, {pipeline_mode = #tpu.pipeline_mode<synchronous>, transform_indices = @transform_2, window_bounds = array<i64: 128, 512>}, {pipeline_mode = #tpu.pipeline_mode<synchronous>, transform_indices = @transform_3, window_bounds = array<i64: 1, 512>}, {pipeline_mode = #tpu.pipeline_mode<synchronous>, transform_indices = @transform_4, window_bounds = array<i64: 8, 128>}, {pipeline_mode = #tpu.pipeline_mode<synchronous>, transform_indices = @transform_5, window_bounds = array<i64: 8, 128>}, {transform_indices = @transform_6, window_bounds = array<i64: 8, 128>}, {transform_indices = @transform_7, window_bounds = array<i64: 8, 128>}]} {
    %c0_i32 = arith.constant 0 : i32
    %0 = arith.cmpi eq, %arg1, %c0_i32 : i32
    %1 = arith.extui %0 : i1 to i32
    %c0_i32_0 = arith.constant 0 : i32
    %2 = arith.cmpi ne, %1, %c0_i32_0 : i32
    scf.if %2 {
      %c0_210 = arith.constant 0 : index
      %c0_211 = arith.constant 0 : index
      %322 = vector.load %arg6[%c0_210, %c0_211] : memref<8x128xf32, #tpu.memory_space<vmem>>, vector<8x128xf32>
      %c0_212 = arith.constant 0 : index
      %c0_213 = arith.constant 0 : index
      %323 = vector.load %arg10[%c0_212, %c0_213] : memref<8x128xf32, #tpu.memory_space<vmem>>, vector<8x128xf32>
      tpu.vector_store %arg10[%c0_212, %c0_213], %322 {strides = array<i32>} : memref<8x128xf32, #tpu.memory_space<vmem>>, vector<8x128xf32>,
      %c0_214 = arith.constant 0 : index
      %c0_215 = arith.constant 0 : index
      %324 = vector.load %arg7[%c0_214, %c0_215] : memref<8x128xf32, #tpu.memory_space<vmem>>, vector<8x128xf32>
      %c0_216 = arith.constant 0 : index
      %c0_217 = arith.constant 0 : index
      %325 = vector.load %arg11[%c0_216, %c0_217] : memref<8x128xf32, #tpu.memory_space<vmem>>, vector<8x128xf32>
      tpu.vector_store %arg11[%c0_216, %c0_217], %324 {strides = array<i32>} : memref<8x128xf32, #tpu.memory_space<vmem>>, vector<8x128xf32>,
    } else {
    }
    %c0 = arith.constant 0 : index
    %c0_1 = arith.constant 0 : index
    %c0_2 = arith.constant 0 : index
    %c0_3 = arith.constant 0 : index
    %3 = vector.load %arg2[%c0, %c0_1, %c0_2, %c0_3] : memref<1x1x64x128xf32, #tpu.memory_space<vmem>>, vector<1x1x64x128xf32>
    %4 = vector.shape_cast %3 : vector<1x1x64x128xf32> to vector<64x128xf32>
    %c0_4 = arith.constant 0 : index
    %c0_5 = arith.constant 0 : index
    %5 = vector.load %arg3[%c0_4, %c0_5] : memref<128x512xf32, #tpu.memory_space<vmem>>, vector<128x512xf32>
    %cst = arith.constant dense<0.000000e+00> : vector<64x512xf32>
    %6 = tpu.matmul %4, %5, %cst {dimension_numbers = #tpu.dot_dimension_numbers<[1], [0], [0], [1], [0, 0, 1, 1], [], []>} : vector<64x128xf32>, vector<128x512xf32>, vector<64x512xf32> -> vector<64x512xf32>
    %c0_6 = arith.constant 0 : index
    %c0_7 = arith.constant 0 : index
    %7 = vector.load %arg5[%c0_6, %c0_7] : memref<1x512xf32, #tpu.memory_space<vmem>>, vector<1x512xf32>
    %8 = vector.broadcast %7 : vector<1x512xf32> to vector<64x512xf32>
    %9 = arith.addf %6, %8 : vector<64x512xf32>
    %c0_8 = arith.constant 0 : index
    %c0_9 = arith.constant 0 : index
    %10 = vector.load %arg12[%c0_8, %c0_9] : memref<64x512xf32, #tpu.memory_space<vmem>>, vector<64x512xf32>
    tpu.vector_store %arg12[%c0_8, %c0_9], %9 {strides = array<i32>} : memref<64x512xf32, #tpu.memory_space<vmem>>, vector<64x512xf32>,
    %c0_10 = arith.constant 0 : index
    %c0_11 = arith.constant 0 : index
    %11 = vector.load %arg10[%c0_10, %c0_11] : memref<8x128xf32, #tpu.memory_space<vmem>>, vector<8x128xf32>
    %c0_12 = arith.constant 0 : index
    %c0_13 = arith.constant 0 : index
    %12 = vector.load %arg11[%c0_12, %c0_13] : memref<8x128xf32, #tpu.memory_space<vmem>>, vector<8x128xf32>
    %c0_i32_14 = arith.constant 0 : i32
    %c8_i32 = arith.constant 8 : i32
    %13 = arith.muli %c0_i32_14, %c8_i32 : i32
    %14 = arith.index_cast %13 : i32 to index
    %c0_15 = arith.constant 0 : index
    %15 = vector.load %arg12[%14, %c0_15] : memref<64x512xf32, #tpu.memory_space<vmem>>, vector<8x512xf32>
    %c0_16 = arith.constant 0 : index
    %c0_17 = arith.constant 0 : index
    %16 = vector.load %arg4[%c0_16, %c0_17] : memref<128x512xf32, #tpu.memory_space<vmem>>, vector<128x512xf32>
    %cst_18 = arith.constant dense<0.000000e+00> : vector<8x512xf32>
    %17 = tpu.matmul %11, %16, %cst_18 {dimension_numbers = #tpu.dot_dimension_numbers<[1], [0], [0], [1], [0, 0, 1, 1], [], []>} : vector<8x128xf32>, vector<128x512xf32>, vector<8x512xf32> -> vector<8x512xf32>
    %18 = arith.addf %15, %17 : vector<8x512xf32>
    %c0_19 = arith.constant 0 : index
    %c0_20 = arith.constant 0 : index
    %19 = vector.load %arg13[%c0_19, %c0_20] : memref<8x512xf32, #tpu.memory_space<vmem>>, vector<8x512xf32>
    tpu.vector_store %arg13[%c0_19, %c0_20], %18 {strides = array<i32>} : memref<8x512xf32, #tpu.memory_space<vmem>>, vector<8x512xf32>,
    %c0_21 = arith.constant 0 : index
    %c0_22 = arith.constant 0 : index
    %20 = vector.load %arg13[%c0_21, %c0_22] : memref<8x512xf32, #tpu.memory_space<vmem>>, vector<8x128xf32>
    %cst_23 = arith.constant 5.000000e-01 : f32
    %21 = vector.broadcast %cst_23 : f32 to vector<8x128xf32>
    %22 = arith.mulf %21, %20 : vector<8x128xf32>
    %23 = math.tanh %22 : vector<8x128xf32>
    %cst_24 = arith.constant 5.000000e-01 : f32
    %24 = vector.broadcast %cst_24 : f32 to vector<8x128xf32>
    %25 = arith.mulf %24, %23 : vector<8x128xf32>
    %cst_25 = arith.constant 5.000000e-01 : f32
    %26 = vector.broadcast %cst_25 : f32 to vector<8x128xf32>
    %27 = arith.addf %25, %26 : vector<8x128xf32>
    %c0_26 = arith.constant 0 : index
    %c128 = arith.constant 128 : index
    %28 = vector.load %arg13[%c0_26, %c128] : memref<8x512xf32, #tpu.memory_space<vmem>>, vector<8x128xf32>
    %cst_27 = arith.constant 5.000000e-01 : f32
    %29 = vector.broadcast %cst_27 : f32 to vector<8x128xf32>
    %30 = arith.mulf %29, %28 : vector<8x128xf32>
    %31 = math.tanh %30 : vector<8x128xf32>
    %cst_28 = arith.constant 5.000000e-01 : f32
    %32 = vector.broadcast %cst_28 : f32 to vector<8x128xf32>
    %33 = arith.mulf %32, %31 : vector<8x128xf32>
    %cst_29 = arith.constant 5.000000e-01 : f32
    %34 = vector.broadcast %cst_29 : f32 to vector<8x128xf32>
    %35 = arith.addf %33, %34 : vector<8x128xf32>
    %c0_30 = arith.constant 0 : index
    %c256 = arith.constant 256 : index
    %36 = vector.load %arg13[%c0_30, %c256] : memref<8x512xf32, #tpu.memory_space<vmem>>, vector<8x128xf32>
    %37 = math.tanh %36 : vector<8x128xf32>
    %c0_31 = arith.constant 0 : index
    %c384 = arith.constant 384 : index
    %38 = vector.load %arg13[%c0_31, %c384] : memref<8x512xf32, #tpu.memory_space<vmem>>, vector<8x128xf32>
    %cst_32 = arith.constant 5.000000e-01 : f32
    %39 = vector.broadcast %cst_32 : f32 to vector<8x128xf32>
    %40 = arith.mulf %39, %38 : vector<8x128xf32>
    %41 = math.tanh %40 : vector<8x128xf32>
    %cst_33 = arith.constant 5.000000e-01 : f32
    %42 = vector.broadcast %cst_33 : f32 to vector<8x128xf32>
    %43 = arith.mulf %42, %41 : vector<8x128xf32>
    %cst_34 = arith.constant 5.000000e-01 : f32
    %44 = vector.broadcast %cst_34 : f32 to vector<8x128xf32>
    %45 = arith.addf %43, %44 : vector<8x128xf32>
    %46 = arith.mulf %35, %12 : vector<8x128xf32>
    %47 = arith.mulf %27, %37 : vector<8x128xf32>
    %48 = arith.addf %46, %47 : vector<8x128xf32>
    %49 = math.tanh %48 : vector<8x128xf32>
    %50 = arith.mulf %45, %49 : vector<8x128xf32>
    %c1_i32 = arith.constant 1 : i32
    %c8_i32_35 = arith.constant 8 : i32
    %51 = arith.muli %c1_i32, %c8_i32_35 : i32
    %52 = arith.index_cast %51 : i32 to index
    %c0_36 = arith.constant 0 : index
    %53 = vector.load %arg12[%52, %c0_36] : memref<64x512xf32, #tpu.memory_space<vmem>>, vector<8x512xf32>
    %c0_37 = arith.constant 0 : index
    %c0_38 = arith.constant 0 : index
    %54 = vector.load %arg4[%c0_37, %c0_38] : memref<128x512xf32, #tpu.memory_space<vmem>>, vector<128x512xf32>
    %cst_39 = arith.constant dense<0.000000e+00> : vector<8x512xf32>
    %55 = tpu.matmul %50, %54, %cst_39 {dimension_numbers = #tpu.dot_dimension_numbers<[1], [0], [0], [1], [0, 0, 1, 1], [], []>} : vector<8x128xf32>, vector<128x512xf32>, vector<8x512xf32> -> vector<8x512xf32>
    %56 = arith.addf %53, %55 : vector<8x512xf32>
    %c0_40 = arith.constant 0 : index
    %c0_41 = arith.constant 0 : index
    %57 = vector.load %arg13[%c0_40, %c0_41] : memref<8x512xf32, #tpu.memory_space<vmem>>, vector<8x512xf32>
    tpu.vector_store %arg13[%c0_40, %c0_41], %56 {strides = array<i32>} : memref<8x512xf32, #tpu.memory_space<vmem>>, vector<8x512xf32>,
    %c0_42 = arith.constant 0 : index
    %c0_43 = arith.constant 0 : index
    %58 = vector.load %arg13[%c0_42, %c0_43] : memref<8x512xf32, #tpu.memory_space<vmem>>, vector<8x128xf32>
    %cst_44 = arith.constant 5.000000e-01 : f32
    %59 = vector.broadcast %cst_44 : f32 to vector<8x128xf32>
    %60 = arith.mulf %59, %58 : vector<8x128xf32>
    %61 = math.tanh %60 : vector<8x128xf32>
    %cst_45 = arith.constant 5.000000e-01 : f32
    %62 = vector.broadcast %cst_45 : f32 to vector<8x128xf32>
    %63 = arith.mulf %62, %61 : vector<8x128xf32>
    %cst_46 = arith.constant 5.000000e-01 : f32
    %64 = vector.broadcast %cst_46 : f32 to vector<8x128xf32>
    %65 = arith.addf %63, %64 : vector<8x128xf32>
    %c0_47 = arith.constant 0 : index
    %c128_48 = arith.constant 128 : index
    %66 = vector.load %arg13[%c0_47, %c128_48] : memref<8x512xf32, #tpu.memory_space<vmem>>, vector<8x128xf32>
    %cst_49 = arith.constant 5.000000e-01 : f32
    %67 = vector.broadcast %cst_49 : f32 to vector<8x128xf32>
    %68 = arith.mulf %67, %66 : vector<8x128xf32>
    %69 = math.tanh %68 : vector<8x128xf32>
    %cst_50 = arith.constant 5.000000e-01 : f32
    %70 = vector.broadcast %cst_50 : f32 to vector<8x128xf32>
    %71 = arith.mulf %70, %69 : vector<8x128xf32>
    %cst_51 = arith.constant 5.000000e-01 : f32
    %72 = vector.broadcast %cst_51 : f32 to vector<8x128xf32>
    %73 = arith.addf %71, %72 : vector<8x128xf32>
    %c0_52 = arith.constant 0 : index
    %c256_53 = arith.constant 256 : index
    %74 = vector.load %arg13[%c0_52, %c256_53] : memref<8x512xf32, #tpu.memory_space<vmem>>, vector<8x128xf32>
    %75 = math.tanh %74 : vector<8x128xf32>
    %c0_54 = arith.constant 0 : index
    %c384_55 = arith.constant 384 : index
    %76 = vector.load %arg13[%c0_54, %c384_55] : memref<8x512xf32, #tpu.memory_space<vmem>>, vector<8x128xf32>
    %cst_56 = arith.constant 5.000000e-01 : f32
    %77 = vector.broadcast %cst_56 : f32 to vector<8x128xf32>
    %78 = arith.mulf %77, %76 : vector<8x128xf32>
    %79 = math.tanh %78 : vector<8x128xf32>
    %cst_57 = arith.constant 5.000000e-01 : f32
    %80 = vector.broadcast %cst_57 : f32 to vector<8x128xf32>
    %81 = arith.mulf %80, %79 : vector<8x128xf32>
    %cst_58 = arith.constant 5.000000e-01 : f32
    %82 = vector.broadcast %cst_58 : f32 to vector<8x128xf32>
    %83 = arith.addf %81, %82 : vector<8x128xf32>
    %84 = arith.mulf %73, %48 : vector<8x128xf32>
    %85 = arith.mulf %65, %75 : vector<8x128xf32>
    %86 = arith.addf %84, %85 : vector<8x128xf32>
    %87 = math.tanh %86 : vector<8x128xf32>
    %88 = arith.mulf %83, %87 : vector<8x128xf32>
    %c2_i32 = arith.constant 2 : i32
    %c8_i32_59 = arith.constant 8 : i32
    %89 = arith.muli %c2_i32, %c8_i32_59 : i32
    %90 = arith.index_cast %89 : i32 to index
    %c0_60 = arith.constant 0 : index
    %91 = vector.load %arg12[%90, %c0_60] : memref<64x512xf32, #tpu.memory_space<vmem>>, vector<8x512xf32>
    %c0_61 = arith.constant 0 : index
    %c0_62 = arith.constant 0 : index
    %92 = vector.load %arg4[%c0_61, %c0_62] : memref<128x512xf32, #tpu.memory_space<vmem>>, vector<128x512xf32>
    %cst_63 = arith.constant dense<0.000000e+00> : vector<8x512xf32>
    %93 = tpu.matmul %88, %92, %cst_63 {dimension_numbers = #tpu.dot_dimension_numbers<[1], [0], [0], [1], [0, 0, 1, 1], [], []>} : vector<8x128xf32>, vector<128x512xf32>, vector<8x512xf32> -> vector<8x512xf32>
    %94 = arith.addf %91, %93 : vector<8x512xf32>
    %c0_64 = arith.constant 0 : index
    %c0_65 = arith.constant 0 : index
    %95 = vector.load %arg13[%c0_64, %c0_65] : memref<8x512xf32, #tpu.memory_space<vmem>>, vector<8x512xf32>
    tpu.vector_store %arg13[%c0_64, %c0_65], %94 {strides = array<i32>} : memref<8x512xf32, #tpu.memory_space<vmem>>, vector<8x512xf32>,
    %c0_66 = arith.constant 0 : index
    %c0_67 = arith.constant 0 : index
    %96 = vector.load %arg13[%c0_66, %c0_67] : memref<8x512xf32, #tpu.memory_space<vmem>>, vector<8x128xf32>
    %cst_68 = arith.constant 5.000000e-01 : f32
    %97 = vector.broadcast %cst_68 : f32 to vector<8x128xf32>
    %98 = arith.mulf %97, %96 : vector<8x128xf32>
    %99 = math.tanh %98 : vector<8x128xf32>
    %cst_69 = arith.constant 5.000000e-01 : f32
    %100 = vector.broadcast %cst_69 : f32 to vector<8x128xf32>
    %101 = arith.mulf %100, %99 : vector<8x128xf32>
    %cst_70 = arith.constant 5.000000e-01 : f32
    %102 = vector.broadcast %cst_70 : f32 to vector<8x128xf32>
    %103 = arith.addf %101, %102 : vector<8x128xf32>
    %c0_71 = arith.constant 0 : index
    %c128_72 = arith.constant 128 : index
    %104 = vector.load %arg13[%c0_71, %c128_72] : memref<8x512xf32, #tpu.memory_space<vmem>>, vector<8x128xf32>
    %cst_73 = arith.constant 5.000000e-01 : f32
    %105 = vector.broadcast %cst_73 : f32 to vector<8x128xf32>
    %106 = arith.mulf %105, %104 : vector<8x128xf32>
    %107 = math.tanh %106 : vector<8x128xf32>
    %cst_74 = arith.constant 5.000000e-01 : f32
    %108 = vector.broadcast %cst_74 : f32 to vector<8x128xf32>
    %109 = arith.mulf %108, %107 : vector<8x128xf32>
    %cst_75 = arith.constant 5.000000e-01 : f32
    %110 = vector.broadcast %cst_75 : f32 to vector<8x128xf32>
    %111 = arith.addf %109, %110 : vector<8x128xf32>
    %c0_76 = arith.constant 0 : index
    %c256_77 = arith.constant 256 : index
    %112 = vector.load %arg13[%c0_76, %c256_77] : memref<8x512xf32, #tpu.memory_space<vmem>>, vector<8x128xf32>
    %113 = math.tanh %112 : vector<8x128xf32>
    %c0_78 = arith.constant 0 : index
    %c384_79 = arith.constant 384 : index
    %114 = vector.load %arg13[%c0_78, %c384_79] : memref<8x512xf32, #tpu.memory_space<vmem>>, vector<8x128xf32>
    %cst_80 = arith.constant 5.000000e-01 : f32
    %115 = vector.broadcast %cst_80 : f32 to vector<8x128xf32>
    %116 = arith.mulf %115, %114 : vector<8x128xf32>
    %117 = math.tanh %116 : vector<8x128xf32>
    %cst_81 = arith.constant 5.000000e-01 : f32
    %118 = vector.broadcast %cst_81 : f32 to vector<8x128xf32>
    %119 = arith.mulf %118, %117 : vector<8x128xf32>
    %cst_82 = arith.constant 5.000000e-01 : f32
    %120 = vector.broadcast %cst_82 : f32 to vector<8x128xf32>
    %121 = arith.addf %119, %120 : vector<8x128xf32>
    %122 = arith.mulf %111, %86 : vector<8x128xf32>
    %123 = arith.mulf %103, %113 : vector<8x128xf32>
    %124 = arith.addf %122, %123 : vector<8x128xf32>
    %125 = math.tanh %124 : vector<8x128xf32>
    %126 = arith.mulf %121, %125 : vector<8x128xf32>
    %c3_i32 = arith.constant 3 : i32
    %c8_i32_83 = arith.constant 8 : i32
    %127 = arith.muli %c3_i32, %c8_i32_83 : i32
    %128 = arith.index_cast %127 : i32 to index
    %c0_84 = arith.constant 0 : index
    %129 = vector.load %arg12[%128, %c0_84] : memref<64x512xf32, #tpu.memory_space<vmem>>, vector<8x512xf32>
    %c0_85 = arith.constant 0 : index
    %c0_86 = arith.constant 0 : index
    %130 = vector.load %arg4[%c0_85, %c0_86] : memref<128x512xf32, #tpu.memory_space<vmem>>, vector<128x512xf32>
    %cst_87 = arith.constant dense<0.000000e+00> : vector<8x512xf32>
    %131 = tpu.matmul %126, %130, %cst_87 {dimension_numbers = #tpu.dot_dimension_numbers<[1], [0], [0], [1], [0, 0, 1, 1], [], []>} : vector<8x128xf32>, vector<128x512xf32>, vector<8x512xf32> -> vector<8x512xf32>
    %132 = arith.addf %129, %131 : vector<8x512xf32>
    %c0_88 = arith.constant 0 : index
    %c0_89 = arith.constant 0 : index
    %133 = vector.load %arg13[%c0_88, %c0_89] : memref<8x512xf32, #tpu.memory_space<vmem>>, vector<8x512xf32>
    tpu.vector_store %arg13[%c0_88, %c0_89], %132 {strides = array<i32>} : memref<8x512xf32, #tpu.memory_space<vmem>>, vector<8x512xf32>,
    %c0_90 = arith.constant 0 : index
    %c0_91 = arith.constant 0 : index
    %134 = vector.load %arg13[%c0_90, %c0_91] : memref<8x512xf32, #tpu.memory_space<vmem>>, vector<8x128xf32>
    %cst_92 = arith.constant 5.000000e-01 : f32
    %135 = vector.broadcast %cst_92 : f32 to vector<8x128xf32>
    %136 = arith.mulf %135, %134 : vector<8x128xf32>
    %137 = math.tanh %136 : vector<8x128xf32>
    %cst_93 = arith.constant 5.000000e-01 : f32
    %138 = vector.broadcast %cst_93 : f32 to vector<8x128xf32>
    %139 = arith.mulf %138, %137 : vector<8x128xf32>
    %cst_94 = arith.constant 5.000000e-01 : f32
    %140 = vector.broadcast %cst_94 : f32 to vector<8x128xf32>
    %141 = arith.addf %139, %140 : vector<8x128xf32>
    %c0_95 = arith.constant 0 : index
    %c128_96 = arith.constant 128 : index
    %142 = vector.load %arg13[%c0_95, %c128_96] : memref<8x512xf32, #tpu.memory_space<vmem>>, vector<8x128xf32>
    %cst_97 = arith.constant 5.000000e-01 : f32
    %143 = vector.broadcast %cst_97 : f32 to vector<8x128xf32>
    %144 = arith.mulf %143, %142 : vector<8x128xf32>
    %145 = math.tanh %144 : vector<8x128xf32>
    %cst_98 = arith.constant 5.000000e-01 : f32
    %146 = vector.broadcast %cst_98 : f32 to vector<8x128xf32>
    %147 = arith.mulf %146, %145 : vector<8x128xf32>
    %cst_99 = arith.constant 5.000000e-01 : f32
    %148 = vector.broadcast %cst_99 : f32 to vector<8x128xf32>
    %149 = arith.addf %147, %148 : vector<8x128xf32>
    %c0_100 = arith.constant 0 : index
    %c256_101 = arith.constant 256 : index
    %150 = vector.load %arg13[%c0_100, %c256_101] : memref<8x512xf32, #tpu.memory_space<vmem>>, vector<8x128xf32>
    %151 = math.tanh %150 : vector<8x128xf32>
    %c0_102 = arith.constant 0 : index
    %c384_103 = arith.constant 384 : index
    %152 = vector.load %arg13[%c0_102, %c384_103] : memref<8x512xf32, #tpu.memory_space<vmem>>, vector<8x128xf32>
    %cst_104 = arith.constant 5.000000e-01 : f32
    %153 = vector.broadcast %cst_104 : f32 to vector<8x128xf32>
    %154 = arith.mulf %153, %152 : vector<8x128xf32>
    %155 = math.tanh %154 : vector<8x128xf32>
    %cst_105 = arith.constant 5.000000e-01 : f32
    %156 = vector.broadcast %cst_105 : f32 to vector<8x128xf32>
    %157 = arith.mulf %156, %155 : vector<8x128xf32>
    %cst_106 = arith.constant 5.000000e-01 : f32
    %158 = vector.broadcast %cst_106 : f32 to vector<8x128xf32>
    %159 = arith.addf %157, %158 : vector<8x128xf32>
    %160 = arith.mulf %149, %124 : vector<8x128xf32>
    %161 = arith.mulf %141, %151 : vector<8x128xf32>
    %162 = arith.addf %160, %161 : vector<8x128xf32>
    %163 = math.tanh %162 : vector<8x128xf32>
    %164 = arith.mulf %159, %163 : vector<8x128xf32>
    %c4_i32 = arith.constant 4 : i32
    %c8_i32_107 = arith.constant 8 : i32
    %165 = arith.muli %c4_i32, %c8_i32_107 : i32
    %166 = arith.index_cast %165 : i32 to index
    %c0_108 = arith.constant 0 : index
    %167 = vector.load %arg12[%166, %c0_108] : memref<64x512xf32, #tpu.memory_space<vmem>>, vector<8x512xf32>
    %c0_109 = arith.constant 0 : index
    %c0_110 = arith.constant 0 : index
    %168 = vector.load %arg4[%c0_109, %c0_110] : memref<128x512xf32, #tpu.memory_space<vmem>>, vector<128x512xf32>
    %cst_111 = arith.constant dense<0.000000e+00> : vector<8x512xf32>
    %169 = tpu.matmul %164, %168, %cst_111 {dimension_numbers = #tpu.dot_dimension_numbers<[1], [0], [0], [1], [0, 0, 1, 1], [], []>} : vector<8x128xf32>, vector<128x512xf32>, vector<8x512xf32> -> vector<8x512xf32>
    %170 = arith.addf %167, %169 : vector<8x512xf32>
    %c0_112 = arith.constant 0 : index
    %c0_113 = arith.constant 0 : index
    %171 = vector.load %arg13[%c0_112, %c0_113] : memref<8x512xf32, #tpu.memory_space<vmem>>, vector<8x512xf32>
    tpu.vector_store %arg13[%c0_112, %c0_113], %170 {strides = array<i32>} : memref<8x512xf32, #tpu.memory_space<vmem>>, vector<8x512xf32>,
    %c0_114 = arith.constant 0 : index
    %c0_115 = arith.constant 0 : index
    %172 = vector.load %arg13[%c0_114, %c0_115] : memref<8x512xf32, #tpu.memory_space<vmem>>, vector<8x128xf32>
    %cst_116 = arith.constant 5.000000e-01 : f32
    %173 = vector.broadcast %cst_116 : f32 to vector<8x128xf32>
    %174 = arith.mulf %173, %172 : vector<8x128xf32>
    %175 = math.tanh %174 : vector<8x128xf32>
    %cst_117 = arith.constant 5.000000e-01 : f32
    %176 = vector.broadcast %cst_117 : f32 to vector<8x128xf32>
    %177 = arith.mulf %176, %175 : vector<8x128xf32>
    %cst_118 = arith.constant 5.000000e-01 : f32
    %178 = vector.broadcast %cst_118 : f32 to vector<8x128xf32>
    %179 = arith.addf %177, %178 : vector<8x128xf32>
    %c0_119 = arith.constant 0 : index
    %c128_120 = arith.constant 128 : index
    %180 = vector.load %arg13[%c0_119, %c128_120] : memref<8x512xf32, #tpu.memory_space<vmem>>, vector<8x128xf32>
    %cst_121 = arith.constant 5.000000e-01 : f32
    %181 = vector.broadcast %cst_121 : f32 to vector<8x128xf32>
    %182 = arith.mulf %181, %180 : vector<8x128xf32>
    %183 = math.tanh %182 : vector<8x128xf32>
    %cst_122 = arith.constant 5.000000e-01 : f32
    %184 = vector.broadcast %cst_122 : f32 to vector<8x128xf32>
    %185 = arith.mulf %184, %183 : vector<8x128xf32>
    %cst_123 = arith.constant 5.000000e-01 : f32
    %186 = vector.broadcast %cst_123 : f32 to vector<8x128xf32>
    %187 = arith.addf %185, %186 : vector<8x128xf32>
    %c0_124 = arith.constant 0 : index
    %c256_125 = arith.constant 256 : index
    %188 = vector.load %arg13[%c0_124, %c256_125] : memref<8x512xf32, #tpu.memory_space<vmem>>, vector<8x128xf32>
    %189 = math.tanh %188 : vector<8x128xf32>
    %c0_126 = arith.constant 0 : index
    %c384_127 = arith.constant 384 : index
    %190 = vector.load %arg13[%c0_126, %c384_127] : memref<8x512xf32, #tpu.memory_space<vmem>>, vector<8x128xf32>
    %cst_128 = arith.constant 5.000000e-01 : f32
    %191 = vector.broadcast %cst_128 : f32 to vector<8x128xf32>
    %192 = arith.mulf %191, %190 : vector<8x128xf32>
    %193 = math.tanh %192 : vector<8x128xf32>
    %cst_129 = arith.constant 5.000000e-01 : f32
    %194 = vector.broadcast %cst_129 : f32 to vector<8x128xf32>
    %195 = arith.mulf %194, %193 : vector<8x128xf32>
    %cst_130 = arith.constant 5.000000e-01 : f32
    %196 = vector.broadcast %cst_130 : f32 to vector<8x128xf32>
    %197 = arith.addf %195, %196 : vector<8x128xf32>
    %198 = arith.mulf %187, %162 : vector<8x128xf32>
    %199 = arith.mulf %179, %189 : vector<8x128xf32>
    %200 = arith.addf %198, %199 : vector<8x128xf32>
    %201 = math.tanh %200 : vector<8x128xf32>
    %202 = arith.mulf %197, %201 : vector<8x128xf32>
    %c5_i32 = arith.constant 5 : i32
    %c8_i32_131 = arith.constant 8 : i32
    %203 = arith.muli %c5_i32, %c8_i32_131 : i32
    %204 = arith.index_cast %203 : i32 to index
    %c0_132 = arith.constant 0 : index
    %205 = vector.load %arg12[%204, %c0_132] : memref<64x512xf32, #tpu.memory_space<vmem>>, vector<8x512xf32>
    %c0_133 = arith.constant 0 : index
    %c0_134 = arith.constant 0 : index
    %206 = vector.load %arg4[%c0_133, %c0_134] : memref<128x512xf32, #tpu.memory_space<vmem>>, vector<128x512xf32>
    %cst_135 = arith.constant dense<0.000000e+00> : vector<8x512xf32>
    %207 = tpu.matmul %202, %206, %cst_135 {dimension_numbers = #tpu.dot_dimension_numbers<[1], [0], [0], [1], [0, 0, 1, 1], [], []>} : vector<8x128xf32>, vector<128x512xf32>, vector<8x512xf32> -> vector<8x512xf32>
    %208 = arith.addf %205, %207 : vector<8x512xf32>
    %c0_136 = arith.constant 0 : index
    %c0_137 = arith.constant 0 : index
    %209 = vector.load %arg13[%c0_136, %c0_137] : memref<8x512xf32, #tpu.memory_space<vmem>>, vector<8x512xf32>
    tpu.vector_store %arg13[%c0_136, %c0_137], %208 {strides = array<i32>} : memref<8x512xf32, #tpu.memory_space<vmem>>, vector<8x512xf32>,
    %c0_138 = arith.constant 0 : index
    %c0_139 = arith.constant 0 : index
    %210 = vector.load %arg13[%c0_138, %c0_139] : memref<8x512xf32, #tpu.memory_space<vmem>>, vector<8x128xf32>
    %cst_140 = arith.constant 5.000000e-01 : f32
    %211 = vector.broadcast %cst_140 : f32 to vector<8x128xf32>
    %212 = arith.mulf %211, %210 : vector<8x128xf32>
    %213 = math.tanh %212 : vector<8x128xf32>
    %cst_141 = arith.constant 5.000000e-01 : f32
    %214 = vector.broadcast %cst_141 : f32 to vector<8x128xf32>
    %215 = arith.mulf %214, %213 : vector<8x128xf32>
    %cst_142 = arith.constant 5.000000e-01 : f32
    %216 = vector.broadcast %cst_142 : f32 to vector<8x128xf32>
    %217 = arith.addf %215, %216 : vector<8x128xf32>
    %c0_143 = arith.constant 0 : index
    %c128_144 = arith.constant 128 : index
    %218 = vector.load %arg13[%c0_143, %c128_144] : memref<8x512xf32, #tpu.memory_space<vmem>>, vector<8x128xf32>
    %cst_145 = arith.constant 5.000000e-01 : f32
    %219 = vector.broadcast %cst_145 : f32 to vector<8x128xf32>
    %220 = arith.mulf %219, %218 : vector<8x128xf32>
    %221 = math.tanh %220 : vector<8x128xf32>
    %cst_146 = arith.constant 5.000000e-01 : f32
    %222 = vector.broadcast %cst_146 : f32 to vector<8x128xf32>
    %223 = arith.mulf %222, %221 : vector<8x128xf32>
    %cst_147 = arith.constant 5.000000e-01 : f32
    %224 = vector.broadcast %cst_147 : f32 to vector<8x128xf32>
    %225 = arith.addf %223, %224 : vector<8x128xf32>
    %c0_148 = arith.constant 0 : index
    %c256_149 = arith.constant 256 : index
    %226 = vector.load %arg13[%c0_148, %c256_149] : memref<8x512xf32, #tpu.memory_space<vmem>>, vector<8x128xf32>
    %227 = math.tanh %226 : vector<8x128xf32>
    %c0_150 = arith.constant 0 : index
    %c384_151 = arith.constant 384 : index
    %228 = vector.load %arg13[%c0_150, %c384_151] : memref<8x512xf32, #tpu.memory_space<vmem>>, vector<8x128xf32>
    %cst_152 = arith.constant 5.000000e-01 : f32
    %229 = vector.broadcast %cst_152 : f32 to vector<8x128xf32>
    %230 = arith.mulf %229, %228 : vector<8x128xf32>
    %231 = math.tanh %230 : vector<8x128xf32>
    %cst_153 = arith.constant 5.000000e-01 : f32
    %232 = vector.broadcast %cst_153 : f32 to vector<8x128xf32>
    %233 = arith.mulf %232, %231 : vector<8x128xf32>
    %cst_154 = arith.constant 5.000000e-01 : f32
    %234 = vector.broadcast %cst_154 : f32 to vector<8x128xf32>
    %235 = arith.addf %233, %234 : vector<8x128xf32>
    %236 = arith.mulf %225, %200 : vector<8x128xf32>
    %237 = arith.mulf %217, %227 : vector<8x128xf32>
    %238 = arith.addf %236, %237 : vector<8x128xf32>
    %239 = math.tanh %238 : vector<8x128xf32>
    %240 = arith.mulf %235, %239 : vector<8x128xf32>
    %c6_i32 = arith.constant 6 : i32
    %c8_i32_155 = arith.constant 8 : i32
    %241 = arith.muli %c6_i32, %c8_i32_155 : i32
    %242 = arith.index_cast %241 : i32 to index
    %c0_156 = arith.constant 0 : index
    %243 = vector.load %arg12[%242, %c0_156] : memref<64x512xf32, #tpu.memory_space<vmem>>, vector<8x512xf32>
    %c0_157 = arith.constant 0 : index
    %c0_158 = arith.constant 0 : index
    %244 = vector.load %arg4[%c0_157, %c0_158] : memref<128x512xf32, #tpu.memory_space<vmem>>, vector<128x512xf32>
    %cst_159 = arith.constant dense<0.000000e+00> : vector<8x512xf32>
    %245 = tpu.matmul %240, %244, %cst_159 {dimension_numbers = #tpu.dot_dimension_numbers<[1], [0], [0], [1], [0, 0, 1, 1], [], []>} : vector<8x128xf32>, vector<128x512xf32>, vector<8x512xf32> -> vector<8x512xf32>
    %246 = arith.addf %243, %245 : vector<8x512xf32>
    %c0_160 = arith.constant 0 : index
    %c0_161 = arith.constant 0 : index
    %247 = vector.load %arg13[%c0_160, %c0_161] : memref<8x512xf32, #tpu.memory_space<vmem>>, vector<8x512xf32>
    tpu.vector_store %arg13[%c0_160, %c0_161], %246 {strides = array<i32>} : memref<8x512xf32, #tpu.memory_space<vmem>>, vector<8x512xf32>,
    %c0_162 = arith.constant 0 : index
    %c0_163 = arith.constant 0 : index
    %248 = vector.load %arg13[%c0_162, %c0_163] : memref<8x512xf32, #tpu.memory_space<vmem>>, vector<8x128xf32>
    %cst_164 = arith.constant 5.000000e-01 : f32
    %249 = vector.broadcast %cst_164 : f32 to vector<8x128xf32>
    %250 = arith.mulf %249, %248 : vector<8x128xf32>
    %251 = math.tanh %250 : vector<8x128xf32>
    %cst_165 = arith.constant 5.000000e-01 : f32
    %252 = vector.broadcast %cst_165 : f32 to vector<8x128xf32>
    %253 = arith.mulf %252, %251 : vector<8x128xf32>
    %cst_166 = arith.constant 5.000000e-01 : f32
    %254 = vector.broadcast %cst_166 : f32 to vector<8x128xf32>
    %255 = arith.addf %253, %254 : vector<8x128xf32>
    %c0_167 = arith.constant 0 : index
    %c128_168 = arith.constant 128 : index
    %256 = vector.load %arg13[%c0_167, %c128_168] : memref<8x512xf32, #tpu.memory_space<vmem>>, vector<8x128xf32>
    %cst_169 = arith.constant 5.000000e-01 : f32
    %257 = vector.broadcast %cst_169 : f32 to vector<8x128xf32>
    %258 = arith.mulf %257, %256 : vector<8x128xf32>
    %259 = math.tanh %258 : vector<8x128xf32>
    %cst_170 = arith.constant 5.000000e-01 : f32
    %260 = vector.broadcast %cst_170 : f32 to vector<8x128xf32>
    %261 = arith.mulf %260, %259 : vector<8x128xf32>
    %cst_171 = arith.constant 5.000000e-01 : f32
    %262 = vector.broadcast %cst_171 : f32 to vector<8x128xf32>
    %263 = arith.addf %261, %262 : vector<8x128xf32>
    %c0_172 = arith.constant 0 : index
    %c256_173 = arith.constant 256 : index
    %264 = vector.load %arg13[%c0_172, %c256_173] : memref<8x512xf32, #tpu.memory_space<vmem>>, vector<8x128xf32>
    %265 = math.tanh %264 : vector<8x128xf32>
    %c0_174 = arith.constant 0 : index
    %c384_175 = arith.constant 384 : index
    %266 = vector.load %arg13[%c0_174, %c384_175] : memref<8x512xf32, #tpu.memory_space<vmem>>, vector<8x128xf32>
    %cst_176 = arith.constant 5.000000e-01 : f32
    %267 = vector.broadcast %cst_176 : f32 to vector<8x128xf32>
    %268 = arith.mulf %267, %266 : vector<8x128xf32>
    %269 = math.tanh %268 : vector<8x128xf32>
    %cst_177 = arith.constant 5.000000e-01 : f32
    %270 = vector.broadcast %cst_177 : f32 to vector<8x128xf32>
    %271 = arith.mulf %270, %269 : vector<8x128xf32>
    %cst_178 = arith.constant 5.000000e-01 : f32
    %272 = vector.broadcast %cst_178 : f32 to vector<8x128xf32>
    %273 = arith.addf %271, %272 : vector<8x128xf32>
    %274 = arith.mulf %263, %238 : vector<8x128xf32>
    %275 = arith.mulf %255, %265 : vector<8x128xf32>
    %276 = arith.addf %274, %275 : vector<8x128xf32>
    %277 = math.tanh %276 : vector<8x128xf32>
    %278 = arith.mulf %273, %277 : vector<8x128xf32>
    %c7_i32 = arith.constant 7 : i32
    %c8_i32_179 = arith.constant 8 : i32
    %279 = arith.muli %c7_i32, %c8_i32_179 : i32
    %280 = arith.index_cast %279 : i32 to index
    %c0_180 = arith.constant 0 : index
    %281 = vector.load %arg12[%280, %c0_180] : memref<64x512xf32, #tpu.memory_space<vmem>>, vector<8x512xf32>
    %c0_181 = arith.constant 0 : index
    %c0_182 = arith.constant 0 : index
    %282 = vector.load %arg4[%c0_181, %c0_182] : memref<128x512xf32, #tpu.memory_space<vmem>>, vector<128x512xf32>
    %cst_183 = arith.constant dense<0.000000e+00> : vector<8x512xf32>
    %283 = tpu.matmul %278, %282, %cst_183 {dimension_numbers = #tpu.dot_dimension_numbers<[1], [0], [0], [1], [0, 0, 1, 1], [], []>} : vector<8x128xf32>, vector<128x512xf32>, vector<8x512xf32> -> vector<8x512xf32>
    %284 = arith.addf %281, %283 : vector<8x512xf32>
    %c0_184 = arith.constant 0 : index
    %c0_185 = arith.constant 0 : index
    %285 = vector.load %arg13[%c0_184, %c0_185] : memref<8x512xf32, #tpu.memory_space<vmem>>, vector<8x512xf32>
    tpu.vector_store %arg13[%c0_184, %c0_185], %284 {strides = array<i32>} : memref<8x512xf32, #tpu.memory_space<vmem>>, vector<8x512xf32>,
    %c0_186 = arith.constant 0 : index
    %c0_187 = arith.constant 0 : index
    %286 = vector.load %arg13[%c0_186, %c0_187] : memref<8x512xf32, #tpu.memory_space<vmem>>, vector<8x128xf32>
    %cst_188 = arith.constant 5.000000e-01 : f32
    %287 = vector.broadcast %cst_188 : f32 to vector<8x128xf32>
    %288 = arith.mulf %287, %286 : vector<8x128xf32>
    %289 = math.tanh %288 : vector<8x128xf32>
    %cst_189 = arith.constant 5.000000e-01 : f32
    %290 = vector.broadcast %cst_189 : f32 to vector<8x128xf32>
    %291 = arith.mulf %290, %289 : vector<8x128xf32>
    %cst_190 = arith.constant 5.000000e-01 : f32
    %292 = vector.broadcast %cst_190 : f32 to vector<8x128xf32>
    %293 = arith.addf %291, %292 : vector<8x128xf32>
    %c0_191 = arith.constant 0 : index
    %c128_192 = arith.constant 128 : index
    %294 = vector.load %arg13[%c0_191, %c128_192] : memref<8x512xf32, #tpu.memory_space<vmem>>, vector<8x128xf32>
    %cst_193 = arith.constant 5.000000e-01 : f32
    %295 = vector.broadcast %cst_193 : f32 to vector<8x128xf32>
    %296 = arith.mulf %295, %294 : vector<8x128xf32>
    %297 = math.tanh %296 : vector<8x128xf32>
    %cst_194 = arith.constant 5.000000e-01 : f32
    %298 = vector.broadcast %cst_194 : f32 to vector<8x128xf32>
    %299 = arith.mulf %298, %297 : vector<8x128xf32>
    %cst_195 = arith.constant 5.000000e-01 : f32
    %300 = vector.broadcast %cst_195 : f32 to vector<8x128xf32>
    %301 = arith.addf %299, %300 : vector<8x128xf32>
    %c0_196 = arith.constant 0 : index
    %c256_197 = arith.constant 256 : index
    %302 = vector.load %arg13[%c0_196, %c256_197] : memref<8x512xf32, #tpu.memory_space<vmem>>, vector<8x128xf32>
    %303 = math.tanh %302 : vector<8x128xf32>
    %c0_198 = arith.constant 0 : index
    %c384_199 = arith.constant 384 : index
    %304 = vector.load %arg13[%c0_198, %c384_199] : memref<8x512xf32, #tpu.memory_space<vmem>>, vector<8x128xf32>
    %cst_200 = arith.constant 5.000000e-01 : f32
    %305 = vector.broadcast %cst_200 : f32 to vector<8x128xf32>
    %306 = arith.mulf %305, %304 : vector<8x128xf32>
    %307 = math.tanh %306 : vector<8x128xf32>
    %cst_201 = arith.constant 5.000000e-01 : f32
    %308 = vector.broadcast %cst_201 : f32 to vector<8x128xf32>
    %309 = arith.mulf %308, %307 : vector<8x128xf32>
    %cst_202 = arith.constant 5.000000e-01 : f32
    %310 = vector.broadcast %cst_202 : f32 to vector<8x128xf32>
    %311 = arith.addf %309, %310 : vector<8x128xf32>
    %312 = arith.mulf %301, %276 : vector<8x128xf32>
    %313 = arith.mulf %293, %303 : vector<8x128xf32>
    %314 = arith.addf %312, %313 : vector<8x128xf32>
    %315 = math.tanh %314 : vector<8x128xf32>
    %316 = arith.mulf %311, %315 : vector<8x128xf32>
    %c8_i32_203 = arith.constant 8 : i32
    %c0_204 = arith.constant 0 : index
    %c0_205 = arith.constant 0 : index
    %317 = vector.load %arg10[%c0_204, %c0_205] : memref<8x128xf32, #tpu.memory_space<vmem>>, vector<8x128xf32>
    tpu.vector_store %arg10[%c0_204, %c0_205], %316 {strides = array<i32>} : memref<8x128xf32, #tpu.memory_space<vmem>>, vector<8x128xf32>,
    %c0_206 = arith.constant 0 : index
    %c0_207 = arith.constant 0 : index
    %318 = vector.load %arg11[%c0_206, %c0_207] : memref<8x128xf32, #tpu.memory_space<vmem>>, vector<8x128xf32>
    tpu.vector_store %arg11[%c0_206, %c0_207], %314 {strides = array<i32>} : memref<8x128xf32, #tpu.memory_space<vmem>>, vector<8x128xf32>,
    %c0_i32_208 = arith.constant 0 : i32
    %319 = arith.cmpi eq, %arg1, %c0_i32_208 : i32
    %320 = arith.extui %319 : i1 to i32
    %c0_i32_209 = arith.constant 0 : i32
    %321 = arith.cmpi ne, %320, %c0_i32_209 : i32
    scf.if %321 {
      %c0_210 = arith.constant 0 : index
      %c0_211 = arith.constant 0 : index
      %322 = vector.load %arg8[%c0_210, %c0_211] : memref<8x128xf32, #tpu.memory_space<vmem>>, vector<8x128xf32>
      tpu.vector_store %arg8[%c0_210, %c0_211], %316 {strides = array<i32>} : memref<8x128xf32, #tpu.memory_space<vmem>>, vector<8x128xf32>,
      %c0_212 = arith.constant 0 : index
      %c0_213 = arith.constant 0 : index
      %323 = vector.load %arg9[%c0_212, %c0_213] : memref<8x128xf32, #tpu.memory_space<vmem>>, vector<8x128xf32>
      tpu.vector_store %arg9[%c0_212, %c0_213], %314 {strides = array<i32>} : memref<8x128xf32, #tpu.memory_space<vmem>>, vector<8x128xf32>,
    } else {
    }
    return
  }
  func.func @transform_0(%arg0: i32, %arg1: i32) -> (i32, i32, i32, i32) {
    %c0_i32 = arith.constant 0 : i32
    %c0_i32_0 = arith.constant 0 : i32
    %c0_i32_1 = arith.constant 0 : i32
    return %arg0, %arg1, %c0_i32, %c0_i32_0 : i32, i32, i32, i32
  }
  func.func @transform_1(%arg0: i32, %arg1: i32) -> (i32, i32) {
    %c0_i32 = arith.constant 0 : i32
    %c0_i32_0 = arith.constant 0 : i32
    %c0_i32_1 = arith.constant 0 : i32
    return %c0_i32, %c0_i32_0 : i32, i32
  }
  func.func @transform_2(%arg0: i32, %arg1: i32) -> (i32, i32) {
    %c0_i32 = arith.constant 0 : i32
    %c0_i32_0 = arith.constant 0 : i32
    %c0_i32_1 = arith.constant 0 : i32
    return %c0_i32, %c0_i32_0 : i32, i32
  }
  func.func @transform_3(%arg0: i32, %arg1: i32) -> (i32, i32) {
    %c0_i32 = arith.constant 0 : i32
    %c0_i32_0 = arith.constant 0 : i32
    %c0_i32_1 = arith.constant 0 : i32
    return %c0_i32, %c0_i32_0 : i32, i32
  }
  func.func @transform_4(%arg0: i32, %arg1: i32) -> (i32, i32) {
    %c0_i32 = arith.constant 0 : i32
    %c0_i32_0 = arith.constant 0 : i32
    return %arg0, %c0_i32 : i32, i32
  }
  func.func @transform_5(%arg0: i32, %arg1: i32) -> (i32, i32) {
    %c0_i32 = arith.constant 0 : i32
    %c0_i32_0 = arith.constant 0 : i32
    return %arg0, %c0_i32 : i32, i32
  }
  func.func @transform_6(%arg0: i32, %arg1: i32) -> (i32, i32) {
    %c0_i32 = arith.constant 0 : i32
    %c0_i32_0 = arith.constant 0 : i32
    return %arg0, %c0_i32 : i32, i32
  }
  func.func @transform_7(%arg0: i32, %arg1: i32) -> (i32, i32) {
    %c0_i32 = arith.constant 0 : i32
    %c0_i32_0 = arith.constant 0 : i32
    return %arg0, %c0_i32 : i32, i32
  }
}

module attributes {stable_mosaic.version = 11 : i64} {
  func.func @_lstm_kernel(%arg0: i32, %arg1: i32, %arg2: memref<1x1x64x128xf32, #tpu.memory_space<vmem>>, %arg3: memref<128x512xf32, #tpu.memory_space<vmem>>, %arg4: memref<128x512xf32, #tpu.memory_space<vmem>>, %arg5: memref<1x512xf32, #tpu.memory_space<vmem>>, %arg6: memref<8x128xf32, #tpu.memory_space<vmem>>, %arg7: memref<8x128xf32, #tpu.memory_space<vmem>>, %arg8: memref<8x128xf32, #tpu.memory_space<vmem>>, %arg9: memref<8x128xf32, #tpu.memory_space<vmem>>, %arg10: memref<8x128xf32, #tpu.memory_space<vmem>>, %arg11: memref<8x128xf32, #tpu.memory_space<vmem>>, %arg12: memref<64x512xf32, #tpu.memory_space<vmem>>, %arg13: memref<8x512xf32, #tpu.memory_space<vmem>>) attributes {dimension_semantics = [#tpu.dimension_semantics<parallel>, #tpu.dimension_semantics<arbitrary>], iteration_bounds = array<i64: 1, 1>, scalar_prefetch = 0 : i64, scratch_operands = 4 : i64, tpu.core_type = #tpu.core_type<tc>, window_params = [{transform_indices = @transform_0, window_bounds = array<i64: 1, 1, 64, 128>}, {pipeline_mode = #tpu.pipeline_mode<synchronous>, transform_indices = @transform_1, window_bounds = array<i64: 128, 512>}, {pipeline_mode = #tpu.pipeline_mode<synchronous>, transform_indices = @transform_2, window_bounds = array<i64: 128, 512>}, {pipeline_mode = #tpu.pipeline_mode<synchronous>, transform_indices = @transform_3, window_bounds = array<i64: 1, 512>}, {transform_indices = @transform_4, window_bounds = array<i64: 8, 128>}, {transform_indices = @transform_5, window_bounds = array<i64: 8, 128>}, {transform_indices = @transform_6, window_bounds = array<i64: 8, 128>}, {transform_indices = @transform_7, window_bounds = array<i64: 8, 128>}]} {
    %c0_i32 = arith.constant 0 : i32
    %0 = arith.cmpi eq, %arg1, %c0_i32 : i32
    %1 = arith.extui %0 : i1 to i32
    %c0_i32_0 = arith.constant 0 : i32
    %2 = arith.cmpi ne, %1, %c0_i32_0 : i32
    scf.if %2 {
      %c0_210 = arith.constant 0 : index
      %c0_211 = arith.constant 0 : index
      %322 = vector.load %arg6[%c0_210, %c0_211] : memref<8x128xf32, #tpu.memory_space<vmem>>, vector<8x128xf32>
      %c0_212 = arith.constant 0 : index
      %c0_213 = arith.constant 0 : index
      %323 = vector.load %arg10[%c0_212, %c0_213] : memref<8x128xf32, #tpu.memory_space<vmem>>, vector<8x128xf32>
      tpu.vector_store %arg10[%c0_212, %c0_213], %322 {strides = array<i32>} : memref<8x128xf32, #tpu.memory_space<vmem>>, vector<8x128xf32>,
      %c0_214 = arith.constant 0 : index
      %c0_215 = arith.constant 0 : index
      %324 = vector.load %arg7[%c0_214, %c0_215] : memref<8x128xf32, #tpu.memory_space<vmem>>, vector<8x128xf32>
      %c0_216 = arith.constant 0 : index
      %c0_217 = arith.constant 0 : index
      %325 = vector.load %arg11[%c0_216, %c0_217] : memref<8x128xf32, #tpu.memory_space<vmem>>, vector<8x128xf32>
      tpu.vector_store %arg11[%c0_216, %c0_217], %324 {strides = array<i32>} : memref<8x128xf32, #tpu.memory_space<vmem>>, vector<8x128xf32>,
    } else {
    }
    %c0 = arith.constant 0 : index
    %c0_1 = arith.constant 0 : index
    %c0_2 = arith.constant 0 : index
    %c0_3 = arith.constant 0 : index
    %3 = vector.load %arg2[%c0, %c0_1, %c0_2, %c0_3] : memref<1x1x64x128xf32, #tpu.memory_space<vmem>>, vector<1x1x64x128xf32>
    %4 = vector.shape_cast %3 : vector<1x1x64x128xf32> to vector<64x128xf32>
    %c0_4 = arith.constant 0 : index
    %c0_5 = arith.constant 0 : index
    %5 = vector.load %arg3[%c0_4, %c0_5] : memref<128x512xf32, #tpu.memory_space<vmem>>, vector<128x512xf32>
    %cst = arith.constant dense<0.000000e+00> : vector<64x512xf32>
    %6 = tpu.matmul %4, %5, %cst {dimension_numbers = #tpu.dot_dimension_numbers<[1], [0], [0], [1], [0, 0, 1, 1], [], []>} : vector<64x128xf32>, vector<128x512xf32>, vector<64x512xf32> -> vector<64x512xf32>
    %c0_6 = arith.constant 0 : index
    %c0_7 = arith.constant 0 : index
    %7 = vector.load %arg5[%c0_6, %c0_7] : memref<1x512xf32, #tpu.memory_space<vmem>>, vector<1x512xf32>
    %8 = vector.broadcast %7 : vector<1x512xf32> to vector<64x512xf32>
    %9 = arith.addf %6, %8 : vector<64x512xf32>
    %c0_8 = arith.constant 0 : index
    %c0_9 = arith.constant 0 : index
    %10 = vector.load %arg12[%c0_8, %c0_9] : memref<64x512xf32, #tpu.memory_space<vmem>>, vector<64x512xf32>
    tpu.vector_store %arg12[%c0_8, %c0_9], %9 {strides = array<i32>} : memref<64x512xf32, #tpu.memory_space<vmem>>, vector<64x512xf32>,
    %c0_10 = arith.constant 0 : index
    %c0_11 = arith.constant 0 : index
    %11 = vector.load %arg10[%c0_10, %c0_11] : memref<8x128xf32, #tpu.memory_space<vmem>>, vector<8x128xf32>
    %c0_12 = arith.constant 0 : index
    %c0_13 = arith.constant 0 : index
    %12 = vector.load %arg11[%c0_12, %c0_13] : memref<8x128xf32, #tpu.memory_space<vmem>>, vector<8x128xf32>
    %c0_i32_14 = arith.constant 0 : i32
    %c8_i32 = arith.constant 8 : i32
    %13 = arith.muli %c0_i32_14, %c8_i32 : i32
    %14 = arith.index_cast %13 : i32 to index
    %c0_15 = arith.constant 0 : index
    %15 = vector.load %arg12[%14, %c0_15] : memref<64x512xf32, #tpu.memory_space<vmem>>, vector<8x512xf32>
    %c0_16 = arith.constant 0 : index
    %c0_17 = arith.constant 0 : index
    %16 = vector.load %arg4[%c0_16, %c0_17] : memref<128x512xf32, #tpu.memory_space<vmem>>, vector<128x512xf32>
    %cst_18 = arith.constant dense<0.000000e+00> : vector<8x512xf32>
    %17 = tpu.matmul %11, %16, %cst_18 {dimension_numbers = #tpu.dot_dimension_numbers<[1], [0], [0], [1], [0, 0, 1, 1], [], []>} : vector<8x128xf32>, vector<128x512xf32>, vector<8x512xf32> -> vector<8x512xf32>
    %18 = arith.addf %15, %17 : vector<8x512xf32>
    %c0_19 = arith.constant 0 : index
    %c0_20 = arith.constant 0 : index
    %19 = vector.load %arg13[%c0_19, %c0_20] : memref<8x512xf32, #tpu.memory_space<vmem>>, vector<8x512xf32>
    tpu.vector_store %arg13[%c0_19, %c0_20], %18 {strides = array<i32>} : memref<8x512xf32, #tpu.memory_space<vmem>>, vector<8x512xf32>,
    %c0_21 = arith.constant 0 : index
    %c0_22 = arith.constant 0 : index
    %20 = vector.load %arg13[%c0_21, %c0_22] : memref<8x512xf32, #tpu.memory_space<vmem>>, vector<8x128xf32>
    %cst_23 = arith.constant 5.000000e-01 : f32
    %21 = vector.broadcast %cst_23 : f32 to vector<8x128xf32>
    %22 = arith.mulf %21, %20 : vector<8x128xf32>
    %23 = math.tanh %22 : vector<8x128xf32>
    %cst_24 = arith.constant 5.000000e-01 : f32
    %24 = vector.broadcast %cst_24 : f32 to vector<8x128xf32>
    %25 = arith.mulf %24, %23 : vector<8x128xf32>
    %cst_25 = arith.constant 5.000000e-01 : f32
    %26 = vector.broadcast %cst_25 : f32 to vector<8x128xf32>
    %27 = arith.addf %25, %26 : vector<8x128xf32>
    %c0_26 = arith.constant 0 : index
    %c128 = arith.constant 128 : index
    %28 = vector.load %arg13[%c0_26, %c128] : memref<8x512xf32, #tpu.memory_space<vmem>>, vector<8x128xf32>
    %cst_27 = arith.constant 5.000000e-01 : f32
    %29 = vector.broadcast %cst_27 : f32 to vector<8x128xf32>
    %30 = arith.mulf %29, %28 : vector<8x128xf32>
    %31 = math.tanh %30 : vector<8x128xf32>
    %cst_28 = arith.constant 5.000000e-01 : f32
    %32 = vector.broadcast %cst_28 : f32 to vector<8x128xf32>
    %33 = arith.mulf %32, %31 : vector<8x128xf32>
    %cst_29 = arith.constant 5.000000e-01 : f32
    %34 = vector.broadcast %cst_29 : f32 to vector<8x128xf32>
    %35 = arith.addf %33, %34 : vector<8x128xf32>
    %c0_30 = arith.constant 0 : index
    %c256 = arith.constant 256 : index
    %36 = vector.load %arg13[%c0_30, %c256] : memref<8x512xf32, #tpu.memory_space<vmem>>, vector<8x128xf32>
    %37 = math.tanh %36 : vector<8x128xf32>
    %c0_31 = arith.constant 0 : index
    %c384 = arith.constant 384 : index
    %38 = vector.load %arg13[%c0_31, %c384] : memref<8x512xf32, #tpu.memory_space<vmem>>, vector<8x128xf32>
    %cst_32 = arith.constant 5.000000e-01 : f32
    %39 = vector.broadcast %cst_32 : f32 to vector<8x128xf32>
    %40 = arith.mulf %39, %38 : vector<8x128xf32>
    %41 = math.tanh %40 : vector<8x128xf32>
    %cst_33 = arith.constant 5.000000e-01 : f32
    %42 = vector.broadcast %cst_33 : f32 to vector<8x128xf32>
    %43 = arith.mulf %42, %41 : vector<8x128xf32>
    %cst_34 = arith.constant 5.000000e-01 : f32
    %44 = vector.broadcast %cst_34 : f32 to vector<8x128xf32>
    %45 = arith.addf %43, %44 : vector<8x128xf32>
    %46 = arith.mulf %35, %12 : vector<8x128xf32>
    %47 = arith.mulf %27, %37 : vector<8x128xf32>
    %48 = arith.addf %46, %47 : vector<8x128xf32>
    %49 = math.tanh %48 : vector<8x128xf32>
    %50 = arith.mulf %45, %49 : vector<8x128xf32>
    %c1_i32 = arith.constant 1 : i32
    %c8_i32_35 = arith.constant 8 : i32
    %51 = arith.muli %c1_i32, %c8_i32_35 : i32
    %52 = arith.index_cast %51 : i32 to index
    %c0_36 = arith.constant 0 : index
    %53 = vector.load %arg12[%52, %c0_36] : memref<64x512xf32, #tpu.memory_space<vmem>>, vector<8x512xf32>
    %c0_37 = arith.constant 0 : index
    %c0_38 = arith.constant 0 : index
    %54 = vector.load %arg4[%c0_37, %c0_38] : memref<128x512xf32, #tpu.memory_space<vmem>>, vector<128x512xf32>
    %cst_39 = arith.constant dense<0.000000e+00> : vector<8x512xf32>
    %55 = tpu.matmul %50, %54, %cst_39 {dimension_numbers = #tpu.dot_dimension_numbers<[1], [0], [0], [1], [0, 0, 1, 1], [], []>} : vector<8x128xf32>, vector<128x512xf32>, vector<8x512xf32> -> vector<8x512xf32>
    %56 = arith.addf %53, %55 : vector<8x512xf32>
    %c0_40 = arith.constant 0 : index
    %c0_41 = arith.constant 0 : index
    %57 = vector.load %arg13[%c0_40, %c0_41] : memref<8x512xf32, #tpu.memory_space<vmem>>, vector<8x512xf32>
    tpu.vector_store %arg13[%c0_40, %c0_41], %56 {strides = array<i32>} : memref<8x512xf32, #tpu.memory_space<vmem>>, vector<8x512xf32>,
    %c0_42 = arith.constant 0 : index
    %c0_43 = arith.constant 0 : index
    %58 = vector.load %arg13[%c0_42, %c0_43] : memref<8x512xf32, #tpu.memory_space<vmem>>, vector<8x128xf32>
    %cst_44 = arith.constant 5.000000e-01 : f32
    %59 = vector.broadcast %cst_44 : f32 to vector<8x128xf32>
    %60 = arith.mulf %59, %58 : vector<8x128xf32>
    %61 = math.tanh %60 : vector<8x128xf32>
    %cst_45 = arith.constant 5.000000e-01 : f32
    %62 = vector.broadcast %cst_45 : f32 to vector<8x128xf32>
    %63 = arith.mulf %62, %61 : vector<8x128xf32>
    %cst_46 = arith.constant 5.000000e-01 : f32
    %64 = vector.broadcast %cst_46 : f32 to vector<8x128xf32>
    %65 = arith.addf %63, %64 : vector<8x128xf32>
    %c0_47 = arith.constant 0 : index
    %c128_48 = arith.constant 128 : index
    %66 = vector.load %arg13[%c0_47, %c128_48] : memref<8x512xf32, #tpu.memory_space<vmem>>, vector<8x128xf32>
    %cst_49 = arith.constant 5.000000e-01 : f32
    %67 = vector.broadcast %cst_49 : f32 to vector<8x128xf32>
    %68 = arith.mulf %67, %66 : vector<8x128xf32>
    %69 = math.tanh %68 : vector<8x128xf32>
    %cst_50 = arith.constant 5.000000e-01 : f32
    %70 = vector.broadcast %cst_50 : f32 to vector<8x128xf32>
    %71 = arith.mulf %70, %69 : vector<8x128xf32>
    %cst_51 = arith.constant 5.000000e-01 : f32
    %72 = vector.broadcast %cst_51 : f32 to vector<8x128xf32>
    %73 = arith.addf %71, %72 : vector<8x128xf32>
    %c0_52 = arith.constant 0 : index
    %c256_53 = arith.constant 256 : index
    %74 = vector.load %arg13[%c0_52, %c256_53] : memref<8x512xf32, #tpu.memory_space<vmem>>, vector<8x128xf32>
    %75 = math.tanh %74 : vector<8x128xf32>
    %c0_54 = arith.constant 0 : index
    %c384_55 = arith.constant 384 : index
    %76 = vector.load %arg13[%c0_54, %c384_55] : memref<8x512xf32, #tpu.memory_space<vmem>>, vector<8x128xf32>
    %cst_56 = arith.constant 5.000000e-01 : f32
    %77 = vector.broadcast %cst_56 : f32 to vector<8x128xf32>
    %78 = arith.mulf %77, %76 : vector<8x128xf32>
    %79 = math.tanh %78 : vector<8x128xf32>
    %cst_57 = arith.constant 5.000000e-01 : f32
    %80 = vector.broadcast %cst_57 : f32 to vector<8x128xf32>
    %81 = arith.mulf %80, %79 : vector<8x128xf32>
    %cst_58 = arith.constant 5.000000e-01 : f32
    %82 = vector.broadcast %cst_58 : f32 to vector<8x128xf32>
    %83 = arith.addf %81, %82 : vector<8x128xf32>
    %84 = arith.mulf %73, %48 : vector<8x128xf32>
    %85 = arith.mulf %65, %75 : vector<8x128xf32>
    %86 = arith.addf %84, %85 : vector<8x128xf32>
    %87 = math.tanh %86 : vector<8x128xf32>
    %88 = arith.mulf %83, %87 : vector<8x128xf32>
    %c2_i32 = arith.constant 2 : i32
    %c8_i32_59 = arith.constant 8 : i32
    %89 = arith.muli %c2_i32, %c8_i32_59 : i32
    %90 = arith.index_cast %89 : i32 to index
    %c0_60 = arith.constant 0 : index
    %91 = vector.load %arg12[%90, %c0_60] : memref<64x512xf32, #tpu.memory_space<vmem>>, vector<8x512xf32>
    %c0_61 = arith.constant 0 : index
    %c0_62 = arith.constant 0 : index
    %92 = vector.load %arg4[%c0_61, %c0_62] : memref<128x512xf32, #tpu.memory_space<vmem>>, vector<128x512xf32>
    %cst_63 = arith.constant dense<0.000000e+00> : vector<8x512xf32>
    %93 = tpu.matmul %88, %92, %cst_63 {dimension_numbers = #tpu.dot_dimension_numbers<[1], [0], [0], [1], [0, 0, 1, 1], [], []>} : vector<8x128xf32>, vector<128x512xf32>, vector<8x512xf32> -> vector<8x512xf32>
    %94 = arith.addf %91, %93 : vector<8x512xf32>
    %c0_64 = arith.constant 0 : index
    %c0_65 = arith.constant 0 : index
    %95 = vector.load %arg13[%c0_64, %c0_65] : memref<8x512xf32, #tpu.memory_space<vmem>>, vector<8x512xf32>
    tpu.vector_store %arg13[%c0_64, %c0_65], %94 {strides = array<i32>} : memref<8x512xf32, #tpu.memory_space<vmem>>, vector<8x512xf32>,
    %c0_66 = arith.constant 0 : index
    %c0_67 = arith.constant 0 : index
    %96 = vector.load %arg13[%c0_66, %c0_67] : memref<8x512xf32, #tpu.memory_space<vmem>>, vector<8x128xf32>
    %cst_68 = arith.constant 5.000000e-01 : f32
    %97 = vector.broadcast %cst_68 : f32 to vector<8x128xf32>
    %98 = arith.mulf %97, %96 : vector<8x128xf32>
    %99 = math.tanh %98 : vector<8x128xf32>
    %cst_69 = arith.constant 5.000000e-01 : f32
    %100 = vector.broadcast %cst_69 : f32 to vector<8x128xf32>
    %101 = arith.mulf %100, %99 : vector<8x128xf32>
    %cst_70 = arith.constant 5.000000e-01 : f32
    %102 = vector.broadcast %cst_70 : f32 to vector<8x128xf32>
    %103 = arith.addf %101, %102 : vector<8x128xf32>
    %c0_71 = arith.constant 0 : index
    %c128_72 = arith.constant 128 : index
    %104 = vector.load %arg13[%c0_71, %c128_72] : memref<8x512xf32, #tpu.memory_space<vmem>>, vector<8x128xf32>
    %cst_73 = arith.constant 5.000000e-01 : f32
    %105 = vector.broadcast %cst_73 : f32 to vector<8x128xf32>
    %106 = arith.mulf %105, %104 : vector<8x128xf32>
    %107 = math.tanh %106 : vector<8x128xf32>
    %cst_74 = arith.constant 5.000000e-01 : f32
    %108 = vector.broadcast %cst_74 : f32 to vector<8x128xf32>
    %109 = arith.mulf %108, %107 : vector<8x128xf32>
    %cst_75 = arith.constant 5.000000e-01 : f32
    %110 = vector.broadcast %cst_75 : f32 to vector<8x128xf32>
    %111 = arith.addf %109, %110 : vector<8x128xf32>
    %c0_76 = arith.constant 0 : index
    %c256_77 = arith.constant 256 : index
    %112 = vector.load %arg13[%c0_76, %c256_77] : memref<8x512xf32, #tpu.memory_space<vmem>>, vector<8x128xf32>
    %113 = math.tanh %112 : vector<8x128xf32>
    %c0_78 = arith.constant 0 : index
    %c384_79 = arith.constant 384 : index
    %114 = vector.load %arg13[%c0_78, %c384_79] : memref<8x512xf32, #tpu.memory_space<vmem>>, vector<8x128xf32>
    %cst_80 = arith.constant 5.000000e-01 : f32
    %115 = vector.broadcast %cst_80 : f32 to vector<8x128xf32>
    %116 = arith.mulf %115, %114 : vector<8x128xf32>
    %117 = math.tanh %116 : vector<8x128xf32>
    %cst_81 = arith.constant 5.000000e-01 : f32
    %118 = vector.broadcast %cst_81 : f32 to vector<8x128xf32>
    %119 = arith.mulf %118, %117 : vector<8x128xf32>
    %cst_82 = arith.constant 5.000000e-01 : f32
    %120 = vector.broadcast %cst_82 : f32 to vector<8x128xf32>
    %121 = arith.addf %119, %120 : vector<8x128xf32>
    %122 = arith.mulf %111, %86 : vector<8x128xf32>
    %123 = arith.mulf %103, %113 : vector<8x128xf32>
    %124 = arith.addf %122, %123 : vector<8x128xf32>
    %125 = math.tanh %124 : vector<8x128xf32>
    %126 = arith.mulf %121, %125 : vector<8x128xf32>
    %c3_i32 = arith.constant 3 : i32
    %c8_i32_83 = arith.constant 8 : i32
    %127 = arith.muli %c3_i32, %c8_i32_83 : i32
    %128 = arith.index_cast %127 : i32 to index
    %c0_84 = arith.constant 0 : index
    %129 = vector.load %arg12[%128, %c0_84] : memref<64x512xf32, #tpu.memory_space<vmem>>, vector<8x512xf32>
    %c0_85 = arith.constant 0 : index
    %c0_86 = arith.constant 0 : index
    %130 = vector.load %arg4[%c0_85, %c0_86] : memref<128x512xf32, #tpu.memory_space<vmem>>, vector<128x512xf32>
    %cst_87 = arith.constant dense<0.000000e+00> : vector<8x512xf32>
    %131 = tpu.matmul %126, %130, %cst_87 {dimension_numbers = #tpu.dot_dimension_numbers<[1], [0], [0], [1], [0, 0, 1, 1], [], []>} : vector<8x128xf32>, vector<128x512xf32>, vector<8x512xf32> -> vector<8x512xf32>
    %132 = arith.addf %129, %131 : vector<8x512xf32>
    %c0_88 = arith.constant 0 : index
    %c0_89 = arith.constant 0 : index
    %133 = vector.load %arg13[%c0_88, %c0_89] : memref<8x512xf32, #tpu.memory_space<vmem>>, vector<8x512xf32>
    tpu.vector_store %arg13[%c0_88, %c0_89], %132 {strides = array<i32>} : memref<8x512xf32, #tpu.memory_space<vmem>>, vector<8x512xf32>,
    %c0_90 = arith.constant 0 : index
    %c0_91 = arith.constant 0 : index
    %134 = vector.load %arg13[%c0_90, %c0_91] : memref<8x512xf32, #tpu.memory_space<vmem>>, vector<8x128xf32>
    %cst_92 = arith.constant 5.000000e-01 : f32
    %135 = vector.broadcast %cst_92 : f32 to vector<8x128xf32>
    %136 = arith.mulf %135, %134 : vector<8x128xf32>
    %137 = math.tanh %136 : vector<8x128xf32>
    %cst_93 = arith.constant 5.000000e-01 : f32
    %138 = vector.broadcast %cst_93 : f32 to vector<8x128xf32>
    %139 = arith.mulf %138, %137 : vector<8x128xf32>
    %cst_94 = arith.constant 5.000000e-01 : f32
    %140 = vector.broadcast %cst_94 : f32 to vector<8x128xf32>
    %141 = arith.addf %139, %140 : vector<8x128xf32>
    %c0_95 = arith.constant 0 : index
    %c128_96 = arith.constant 128 : index
    %142 = vector.load %arg13[%c0_95, %c128_96] : memref<8x512xf32, #tpu.memory_space<vmem>>, vector<8x128xf32>
    %cst_97 = arith.constant 5.000000e-01 : f32
    %143 = vector.broadcast %cst_97 : f32 to vector<8x128xf32>
    %144 = arith.mulf %143, %142 : vector<8x128xf32>
    %145 = math.tanh %144 : vector<8x128xf32>
    %cst_98 = arith.constant 5.000000e-01 : f32
    %146 = vector.broadcast %cst_98 : f32 to vector<8x128xf32>
    %147 = arith.mulf %146, %145 : vector<8x128xf32>
    %cst_99 = arith.constant 5.000000e-01 : f32
    %148 = vector.broadcast %cst_99 : f32 to vector<8x128xf32>
    %149 = arith.addf %147, %148 : vector<8x128xf32>
    %c0_100 = arith.constant 0 : index
    %c256_101 = arith.constant 256 : index
    %150 = vector.load %arg13[%c0_100, %c256_101] : memref<8x512xf32, #tpu.memory_space<vmem>>, vector<8x128xf32>
    %151 = math.tanh %150 : vector<8x128xf32>
    %c0_102 = arith.constant 0 : index
    %c384_103 = arith.constant 384 : index
    %152 = vector.load %arg13[%c0_102, %c384_103] : memref<8x512xf32, #tpu.memory_space<vmem>>, vector<8x128xf32>
    %cst_104 = arith.constant 5.000000e-01 : f32
    %153 = vector.broadcast %cst_104 : f32 to vector<8x128xf32>
    %154 = arith.mulf %153, %152 : vector<8x128xf32>
    %155 = math.tanh %154 : vector<8x128xf32>
    %cst_105 = arith.constant 5.000000e-01 : f32
    %156 = vector.broadcast %cst_105 : f32 to vector<8x128xf32>
    %157 = arith.mulf %156, %155 : vector<8x128xf32>
    %cst_106 = arith.constant 5.000000e-01 : f32
    %158 = vector.broadcast %cst_106 : f32 to vector<8x128xf32>
    %159 = arith.addf %157, %158 : vector<8x128xf32>
    %160 = arith.mulf %149, %124 : vector<8x128xf32>
    %161 = arith.mulf %141, %151 : vector<8x128xf32>
    %162 = arith.addf %160, %161 : vector<8x128xf32>
    %163 = math.tanh %162 : vector<8x128xf32>
    %164 = arith.mulf %159, %163 : vector<8x128xf32>
    %c4_i32 = arith.constant 4 : i32
    %c8_i32_107 = arith.constant 8 : i32
    %165 = arith.muli %c4_i32, %c8_i32_107 : i32
    %166 = arith.index_cast %165 : i32 to index
    %c0_108 = arith.constant 0 : index
    %167 = vector.load %arg12[%166, %c0_108] : memref<64x512xf32, #tpu.memory_space<vmem>>, vector<8x512xf32>
    %c0_109 = arith.constant 0 : index
    %c0_110 = arith.constant 0 : index
    %168 = vector.load %arg4[%c0_109, %c0_110] : memref<128x512xf32, #tpu.memory_space<vmem>>, vector<128x512xf32>
    %cst_111 = arith.constant dense<0.000000e+00> : vector<8x512xf32>
    %169 = tpu.matmul %164, %168, %cst_111 {dimension_numbers = #tpu.dot_dimension_numbers<[1], [0], [0], [1], [0, 0, 1, 1], [], []>} : vector<8x128xf32>, vector<128x512xf32>, vector<8x512xf32> -> vector<8x512xf32>
    %170 = arith.addf %167, %169 : vector<8x512xf32>
    %c0_112 = arith.constant 0 : index
    %c0_113 = arith.constant 0 : index
    %171 = vector.load %arg13[%c0_112, %c0_113] : memref<8x512xf32, #tpu.memory_space<vmem>>, vector<8x512xf32>
    tpu.vector_store %arg13[%c0_112, %c0_113], %170 {strides = array<i32>} : memref<8x512xf32, #tpu.memory_space<vmem>>, vector<8x512xf32>,
    %c0_114 = arith.constant 0 : index
    %c0_115 = arith.constant 0 : index
    %172 = vector.load %arg13[%c0_114, %c0_115] : memref<8x512xf32, #tpu.memory_space<vmem>>, vector<8x128xf32>
    %cst_116 = arith.constant 5.000000e-01 : f32
    %173 = vector.broadcast %cst_116 : f32 to vector<8x128xf32>
    %174 = arith.mulf %173, %172 : vector<8x128xf32>
    %175 = math.tanh %174 : vector<8x128xf32>
    %cst_117 = arith.constant 5.000000e-01 : f32
    %176 = vector.broadcast %cst_117 : f32 to vector<8x128xf32>
    %177 = arith.mulf %176, %175 : vector<8x128xf32>
    %cst_118 = arith.constant 5.000000e-01 : f32
    %178 = vector.broadcast %cst_118 : f32 to vector<8x128xf32>
    %179 = arith.addf %177, %178 : vector<8x128xf32>
    %c0_119 = arith.constant 0 : index
    %c128_120 = arith.constant 128 : index
    %180 = vector.load %arg13[%c0_119, %c128_120] : memref<8x512xf32, #tpu.memory_space<vmem>>, vector<8x128xf32>
    %cst_121 = arith.constant 5.000000e-01 : f32
    %181 = vector.broadcast %cst_121 : f32 to vector<8x128xf32>
    %182 = arith.mulf %181, %180 : vector<8x128xf32>
    %183 = math.tanh %182 : vector<8x128xf32>
    %cst_122 = arith.constant 5.000000e-01 : f32
    %184 = vector.broadcast %cst_122 : f32 to vector<8x128xf32>
    %185 = arith.mulf %184, %183 : vector<8x128xf32>
    %cst_123 = arith.constant 5.000000e-01 : f32
    %186 = vector.broadcast %cst_123 : f32 to vector<8x128xf32>
    %187 = arith.addf %185, %186 : vector<8x128xf32>
    %c0_124 = arith.constant 0 : index
    %c256_125 = arith.constant 256 : index
    %188 = vector.load %arg13[%c0_124, %c256_125] : memref<8x512xf32, #tpu.memory_space<vmem>>, vector<8x128xf32>
    %189 = math.tanh %188 : vector<8x128xf32>
    %c0_126 = arith.constant 0 : index
    %c384_127 = arith.constant 384 : index
    %190 = vector.load %arg13[%c0_126, %c384_127] : memref<8x512xf32, #tpu.memory_space<vmem>>, vector<8x128xf32>
    %cst_128 = arith.constant 5.000000e-01 : f32
    %191 = vector.broadcast %cst_128 : f32 to vector<8x128xf32>
    %192 = arith.mulf %191, %190 : vector<8x128xf32>
    %193 = math.tanh %192 : vector<8x128xf32>
    %cst_129 = arith.constant 5.000000e-01 : f32
    %194 = vector.broadcast %cst_129 : f32 to vector<8x128xf32>
    %195 = arith.mulf %194, %193 : vector<8x128xf32>
    %cst_130 = arith.constant 5.000000e-01 : f32
    %196 = vector.broadcast %cst_130 : f32 to vector<8x128xf32>
    %197 = arith.addf %195, %196 : vector<8x128xf32>
    %198 = arith.mulf %187, %162 : vector<8x128xf32>
    %199 = arith.mulf %179, %189 : vector<8x128xf32>
    %200 = arith.addf %198, %199 : vector<8x128xf32>
    %201 = math.tanh %200 : vector<8x128xf32>
    %202 = arith.mulf %197, %201 : vector<8x128xf32>
    %c5_i32 = arith.constant 5 : i32
    %c8_i32_131 = arith.constant 8 : i32
    %203 = arith.muli %c5_i32, %c8_i32_131 : i32
    %204 = arith.index_cast %203 : i32 to index
    %c0_132 = arith.constant 0 : index
    %205 = vector.load %arg12[%204, %c0_132] : memref<64x512xf32, #tpu.memory_space<vmem>>, vector<8x512xf32>
    %c0_133 = arith.constant 0 : index
    %c0_134 = arith.constant 0 : index
    %206 = vector.load %arg4[%c0_133, %c0_134] : memref<128x512xf32, #tpu.memory_space<vmem>>, vector<128x512xf32>
    %cst_135 = arith.constant dense<0.000000e+00> : vector<8x512xf32>
    %207 = tpu.matmul %202, %206, %cst_135 {dimension_numbers = #tpu.dot_dimension_numbers<[1], [0], [0], [1], [0, 0, 1, 1], [], []>} : vector<8x128xf32>, vector<128x512xf32>, vector<8x512xf32> -> vector<8x512xf32>
    %208 = arith.addf %205, %207 : vector<8x512xf32>
    %c0_136 = arith.constant 0 : index
    %c0_137 = arith.constant 0 : index
    %209 = vector.load %arg13[%c0_136, %c0_137] : memref<8x512xf32, #tpu.memory_space<vmem>>, vector<8x512xf32>
    tpu.vector_store %arg13[%c0_136, %c0_137], %208 {strides = array<i32>} : memref<8x512xf32, #tpu.memory_space<vmem>>, vector<8x512xf32>,
    %c0_138 = arith.constant 0 : index
    %c0_139 = arith.constant 0 : index
    %210 = vector.load %arg13[%c0_138, %c0_139] : memref<8x512xf32, #tpu.memory_space<vmem>>, vector<8x128xf32>
    %cst_140 = arith.constant 5.000000e-01 : f32
    %211 = vector.broadcast %cst_140 : f32 to vector<8x128xf32>
    %212 = arith.mulf %211, %210 : vector<8x128xf32>
    %213 = math.tanh %212 : vector<8x128xf32>
    %cst_141 = arith.constant 5.000000e-01 : f32
    %214 = vector.broadcast %cst_141 : f32 to vector<8x128xf32>
    %215 = arith.mulf %214, %213 : vector<8x128xf32>
    %cst_142 = arith.constant 5.000000e-01 : f32
    %216 = vector.broadcast %cst_142 : f32 to vector<8x128xf32>
    %217 = arith.addf %215, %216 : vector<8x128xf32>
    %c0_143 = arith.constant 0 : index
    %c128_144 = arith.constant 128 : index
    %218 = vector.load %arg13[%c0_143, %c128_144] : memref<8x512xf32, #tpu.memory_space<vmem>>, vector<8x128xf32>
    %cst_145 = arith.constant 5.000000e-01 : f32
    %219 = vector.broadcast %cst_145 : f32 to vector<8x128xf32>
    %220 = arith.mulf %219, %218 : vector<8x128xf32>
    %221 = math.tanh %220 : vector<8x128xf32>
    %cst_146 = arith.constant 5.000000e-01 : f32
    %222 = vector.broadcast %cst_146 : f32 to vector<8x128xf32>
    %223 = arith.mulf %222, %221 : vector<8x128xf32>
    %cst_147 = arith.constant 5.000000e-01 : f32
    %224 = vector.broadcast %cst_147 : f32 to vector<8x128xf32>
    %225 = arith.addf %223, %224 : vector<8x128xf32>
    %c0_148 = arith.constant 0 : index
    %c256_149 = arith.constant 256 : index
    %226 = vector.load %arg13[%c0_148, %c256_149] : memref<8x512xf32, #tpu.memory_space<vmem>>, vector<8x128xf32>
    %227 = math.tanh %226 : vector<8x128xf32>
    %c0_150 = arith.constant 0 : index
    %c384_151 = arith.constant 384 : index
    %228 = vector.load %arg13[%c0_150, %c384_151] : memref<8x512xf32, #tpu.memory_space<vmem>>, vector<8x128xf32>
    %cst_152 = arith.constant 5.000000e-01 : f32
    %229 = vector.broadcast %cst_152 : f32 to vector<8x128xf32>
    %230 = arith.mulf %229, %228 : vector<8x128xf32>
    %231 = math.tanh %230 : vector<8x128xf32>
    %cst_153 = arith.constant 5.000000e-01 : f32
    %232 = vector.broadcast %cst_153 : f32 to vector<8x128xf32>
    %233 = arith.mulf %232, %231 : vector<8x128xf32>
    %cst_154 = arith.constant 5.000000e-01 : f32
    %234 = vector.broadcast %cst_154 : f32 to vector<8x128xf32>
    %235 = arith.addf %233, %234 : vector<8x128xf32>
    %236 = arith.mulf %225, %200 : vector<8x128xf32>
    %237 = arith.mulf %217, %227 : vector<8x128xf32>
    %238 = arith.addf %236, %237 : vector<8x128xf32>
    %239 = math.tanh %238 : vector<8x128xf32>
    %240 = arith.mulf %235, %239 : vector<8x128xf32>
    %c6_i32 = arith.constant 6 : i32
    %c8_i32_155 = arith.constant 8 : i32
    %241 = arith.muli %c6_i32, %c8_i32_155 : i32
    %242 = arith.index_cast %241 : i32 to index
    %c0_156 = arith.constant 0 : index
    %243 = vector.load %arg12[%242, %c0_156] : memref<64x512xf32, #tpu.memory_space<vmem>>, vector<8x512xf32>
    %c0_157 = arith.constant 0 : index
    %c0_158 = arith.constant 0 : index
    %244 = vector.load %arg4[%c0_157, %c0_158] : memref<128x512xf32, #tpu.memory_space<vmem>>, vector<128x512xf32>
    %cst_159 = arith.constant dense<0.000000e+00> : vector<8x512xf32>
    %245 = tpu.matmul %240, %244, %cst_159 {dimension_numbers = #tpu.dot_dimension_numbers<[1], [0], [0], [1], [0, 0, 1, 1], [], []>} : vector<8x128xf32>, vector<128x512xf32>, vector<8x512xf32> -> vector<8x512xf32>
    %246 = arith.addf %243, %245 : vector<8x512xf32>
    %c0_160 = arith.constant 0 : index
    %c0_161 = arith.constant 0 : index
    %247 = vector.load %arg13[%c0_160, %c0_161] : memref<8x512xf32, #tpu.memory_space<vmem>>, vector<8x512xf32>
    tpu.vector_store %arg13[%c0_160, %c0_161], %246 {strides = array<i32>} : memref<8x512xf32, #tpu.memory_space<vmem>>, vector<8x512xf32>,
    %c0_162 = arith.constant 0 : index
    %c0_163 = arith.constant 0 : index
    %248 = vector.load %arg13[%c0_162, %c0_163] : memref<8x512xf32, #tpu.memory_space<vmem>>, vector<8x128xf32>
    %cst_164 = arith.constant 5.000000e-01 : f32
    %249 = vector.broadcast %cst_164 : f32 to vector<8x128xf32>
    %250 = arith.mulf %249, %248 : vector<8x128xf32>
    %251 = math.tanh %250 : vector<8x128xf32>
    %cst_165 = arith.constant 5.000000e-01 : f32
    %252 = vector.broadcast %cst_165 : f32 to vector<8x128xf32>
    %253 = arith.mulf %252, %251 : vector<8x128xf32>
    %cst_166 = arith.constant 5.000000e-01 : f32
    %254 = vector.broadcast %cst_166 : f32 to vector<8x128xf32>
    %255 = arith.addf %253, %254 : vector<8x128xf32>
    %c0_167 = arith.constant 0 : index
    %c128_168 = arith.constant 128 : index
    %256 = vector.load %arg13[%c0_167, %c128_168] : memref<8x512xf32, #tpu.memory_space<vmem>>, vector<8x128xf32>
    %cst_169 = arith.constant 5.000000e-01 : f32
    %257 = vector.broadcast %cst_169 : f32 to vector<8x128xf32>
    %258 = arith.mulf %257, %256 : vector<8x128xf32>
    %259 = math.tanh %258 : vector<8x128xf32>
    %cst_170 = arith.constant 5.000000e-01 : f32
    %260 = vector.broadcast %cst_170 : f32 to vector<8x128xf32>
    %261 = arith.mulf %260, %259 : vector<8x128xf32>
    %cst_171 = arith.constant 5.000000e-01 : f32
    %262 = vector.broadcast %cst_171 : f32 to vector<8x128xf32>
    %263 = arith.addf %261, %262 : vector<8x128xf32>
    %c0_172 = arith.constant 0 : index
    %c256_173 = arith.constant 256 : index
    %264 = vector.load %arg13[%c0_172, %c256_173] : memref<8x512xf32, #tpu.memory_space<vmem>>, vector<8x128xf32>
    %265 = math.tanh %264 : vector<8x128xf32>
    %c0_174 = arith.constant 0 : index
    %c384_175 = arith.constant 384 : index
    %266 = vector.load %arg13[%c0_174, %c384_175] : memref<8x512xf32, #tpu.memory_space<vmem>>, vector<8x128xf32>
    %cst_176 = arith.constant 5.000000e-01 : f32
    %267 = vector.broadcast %cst_176 : f32 to vector<8x128xf32>
    %268 = arith.mulf %267, %266 : vector<8x128xf32>
    %269 = math.tanh %268 : vector<8x128xf32>
    %cst_177 = arith.constant 5.000000e-01 : f32
    %270 = vector.broadcast %cst_177 : f32 to vector<8x128xf32>
    %271 = arith.mulf %270, %269 : vector<8x128xf32>
    %cst_178 = arith.constant 5.000000e-01 : f32
    %272 = vector.broadcast %cst_178 : f32 to vector<8x128xf32>
    %273 = arith.addf %271, %272 : vector<8x128xf32>
    %274 = arith.mulf %263, %238 : vector<8x128xf32>
    %275 = arith.mulf %255, %265 : vector<8x128xf32>
    %276 = arith.addf %274, %275 : vector<8x128xf32>
    %277 = math.tanh %276 : vector<8x128xf32>
    %278 = arith.mulf %273, %277 : vector<8x128xf32>
    %c7_i32 = arith.constant 7 : i32
    %c8_i32_179 = arith.constant 8 : i32
    %279 = arith.muli %c7_i32, %c8_i32_179 : i32
    %280 = arith.index_cast %279 : i32 to index
    %c0_180 = arith.constant 0 : index
    %281 = vector.load %arg12[%280, %c0_180] : memref<64x512xf32, #tpu.memory_space<vmem>>, vector<8x512xf32>
    %c0_181 = arith.constant 0 : index
    %c0_182 = arith.constant 0 : index
    %282 = vector.load %arg4[%c0_181, %c0_182] : memref<128x512xf32, #tpu.memory_space<vmem>>, vector<128x512xf32>
    %cst_183 = arith.constant dense<0.000000e+00> : vector<8x512xf32>
    %283 = tpu.matmul %278, %282, %cst_183 {dimension_numbers = #tpu.dot_dimension_numbers<[1], [0], [0], [1], [0, 0, 1, 1], [], []>} : vector<8x128xf32>, vector<128x512xf32>, vector<8x512xf32> -> vector<8x512xf32>
    %284 = arith.addf %281, %283 : vector<8x512xf32>
    %c0_184 = arith.constant 0 : index
    %c0_185 = arith.constant 0 : index
    %285 = vector.load %arg13[%c0_184, %c0_185] : memref<8x512xf32, #tpu.memory_space<vmem>>, vector<8x512xf32>
    tpu.vector_store %arg13[%c0_184, %c0_185], %284 {strides = array<i32>} : memref<8x512xf32, #tpu.memory_space<vmem>>, vector<8x512xf32>,
    %c0_186 = arith.constant 0 : index
    %c0_187 = arith.constant 0 : index
    %286 = vector.load %arg13[%c0_186, %c0_187] : memref<8x512xf32, #tpu.memory_space<vmem>>, vector<8x128xf32>
    %cst_188 = arith.constant 5.000000e-01 : f32
    %287 = vector.broadcast %cst_188 : f32 to vector<8x128xf32>
    %288 = arith.mulf %287, %286 : vector<8x128xf32>
    %289 = math.tanh %288 : vector<8x128xf32>
    %cst_189 = arith.constant 5.000000e-01 : f32
    %290 = vector.broadcast %cst_189 : f32 to vector<8x128xf32>
    %291 = arith.mulf %290, %289 : vector<8x128xf32>
    %cst_190 = arith.constant 5.000000e-01 : f32
    %292 = vector.broadcast %cst_190 : f32 to vector<8x128xf32>
    %293 = arith.addf %291, %292 : vector<8x128xf32>
    %c0_191 = arith.constant 0 : index
    %c128_192 = arith.constant 128 : index
    %294 = vector.load %arg13[%c0_191, %c128_192] : memref<8x512xf32, #tpu.memory_space<vmem>>, vector<8x128xf32>
    %cst_193 = arith.constant 5.000000e-01 : f32
    %295 = vector.broadcast %cst_193 : f32 to vector<8x128xf32>
    %296 = arith.mulf %295, %294 : vector<8x128xf32>
    %297 = math.tanh %296 : vector<8x128xf32>
    %cst_194 = arith.constant 5.000000e-01 : f32
    %298 = vector.broadcast %cst_194 : f32 to vector<8x128xf32>
    %299 = arith.mulf %298, %297 : vector<8x128xf32>
    %cst_195 = arith.constant 5.000000e-01 : f32
    %300 = vector.broadcast %cst_195 : f32 to vector<8x128xf32>
    %301 = arith.addf %299, %300 : vector<8x128xf32>
    %c0_196 = arith.constant 0 : index
    %c256_197 = arith.constant 256 : index
    %302 = vector.load %arg13[%c0_196, %c256_197] : memref<8x512xf32, #tpu.memory_space<vmem>>, vector<8x128xf32>
    %303 = math.tanh %302 : vector<8x128xf32>
    %c0_198 = arith.constant 0 : index
    %c384_199 = arith.constant 384 : index
    %304 = vector.load %arg13[%c0_198, %c384_199] : memref<8x512xf32, #tpu.memory_space<vmem>>, vector<8x128xf32>
    %cst_200 = arith.constant 5.000000e-01 : f32
    %305 = vector.broadcast %cst_200 : f32 to vector<8x128xf32>
    %306 = arith.mulf %305, %304 : vector<8x128xf32>
    %307 = math.tanh %306 : vector<8x128xf32>
    %cst_201 = arith.constant 5.000000e-01 : f32
    %308 = vector.broadcast %cst_201 : f32 to vector<8x128xf32>
    %309 = arith.mulf %308, %307 : vector<8x128xf32>
    %cst_202 = arith.constant 5.000000e-01 : f32
    %310 = vector.broadcast %cst_202 : f32 to vector<8x128xf32>
    %311 = arith.addf %309, %310 : vector<8x128xf32>
    %312 = arith.mulf %301, %276 : vector<8x128xf32>
    %313 = arith.mulf %293, %303 : vector<8x128xf32>
    %314 = arith.addf %312, %313 : vector<8x128xf32>
    %315 = math.tanh %314 : vector<8x128xf32>
    %316 = arith.mulf %311, %315 : vector<8x128xf32>
    %c8_i32_203 = arith.constant 8 : i32
    %c0_204 = arith.constant 0 : index
    %c0_205 = arith.constant 0 : index
    %317 = vector.load %arg10[%c0_204, %c0_205] : memref<8x128xf32, #tpu.memory_space<vmem>>, vector<8x128xf32>
    tpu.vector_store %arg10[%c0_204, %c0_205], %316 {strides = array<i32>} : memref<8x128xf32, #tpu.memory_space<vmem>>, vector<8x128xf32>,
    %c0_206 = arith.constant 0 : index
    %c0_207 = arith.constant 0 : index
    %318 = vector.load %arg11[%c0_206, %c0_207] : memref<8x128xf32, #tpu.memory_space<vmem>>, vector<8x128xf32>
    tpu.vector_store %arg11[%c0_206, %c0_207], %314 {strides = array<i32>} : memref<8x128xf32, #tpu.memory_space<vmem>>, vector<8x128xf32>,
    %c0_i32_208 = arith.constant 0 : i32
    %319 = arith.cmpi eq, %arg1, %c0_i32_208 : i32
    %320 = arith.extui %319 : i1 to i32
    %c0_i32_209 = arith.constant 0 : i32
    %321 = arith.cmpi ne, %320, %c0_i32_209 : i32
    scf.if %321 {
      %c0_210 = arith.constant 0 : index
      %c0_211 = arith.constant 0 : index
      %322 = vector.load %arg8[%c0_210, %c0_211] : memref<8x128xf32, #tpu.memory_space<vmem>>, vector<8x128xf32>
      tpu.vector_store %arg8[%c0_210, %c0_211], %316 {strides = array<i32>} : memref<8x128xf32, #tpu.memory_space<vmem>>, vector<8x128xf32>,
      %c0_212 = arith.constant 0 : index
      %c0_213 = arith.constant 0 : index
      %323 = vector.load %arg9[%c0_212, %c0_213] : memref<8x128xf32, #tpu.memory_space<vmem>>, vector<8x128xf32>
      tpu.vector_store %arg9[%c0_212, %c0_213], %314 {strides = array<i32>} : memref<8x128xf32, #tpu.memory_space<vmem>>, vector<8x128xf32>,
    } else {
    }
    return
  }
  func.func @transform_0(%arg0: i32, %arg1: i32) -> (i32, i32, i32, i32) {
    %c0_i32 = arith.constant 0 : i32
    %c0_i32_0 = arith.constant 0 : i32
    %c0_i32_1 = arith.constant 0 : i32
    return %arg0, %arg1, %c0_i32, %c0_i32_0 : i32, i32, i32, i32
  }
  func.func @transform_1(%arg0: i32, %arg1: i32) -> (i32, i32) {
    %c0_i32 = arith.constant 0 : i32
    %c0_i32_0 = arith.constant 0 : i32
    %c0_i32_1 = arith.constant 0 : i32
    return %c0_i32, %c0_i32_0 : i32, i32
  }
  func.func @transform_2(%arg0: i32, %arg1: i32) -> (i32, i32) {
    %c0_i32 = arith.constant 0 : i32
    %c0_i32_0 = arith.constant 0 : i32
    %c0_i32_1 = arith.constant 0 : i32
    return %c0_i32, %c0_i32_0 : i32, i32
  }
  func.func @transform_3(%arg0: i32, %arg1: i32) -> (i32, i32) {
    %c0_i32 = arith.constant 0 : i32
    %c0_i32_0 = arith.constant 0 : i32
    %c0_i32_1 = arith.constant 0 : i32
    return %c0_i32, %c0_i32_0 : i32, i32
  }
  func.func @transform_4(%arg0: i32, %arg1: i32) -> (i32, i32) {
    %c0_i32 = arith.constant 0 : i32
    %c0_i32_0 = arith.constant 0 : i32
    return %arg0, %c0_i32 : i32, i32
  }
  func.func @transform_5(%arg0: i32, %arg1: i32) -> (i32, i32) {
    %c0_i32 = arith.constant 0 : i32
    %c0_i32_0 = arith.constant 0 : i32
    return %arg0, %c0_i32 : i32, i32
  }
  func.func @transform_6(%arg0: i32, %arg1: i32) -> (i32, i32) {
    %c0_i32 = arith.constant 0 : i32
    %c0_i32_0 = arith.constant 0 : i32
    return %arg0, %c0_i32 : i32, i32
  }
  func.func @transform_7(%arg0: i32, %arg1: i32) -> (i32, i32) {
    %c0_i32 = arith.constant 0 : i32
    %c0_i32_0 = arith.constant 0 : i32
    return %arg0, %c0_i32 : i32, i32
  }
}

</mosaic_0001>

<bundles_post_ra>
// kernel: tpu_custom_call.1
= control target key start
LH: loop header
LB: loop body
LE: loop exit
PB: predicated region body
PF: predicated region fallthrough
CT: control target
= control target key end

     0   :  { %13 = vsyncpa [#allocation7], 0  ;;  %s3611_s0 = inlined_call_operand.hbm [shape: f32[1,1,64,128], index: 0, kind: input, shape index: {}]   ;;  %s3612_s1 = inlined_call_operand.hbm [shape: f32[128,512], index: 1, kind: input, shape index: {}]   ;;  %s3613_s2 = inlined_call_operand.hbm [shape: f32[128,512], index: 2, kind: input, shape index: {}]   ;;  %s3614_s3 = inlined_call_operand.hbm [shape: f32[1,512], index: 3, kind: input, shape index: {}]   ;;  %s3615_s4 = inlined_call_operand.hbm [shape: f32[8,128], index: 4, kind: input, shape index: {}]   ;;  %s3616_s5 = inlined_call_operand.vmem [shape: f32[8,128], index: 5, kind: input, shape index: {}]   ;;  %s3617_s6 = inlined_call_operand.hbm [shape: f32[8,128], index: 6, kind: output, shape index: {0}]   ;;  %s3618_s7 = inlined_call_operand.hbm [shape: f32[8,128], index: 7, kind: output, shape index: {1}]  }
   0x1   :  { %14 = vsyncpa [#allocation10], 0 }
   0x2   :  { %15 = vsyncpa [#allocation13], 0 }
   0x3   :  { %16 = vsyncpa [#allocation8], 0 }
   0x4   :  { %17 = vsyncpa [#allocation17], 0  ;;  %s2653_s24 = smov [#allocation9]  }
   0x5   :  { %s35_s25 = sshll.u32 %s2653_s24, 4  ;;  %s36_s25 = int_to_ptr.vmem [resolvable:$true] %s35_s25 }
   0x6   :  { %s2511_s26 = scalar_lea.vmem %s36_s25, 8192  ;;  %p2516_p1 = scmp.lt.s32.totalorder %s36_s25, %s36_s25 }
   0x7   :  { %p2512_p0 = scmp.ne.s32.totalorder %s36_s25, %s2511_s26  ;;  %p2517_p2 = scmp.lt.s32.totalorder %s2511_s26, %s2511_s26 }
   0x9   :  { %p2518_p3 = por %p2517_p2, %p2516_p1 }
   0xb   :  { %p2519_p4 = pnand %p2518_p3, %p2512_p0 }
   0xd   :  { %2522 = shalt.err (!%p2519_p4)
}
   0xe   :  { %s2654_s27 = smov 512   ;;  %s2655_s28 = smov 32  }
   0xf   :  { %41 = dma.hbm_to_vmem [thread:$0]  %s3612_s1, 8192, %s36_s25, [#allocation10], %s2654_s27, %s2654_s27, %s2655_s28  }
  0x10   :  { %s2656_s8 = smov [#allocation12]   ;;  %s2657_s10 = smov [#allocation6]  }
  0x11   :  { %s60_s9 = sshll.u32 %s2656_s8, 4  ;;  %s23_s11 = sshll.u32 %s2657_s10, 4  ;;  %s61_s9 = int_to_ptr.vmem [resolvable:$true] %s60_s9  ;;  %s24_s11 = int_to_ptr.vmem [resolvable:$true] %s23_s11 }
  0x12   :  { %s2531_s12 = scalar_lea.vmem %s61_s9, 64  ;;  %p2536_p6 = scmp.lt.s32.totalorder %s61_s9, %s61_s9 }
  0x13   :  { %p2532_p5 = scmp.ne.s32.totalorder %s61_s9, %s2531_s12  ;;  %p2537_p7 = scmp.lt.s32.totalorder %s2531_s12, %s2531_s12 }
  0x15   :  { %p2538_p8 = por %p2537_p7, %p2536_p6 }
  0x17   :  { %p2539_p9 = pnand %p2538_p8, %p2532_p5 }
  0x19   :  { %2542 = shalt.err (!%p2539_p9)
}
  0x1a   :  { %63 = dma.hbm_to_vmem [thread:$0]  %s3614_s3, 64, %s61_s9, [#allocation13]  }
  0x1b   :  { %s2551_s15 = scalar_lea.vmem %s24_s11, 1024  ;;  %p2556_p11 = scmp.lt.s32.totalorder %s24_s11, %s24_s11 }
  0x1c   :  { %p2552_p10 = scmp.ne.s32.totalorder %s24_s11, %s2551_s15  ;;  %p2557_p12 = scmp.lt.s32.totalorder %s2551_s15, %s2551_s15 }
  0x1e   :  { %p2558_p13 = por %p2557_p12, %p2556_p11 }
  0x20   :  { %p2559_p0 = pnand %p2558_p13, %p2552_p10 }
  0x22   :  { %2562 = shalt.err (!%p2559_p0)
}
  0x23   :  { %s2658_s1 = smov 128   ;;  %s2659_s16 = smov 8  }
  0x24   :  { %29 = dma.hbm_to_vmem [thread:$0]  %s3611_s0, 1024, %s24_s11, [#allocation7], %s2658_s1, %s2658_s1, %s2659_s16  }
  0x25   :  { %s2660_s19 = smov [#allocation11]   ;;  %s2661_s21 = smov [#allocation14]  }
  0x26   :  { %s47_s20 = sshll.u32 %s2660_s19, 4  ;;  %s70_s22 = sshll.u32 %s2661_s21, 4  ;;  %s48_s20 = int_to_ptr.vmem [resolvable:$true] %s47_s20  ;;  %s71_s22 = int_to_ptr.vmem [resolvable:$true] %s70_s22 }
  0x27   :  { %s2571_s3 = scalar_lea.vmem %s48_s20, 8192  ;;  %p2576_p2 = scmp.lt.s32.totalorder %s48_s20, %s48_s20 }
  0x28   :  { %p2572_p1 = scmp.ne.s32.totalorder %s48_s20, %s2571_s3  ;;  %p2577_p3 = scmp.lt.s32.totalorder %s2571_s3, %s2571_s3 }
  0x2a   :  { %p2578_p4 = por %p2577_p3, %p2576_p2 }
  0x2c   :  { %p2579_p5 = pnand %p2578_p4, %p2572_p1 }
  0x2e   :  { %2582 = shalt.err (!%p2579_p5)
}
  0x2f   :  { %53 = dma.hbm_to_vmem [thread:$0]  %s3613_s2, 8192, %s48_s20, [#allocation10], %s2654_s27, %s2654_s27, %s2655_s28  }
  0x30   :  { %s2591_s0 = scalar_lea.vmem %s71_s22, 128  ;;  %p2596_p7 = scmp.lt.s32.totalorder %s71_s22, %s71_s22 }
  0x31   :  { %p2592_p6 = scmp.ne.s32.totalorder %s71_s22, %s2591_s0  ;;  %p2597_p8 = scmp.lt.s32.totalorder %s2591_s0, %s2591_s0 }
  0x33   :  { %p2598_p9 = por %p2597_p8, %p2596_p7 }
  0x35   :  { %p2599_p10 = pnand %p2598_p9, %p2592_p6 }
  0x37   :  { %2602 = shalt.err (!%p2599_p10)
}
  0x38   :  { %73 = dma.hbm_to_vmem [thread:$0]  %s3615_s4, 128, %s71_s22, [#allocation13]  }
  0x39   :  { %2643 = dma.done.wait [#allocation7], 1024  }
  0x3a   :  { %2644 = vsyncadd [#allocation7], 4294966272 }
  0x3b   :  { %2645 = dma.done.wait [#allocation10], 16384  }
  0x3c   :  { %2646 = vsyncadd [#allocation10], 4294950912 }
  0x3d   :  { %2647 = dma.done.wait [#allocation13], 192  }
  0x3e   :  { %2648 = vsyncadd [#allocation13], 4294967104  ;;  %v3619_v0 = vmov 0.0   ;;  %v168_v1 = vld [vmem:[#allocation9 + $0x1e8] sm:$0xff]  ;;  %v170_v2 = vld [vmem:[#allocation9 + $0x1f8] sm:$0xff] }
  0x3f   :  { %257 = vmatprep.mubr.f32.mxu0 %v3619_v0  ;;  %370 = vmatprep.mubr.f32.mxu1 %v3619_v0  ;;  %v167_v3 = vld [vmem:[#allocation9 + $0x1e0] sm:$0xff]  ;;  %v169_v4 = vld [vmem:[#allocation9 + $0x1f0] sm:$0xff]  ;;  %v164_v5 = vld [vmem:[#allocation9 + $0x1c8] sm:$0xff] }
  0x40   :  { %193 = vmatprep.subr.mxu0 %v168_v1  ;;  %306 = vmatprep.subr.mxu1 %v170_v2  ;;  %v166_v6 = vld [vmem:[#allocation9 + $0x1d8] sm:$0xff]  ;;  %v163_v7 = vld [vmem:[#allocation9 + $0x1c0] sm:$0xff]  ;;  %v165_v8 = vld [vmem:[#allocation9 + $0x1d0] sm:$0xff] }
  0x41   :  { %194 = vmatpush1.msra.mxu0 %v167_v3  ;;  %307 = vmatpush1.msra.mxu1 %v169_v4  ;;  %v160_v9 = vld [vmem:[#allocation9 + $0x1a8] sm:$0xff]  ;;  %v162_v10 = vld [vmem:[#allocation9 + $0x1b8] sm:$0xff]  ;;  %v159_v11 = vld [vmem:[#allocation9 + $0x1a0] sm:$0xff] }
  0x42   :  { %195 = vmatprep.subr.mxu0 %v164_v5  ;;  %308 = vmatprep.subr.mxu1 %v166_v6  ;;  %v161_v12 = vld [vmem:[#allocation9 + $0x1b0] sm:$0xff]  ;;  %v156_v13 = vld [vmem:[#allocation9 + $0x188] sm:$0xff]  ;;  %v158_v14 = vld [vmem:[#allocation9 + $0x198] sm:$0xff] }
  0x43   :  { %196 = vmatpush1.msra.mxu0 %v163_v7  ;;  %309 = vmatpush1.msra.mxu1 %v165_v8  ;;  %v155_v15 = vld [vmem:[#allocation9 + $0x180] sm:$0xff]  ;;  %v157_v16 = vld [vmem:[#allocation9 + $0x190] sm:$0xff]  ;;  %v152_v17 = vld [vmem:[#allocation9 + $0x168] sm:$0xff] }
  0x44   :  { %197 = vmatprep.subr.mxu0 %v160_v9  ;;  %310 = vmatprep.subr.mxu1 %v162_v10  ;;  %v154_v18 = vld [vmem:[#allocation9 + $0x178] sm:$0xff]  ;;  %v151_v19 = vld [vmem:[#allocation9 + $0x160] sm:$0xff]  ;;  %v153_v20 = vld [vmem:[#allocation9 + $0x170] sm:$0xff] }
  0x45   :  { %198 = vmatpush1.msra.mxu0 %v159_v11  ;;  %311 = vmatpush1.msra.mxu1 %v161_v12  ;;  %v148_v21 = vld [vmem:[#allocation9 + $0x148] sm:$0xff]  ;;  %v150_v22 = vld [vmem:[#allocation9 + $0x158] sm:$0xff]  ;;  %v147_v23 = vld [vmem:[#allocation9 + $0x140] sm:$0xff] }
  0x46   :  { %199 = vmatprep.subr.mxu0 %v156_v13  ;;  %312 = vmatprep.subr.mxu1 %v158_v14  ;;  %v149_v24 = vld [vmem:[#allocation9 + $0x150] sm:$0xff]  ;;  %v144_v25 = vld [vmem:[#allocation9 + $0x128] sm:$0xff]  ;;  %v146_v26 = vld [vmem:[#allocation9 + $0x138] sm:$0xff] }
  0x47   :  { %200 = vmatpush1.msra.mxu0 %v155_v15  ;;  %313 = vmatpush1.msra.mxu1 %v157_v16  ;;  %v143_v27 = vld [vmem:[#allocation9 + $0x120] sm:$0xff]  ;;  %v145_v28 = vld [vmem:[#allocation9 + $0x130] sm:$0xff]  ;;  %v140_v29 = vld [vmem:[#allocation9 + $0x108] sm:$0xff] }
  0x48   :  { %201 = vmatprep.subr.mxu0 %v152_v17  ;;  %314 = vmatprep.subr.mxu1 %v154_v18  ;;  %v142_v30 = vld [vmem:[#allocation9 + $0x118] sm:$0xff]  ;;  %v139_v31 = vld [vmem:[#allocation9 + $0x100] sm:$0xff]  ;;  %v141_v32 = vld [vmem:[#allocation9 + $0x110] sm:$0xff] }
  0x49   :  { %202 = vmatpush1.msra.mxu0 %v151_v19  ;;  %315 = vmatpush1.msra.mxu1 %v153_v20  ;;  %v136_v33 = vld [vmem:[#allocation9 + $0xe8] sm:$0xff]  ;;  %v138_v34 = vld [vmem:[#allocation9 + $0xf8] sm:$0xff]  ;;  %v135_v35 = vld [vmem:[#allocation9 + $0xe0] sm:$0xff] }
  0x4a   :  { %203 = vmatprep.subr.mxu0 %v148_v21  ;;  %316 = vmatprep.subr.mxu1 %v150_v22  ;;  %v137_v36 = vld [vmem:[#allocation9 + $0xf0] sm:$0xff]  ;;  %v132_v37 = vld [vmem:[#allocation9 + $0xc8] sm:$0xff]  ;;  %v134_v38 = vld [vmem:[#allocation9 + $0xd8] sm:$0xff] }
  0x4b   :  { %204 = vmatpush1.msra.mxu0 %v147_v23  ;;  %317 = vmatpush1.msra.mxu1 %v149_v24  ;;  %v131_v39 = vld [vmem:[#allocation9 + $0xc0] sm:$0xff]  ;;  %v133_v40 = vld [vmem:[#allocation9 + $0xd0] sm:$0xff]  ;;  %v128_v41 = vld [vmem:[#allocation9 + $0xa8] sm:$0xff] }
  0x4c   :  { %205 = vmatprep.subr.mxu0 %v144_v25  ;;  %318 = vmatprep.subr.mxu1 %v146_v26  ;;  %v130_v42 = vld [vmem:[#allocation9 + $0xb8] sm:$0xff]  ;;  %v127_v43 = vld [vmem:[#allocation9 + $0xa0] sm:$0xff]  ;;  %v129_v44 = vld [vmem:[#allocation9 + $0xb0] sm:$0xff] }
  0x4d   :  { %206 = vmatpush1.msra.mxu0 %v143_v27  ;;  %319 = vmatpush1.msra.mxu1 %v145_v28  ;;  %v124_v45 = vld [vmem:[#allocation9 + $0x88] sm:$0xff]  ;;  %v126_v46 = vld [vmem:[#allocation9 + $0x98] sm:$0xff]  ;;  %v123_v47 = vld [vmem:[#allocation9 + $0x80] sm:$0xff] }
  0x4e   :  { %207 = vmatprep.subr.mxu0 %v140_v29  ;;  %320 = vmatprep.subr.mxu1 %v142_v30  ;;  %v125_v48 = vld [vmem:[#allocation9 + $0x90] sm:$0xff]  ;;  %v120_v49 = vld [vmem:[#allocation9 + $0x68] sm:$0xff]  ;;  %v122_v50 = vld [vmem:[#allocation9 + $0x78] sm:$0xff] }
  0x4f   :  { %208 = vmatpush1.msra.mxu0 %v139_v31  ;;  %321 = vmatpush1.msra.mxu1 %v141_v32  ;;  %v119_v51 = vld [vmem:[#allocation9 + $0x60] sm:$0xff]  ;;  %v121_v52 = vld [vmem:[#allocation9 + $0x70] sm:$0xff]  ;;  %v116_v53 = vld [vmem:[#allocation9 + $0x48] sm:$0xff] }
  0x50   :  { %209 = vmatprep.subr.mxu0 %v136_v33  ;;  %322 = vmatprep.subr.mxu1 %v138_v34  ;;  %v118_v54 = vld [vmem:[#allocation9 + $0x58] sm:$0xff]  ;;  %v115_v55 = vld [vmem:[#allocation9 + $0x40] sm:$0xff]  ;;  %v117_v56 = vld [vmem:[#allocation9 + $0x50] sm:$0xff] }
  0x51   :  { %210 = vmatpush1.msra.mxu0 %v135_v35  ;;  %323 = vmatpush1.msra.mxu1 %v137_v36  ;;  %v112_v57 = vld [vmem:[#allocation9 + $0x28] sm:$0xff]  ;;  %v114_v58 = vld [vmem:[#allocation9 + $0x38] sm:$0xff]  ;;  %v111_v59 = vld [vmem:[#allocation9 + $0x20] sm:$0xff] }
  0x52   :  { %211 = vmatprep.subr.mxu0 %v132_v37  ;;  %324 = vmatprep.subr.mxu1 %v134_v38  ;;  %v113_v60 = vld [vmem:[#allocation9 + $0x30] sm:$0xff]  ;;  %v108_v61 = vld [vmem:[#allocation9 + $0x8] sm:$0xff]  ;;  %v110_v62 = vld [vmem:[#allocation9 + $0x18] sm:$0xff] }
  0x53   :  { %212 = vmatpush1.msra.mxu0 %v131_v39  ;;  %325 = vmatpush1.msra.mxu1 %v133_v40  ;;  %v107_v63 = vld [vmem:[#allocation9] sm:$0xff]  ;;  %v109_v1 = vld [vmem:[#allocation9 + $0x10] sm:$0xff]  ;;  %v2728_v3 = vld [vmem:[#allocation11 + $0x1e8] sm:$0xff] }
  0x54   :  { %213 = vmatprep.subr.mxu0 %v128_v41  ;;  %326 = vmatprep.subr.mxu1 %v130_v42  ;;  %v99_v2 = vld [vmem:[#allocation6] sm:$0xff]  ;;  %v2730_v4 = vld [vmem:[#allocation11 + $0x1f8] sm:$0xff]  ;;  %v2734_v6 = vld [vmem:[#allocation11 + $0x1f0] sm:$0xff] }
  0x55   :  { %214 = vmatpush1.msra.mxu0 %v127_v43  ;;  %327 = vmatpush1.msra.mxu1 %v129_v44  ;;  %v2732_v5 = vld [vmem:[#allocation11 + $0x1e0] sm:$0xff]  ;;  %v2736_v7 = vld [vmem:[#allocation11 + $0x1c8] sm:$0xff]  ;;  %v2738_v8 = vld [vmem:[#allocation11 + $0x1d8] sm:$0xff] }
  0x56   :  { %215 = vmatprep.subr.mxu0 %v124_v45  ;;  %328 = vmatprep.subr.mxu1 %v126_v46  ;;  %v2744_v9 = vld [vmem:[#allocation11 + $0x1c0] sm:$0xff]  ;;  %v2746_v10 = vld [vmem:[#allocation11 + $0x1d0] sm:$0xff]  ;;  %v100_v11 = vld [vmem:[#allocation6 + $0x8] sm:$0xff] }
  0x57   :  { %216 = vmatpush1.msra.mxu0 %v123_v47  ;;  %329 = vmatpush1.msra.mxu1 %v125_v48  ;;  %v2752_v12 = vld [vmem:[#allocation11 + $0x1a8] sm:$0xff]  ;;  %v2754_v13 = vld [vmem:[#allocation11 + $0x1b8] sm:$0xff]  ;;  %v2758_v14 = vld [vmem:[#allocation11 + $0x1a0] sm:$0xff] }
  0x58   :  { %217 = vmatprep.subr.mxu0 %v120_v49  ;;  %330 = vmatprep.subr.mxu1 %v122_v50  ;;  %v2760_v15 = vld [vmem:[#allocation11 + $0x1b0] sm:$0xff]  ;;  %v2762_v16 = vld [vmem:[#allocation11 + $0x188] sm:$0xff]  ;;  %v2764_v17 = vld [vmem:[#allocation11 + $0x198] sm:$0xff] }
  0x59   :  { %218 = vmatpush1.msra.mxu0 %v119_v51  ;;  %331 = vmatpush1.msra.mxu1 %v121_v52  ;;  %v2770_v18 = vld [vmem:[#allocation11 + $0x180] sm:$0xff]  ;;  %v2772_v19 = vld [vmem:[#allocation11 + $0x190] sm:$0xff]  ;;  %v2778_v21 = vld [vmem:[#allocation11 + $0x168] sm:$0xff] }
  0x5a   :  { %219 = vmatprep.subr.mxu0 %v116_v53  ;;  %332 = vmatprep.subr.mxu1 %v118_v54  ;;  %v101_v20 = vld [vmem:[#allocation6 + $0x10] sm:$0xff]  ;;  %v2780_v22 = vld [vmem:[#allocation11 + $0x178] sm:$0xff]  ;;  %v2784_v23 = vld [vmem:[#allocation11 + $0x160] sm:$0xff] }
  0x5b   :  { %220 = vmatpush1.msra.mxu0 %v115_v55  ;;  %333 = vmatpush1.msra.mxu1 %v117_v56  ;;  %v2786_v24 = vld [vmem:[#allocation11 + $0x170] sm:$0xff]  ;;  %v2788_v25 = vld [vmem:[#allocation11 + $0x148] sm:$0xff]  ;;  %v2790_v26 = vld [vmem:[#allocation11 + $0x158] sm:$0xff] }
  0x5c   :  { %221 = vmatprep.subr.mxu0 %v112_v57  ;;  %334 = vmatprep.subr.mxu1 %v114_v58  ;;  %v2796_v27 = vld [vmem:[#allocation11 + $0x140] sm:$0xff]  ;;  %v2798_v28 = vld [vmem:[#allocation11 + $0x150] sm:$0xff]  ;;  %v102_v29 = vld [vmem:[#allocation6 + $0x18] sm:$0xff] }
  0x5d   :  { %222 = vmatpush1.msra.mxu0 %v111_v59  ;;  %335 = vmatpush1.msra.mxu1 %v113_v60  ;;  %v2804_v30 = vld [vmem:[#allocation11 + $0x128] sm:$0xff]  ;;  %v2806_v31 = vld [vmem:[#allocation11 + $0x138] sm:$0xff]  ;;  %v2810_v32 = vld [vmem:[#allocation11 + $0x120] sm:$0xff] }
  0x5e   :  { %223 = vmatprep.subr.mxu0 %v108_v61  ;;  %336 = vmatprep.subr.mxu1 %v110_v62  ;;  %v2812_v33 = vld [vmem:[#allocation11 + $0x130] sm:$0xff]  ;;  %v2814_v34 = vld [vmem:[#allocation11 + $0x108] sm:$0xff]  ;;  %v2816_v35 = vld [vmem:[#allocation11 + $0x118] sm:$0xff] }
  0x5f   :  { %224 = vmatpush1.msra.mxu0 %v107_v63  ;;  %337 = vmatpush1.msra.mxu1 %v109_v1  ;;  %v2822_v36 = vld [vmem:[#allocation11 + $0x100] sm:$0xff]  ;;  %v2824_v37 = vld [vmem:[#allocation11 + $0x110] sm:$0xff]  ;;  %v2830_v39 = vld [vmem:[#allocation11 + $0xe8] sm:$0xff] }
  0x60   :  { %258 = vmatmul.mubr.f32.vlgmr.msra.gmra.mxu0 %v99_v2  ;;  %371 = vmatmul.mubr.f32.vlgmr.msra.gmra.mxu1 %v99_v2  ;;  %v103_v38 = vld [vmem:[#allocation6 + $0x20] sm:$0xff]  ;;  %v2832_v40 = vld [vmem:[#allocation11 + $0xf8] sm:$0xff]  ;;  %v2838_v42 = vld [vmem:[#allocation11 + $0xf0] sm:$0xff] }
  0x61   :  { %521 = vmatprep.subr.mxu0 %v2728_v3  ;;  %592 = vmatprep.subr.mxu1 %v2730_v4  ;;  %v2836_v41 = vld [vmem:[#allocation11 + $0xe0] sm:$0xff]  ;;  %v2840_v43 = vld [vmem:[#allocation11 + $0xc8] sm:$0xff]  ;;  %v2842_v44 = vld [vmem:[#allocation11 + $0xd8] sm:$0xff] }
  0x62   :  { %522 = vmatpush1.msra.mxu0 %v2732_v5  ;;  %593 = vmatpush1.msra.mxu1 %v2734_v6  ;;  %v2848_v45 = vld [vmem:[#allocation11 + $0xc0] sm:$0xff]  ;;  %v2850_v46 = vld [vmem:[#allocation11 + $0xd0] sm:$0xff]  ;;  %v104_v47 = vld [vmem:[#allocation6 + $0x28] sm:$0xff] }
  0x63   :  { %523 = vmatprep.subr.mxu0 %v2736_v7  ;;  %594 = vmatprep.subr.mxu1 %v2738_v8  ;;  %v2856_v48 = vld [vmem:[#allocation11 + $0xa8] sm:$0xff]  ;;  %v2858_v49 = vld [vmem:[#allocation11 + $0xb8] sm:$0xff]  ;;  %v2862_v50 = vld [vmem:[#allocation11 + $0xa0] sm:$0xff] }
  0x64   :  { %263 = vmatprep.mubr.f32.mxu0 %v3619_v0  ;;  %376 = vmatprep.mubr.f32.mxu1 %v3619_v0  ;;  %v2864_v51 = vld [vmem:[#allocation11 + $0xb0] sm:$0xff]  ;;  %v2866_v52 = vld [vmem:[#allocation11 + $0x88] sm:$0xff]  ;;  %v2868_v53 = vld [vmem:[#allocation11 + $0x98] sm:$0xff] }
  0x65   :  { %524 = vmatpush1.msra.mxu0 %v2744_v9  ;;  %595 = vmatpush1.msra.mxu1 %v2746_v10  ;;  %3689 = vst [vmem:[#allocation23_spill] sm:$0xff] %v2866_v52  ;;  %3690 = vst [vmem:[#allocation24_spill] sm:$0xff] %v2868_v53  ;;  %v2874_v54 = vld [vmem:[#allocation11 + $0x80] sm:$0xff]  ;;  %v2876_v55 = vld [vmem:[#allocation11 + $0x90] sm:$0xff] }
  0x66   :  { %264 = vmatmul.mubr.f32.gmra.mxu0 %v100_v11  ;;  %377 = vmatmul.mubr.f32.gmra.mxu1 %v100_v11  ;;  %3691 = vst [vmem:[#allocation25_spill] sm:$0xff] %v2874_v54  ;;  %3692 = vst [vmem:[#allocation26_spill] sm:$0xff] %v2876_v55  ;;  %v105_v56 = vld [vmem:[#allocation6 + $0x30] sm:$0xff]  ;;  %v2882_v57 = vld [vmem:[#allocation11 + $0x68] sm:$0xff] }
  0x67   :  { %525 = vmatprep.subr.mxu0 %v2752_v12  ;;  %596 = vmatprep.subr.mxu1 %v2754_v13  ;;  %3693 = vst [vmem:[#allocation27_spill] sm:$0xff] %v2882_v57  ;;  %v2884_v58 = vld [vmem:[#allocation11 + $0x78] sm:$0xff]  ;;  %v2888_v59 = vld [vmem:[#allocation11 + $0x60] sm:$0xff]  ;;  %v2890_v60 = vld [vmem:[#allocation11 + $0x70] sm:$0xff] }
  0x68   :  { %526 = vmatpush1.msra.mxu0 %v2758_v14  ;;  %597 = vmatpush1.msra.mxu1 %v2760_v15  ;;  %3694 = vst [vmem:[#allocation28_spill] sm:$0xff] %v2884_v58  ;;  %3695 = vst [vmem:[#allocation29_spill] sm:$0xff] %v2888_v59  ;;  %v2892_v61 = vld [vmem:[#allocation11 + $0x48] sm:$0xff]  ;;  %v2894_v62 = vld [vmem:[#allocation11 + $0x58] sm:$0xff] }
  0x69   :  { %527 = vmatprep.subr.mxu0 %v2762_v16  ;;  %598 = vmatprep.subr.mxu1 %v2764_v17  ;;  %3696 = vst [vmem:[#allocation30_spill] sm:$0xff] %v2890_v60  ;;  %3697 = vst [vmem:[#allocation31_spill] sm:$0xff] %v2892_v61  ;;  %v2900_v63 = vld [vmem:[#allocation11 + $0x40] sm:$0xff]  ;;  %v2902_v1 = vld [vmem:[#allocation11 + $0x50] sm:$0xff] }
  0x6a   :  { %269 = vmatprep.mubr.f32.mxu0 %v3619_v0  ;;  %382 = vmatprep.mubr.f32.mxu1 %v3619_v0  ;;  %3698 = vst [vmem:[#allocation32_spill] sm:$0xff] %v2894_v62  ;;  %3699 = vst [vmem:[#allocation33_spill] sm:$0xff] %v2900_v63  ;;  %v106_v2 = vld [vmem:[#allocation6 + $0x38] sm:$0xff]  ;;  %v2908_v11 = vld [vmem:[#allocation11 + $0x28] sm:$0xff] }
  0x6b   :  { %528 = vmatpush1.msra.mxu0 %v2770_v18  ;;  %599 = vmatpush1.msra.mxu1 %v2772_v19  ;;  %3700 = vst [vmem:[#allocation34_spill] sm:$0xff] %v2902_v1  ;;  %3701 = vst [vmem:[#allocation35_spill] sm:$0xff] %v2908_v11 }
  0x6c   :  { %270 = vmatmul.mubr.f32.gmra.mxu0 %v101_v20  ;;  %383 = vmatmul.mubr.f32.gmra.mxu1 %v101_v20  ;;  %v2910_v20 = vld [vmem:[#allocation11 + $0x38] sm:$0xff] }
  0x6d   :  { %529 = vmatprep.subr.mxu0 %v2778_v21  ;;  %600 = vmatprep.subr.mxu1 %v2780_v22  ;;  %3702 = vst [vmem:[#allocation36_spill] sm:$0xff] %v2910_v20 }
  0x6e   :  { %530 = vmatpush1.msra.mxu0 %v2784_v23  ;;  %601 = vmatpush1.msra.mxu1 %v2786_v24 }
  0x6f   :  { %531 = vmatprep.subr.mxu0 %v2788_v25  ;;  %602 = vmatprep.subr.mxu1 %v2790_v26 }
  0x70   :  { %275 = vmatprep.mubr.f32.mxu0 %v3619_v0  ;;  %388 = vmatprep.mubr.f32.mxu1 %v3619_v0 }
  0x71   :  { %532 = vmatpush1.msra.mxu0 %v2796_v27  ;;  %603 = vmatpush1.msra.mxu1 %v2798_v28 }
  0x72   :  { %276 = vmatmul.mubr.f32.gmra.mxu0 %v102_v29  ;;  %389 = vmatmul.mubr.f32.gmra.mxu1 %v102_v29  ;;  %v2914_v29 = vld [vmem:[#allocation11 + $0x20] sm:$0xff] }
  0x73   :  { %533 = vmatprep.subr.mxu0 %v2804_v30  ;;  %604 = vmatprep.subr.mxu1 %v2806_v31  ;;  %3703 = vst [vmem:[#allocation37_spill] sm:$0xff] %v2914_v29 }
  0x74   :  { %534 = vmatpush1.msra.mxu0 %v2810_v32  ;;  %605 = vmatpush1.msra.mxu1 %v2812_v33 }
  0x75   :  { %535 = vmatprep.subr.mxu0 %v2814_v34  ;;  %606 = vmatprep.subr.mxu1 %v2816_v35 }
  0x76   :  { %281 = vmatprep.mubr.f32.mxu0 %v3619_v0  ;;  %394 = vmatprep.mubr.f32.mxu1 %v3619_v0 }
  0x77   :  { %536 = vmatpush1.msra.mxu0 %v2822_v36  ;;  %607 = vmatpush1.msra.mxu1 %v2824_v37 }
  0x78   :  { %282 = vmatmul.mubr.f32.gmra.mxu0 %v103_v38  ;;  %395 = vmatmul.mubr.f32.gmra.mxu1 %v103_v38  ;;  %v2916_v38 = vld [vmem:[#allocation11 + $0x30] sm:$0xff] }
  0x79   :  { %537 = vmatprep.subr.mxu0 %v2830_v39  ;;  %608 = vmatprep.subr.mxu1 %v2832_v40  ;;  %3704 = vst [vmem:[#allocation38_spill] sm:$0xff] %v2916_v38 }
  0x7a   :  { %538 = vmatpush1.msra.mxu0 %v2836_v41  ;;  %609 = vmatpush1.msra.mxu1 %v2838_v42 }
  0x7b   :  { %539 = vmatprep.subr.mxu0 %v2840_v43  ;;  %610 = vmatprep.subr.mxu1 %v2842_v44 }
  0x7c   :  { %287 = vmatprep.mubr.f32.mxu0 %v3619_v0  ;;  %400 = vmatprep.mubr.f32.mxu1 %v3619_v0 }
  0x7d   :  { %540 = vmatpush1.msra.mxu0 %v2848_v45  ;;  %611 = vmatpush1.msra.mxu1 %v2850_v46 }
  0x7e   :  { %288 = vmatmul.mubr.f32.gmra.mxu0 %v104_v47  ;;  %401 = vmatmul.mubr.f32.gmra.mxu1 %v104_v47  ;;  %v2918_v47 = vld [vmem:[#allocation11 + $0x8] sm:$0xff] }
  0x7f   :  { %541 = vmatprep.subr.mxu0 %v2856_v48  ;;  %612 = vmatprep.subr.mxu1 %v2858_v49  ;;  %3705 = vst [vmem:[#allocation39_spill] sm:$0xff] %v2918_v47 }
  0x80   :  { %542 = vmatpush1.msra.mxu0 %v2862_v50  ;;  %613 = vmatpush1.msra.mxu1 %v2864_v51 }
  0x81   :  { %543 = vmatprep.subr.mxu0 %v2866_v52  ;;  %614 = vmatprep.subr.mxu1 %v2868_v53 }
  0x82   :  { %293 = vmatprep.mubr.f32.mxu0 %v3619_v0  ;;  %406 = vmatprep.mubr.f32.mxu1 %v3619_v0 }
  0x83   :  { %544 = vmatpush1.msra.mxu0 %v2874_v54  ;;  %615 = vmatpush1.msra.mxu1 %v2876_v55 }
  0x84   :  { %294 = vmatmul.mubr.f32.gmra.mxu0 %v105_v56  ;;  %407 = vmatmul.mubr.f32.gmra.mxu1 %v105_v56  ;;  %v2920_v56 = vld [vmem:[#allocation11 + $0x18] sm:$0xff] }
  0x85   :  { %545 = vmatprep.subr.mxu0 %v2882_v57  ;;  %616 = vmatprep.subr.mxu1 %v2884_v58  ;;  %3706 = vst [vmem:[#allocation40_spill] sm:$0xff] %v2920_v56 }
  0x86   :  { %546 = vmatpush1.msra.mxu0 %v2888_v59  ;;  %617 = vmatpush1.msra.mxu1 %v2890_v60 }
  0x87   :  { %547 = vmatprep.subr.mxu0 %v2892_v61  ;;  %618 = vmatprep.subr.mxu1 %v2894_v62 }
  0x88   :  { %299 = vmatprep.mubr.f32.mxu0 %v3619_v0  ;;  %412 = vmatprep.mubr.f32.mxu1 %v3619_v0  ;;  %v2924_v0 = vld [vmem:[#allocation11] sm:$0xff] }
  0x89   :  { %548 = vmatpush1.msra.mxu0 %v2900_v63  ;;  %619 = vmatpush1.msra.mxu1 %v2902_v1  ;;  %3707 = vst [vmem:[#allocation41_spill] sm:$0xff] %v2924_v0  ;;  %v2928_v1 = vld [vmem:[#allocation11 + $0x10] sm:$0xff]  ;;  %v3709_v63 = vmov 0.0  }
  0x8a   :  { %300 = vmatmul.mubr.f32.gmra.mxu0 %v106_v2  ;;  %413 = vmatmul.mubr.f32.gmra.mxu1 %v106_v2  ;;  %3708 = vst [vmem:[#allocation42_spill] sm:$0xff] %v2928_v1  ;;  %v95_v2 = vld [vmem:[#allocation14] sm:$0xff] }
  0x8b   :  { %549 = vmatprep.subr.mxu0 %v2908_v11  ;;  %620 = vmatprep.subr.mxu1 %v2910_v20 }
  0x8c   :  { %550 = vmatpush1.msra.mxu0 %v2914_v29  ;;  %621 = vmatpush1.msra.mxu1 %v2916_v38 }
  0x8d   :  { %551 = vmatprep.subr.mxu0 %v2918_v47  ;;  %622 = vmatprep.subr.mxu1 %v2920_v56 }
  0x8e   :  { %552 = vmatpush1.msra.mxu0 %v2924_v0  ;;  %585 = vmatprep.mubr.f32.mxu0 %v3709_v63 }
  0x8f   :  { %623 = vmatpush1.msra.mxu1 %v2928_v1  ;;  %656 = vmatprep.mubr.f32.mxu1 %v3709_v63 }
  0x90   :  { %586 = vmatmul.mubr.f32.vlgmr.msra.gmra.mxu0 %v95_v2  ;;  %657 = vmatmul.mubr.f32.vlgmr.msra.gmra.mxu1 %v95_v2  ;;  %v3710_v2 = vld [vmem:[#allocation33_spill] sm:$0xff] }
  0x91   :  { %761 = vmatprep.subr.mxu0 %v2728_v3  ;;  %832 = vmatprep.subr.mxu1 %v2730_v4 }
  0x92   :  { %762 = vmatpush1.msra.mxu0 %v2732_v5  ;;  %833 = vmatpush1.msra.mxu1 %v2734_v6 }
  0x93   :  { %763 = vmatprep.subr.mxu0 %v2736_v7  ;;  %834 = vmatprep.subr.mxu1 %v2738_v8 }
  0x94   :  { %764 = vmatpush1.msra.mxu0 %v2744_v9  ;;  %835 = vmatpush1.msra.mxu1 %v2746_v10 }
  0x95   :  { %765 = vmatprep.subr.mxu0 %v2752_v12  ;;  %836 = vmatprep.subr.mxu1 %v2754_v13 }
  0x96   :  { %766 = vmatpush1.msra.mxu0 %v2758_v14  ;;  %837 = vmatpush1.msra.mxu1 %v2760_v15 }
  0x97   :  { %767 = vmatprep.subr.mxu0 %v2762_v16  ;;  %838 = vmatprep.subr.mxu1 %v2764_v17 }
  0x98   :  { %768 = vmatpush1.msra.mxu0 %v2770_v18  ;;  %839 = vmatpush1.msra.mxu1 %v2772_v19 }
  0x99   :  { %769 = vmatprep.subr.mxu0 %v2778_v21  ;;  %840 = vmatprep.subr.mxu1 %v2780_v22 }
  0x9a   :  { %770 = vmatpush1.msra.mxu0 %v2784_v23  ;;  %841 = vmatpush1.msra.mxu1 %v2786_v24 }
  0x9b   :  { %771 = vmatprep.subr.mxu0 %v2788_v25  ;;  %842 = vmatprep.subr.mxu1 %v2790_v26 }
  0x9c   :  { %772 = vmatpush1.msra.mxu0 %v2796_v27  ;;  %843 = vmatpush1.msra.mxu1 %v2798_v28 }
  0x9d   :  { %773 = vmatprep.subr.mxu0 %v2804_v30  ;;  %844 = vmatprep.subr.mxu1 %v2806_v31 }
  0x9e   :  { %774 = vmatpush1.msra.mxu0 %v2810_v32  ;;  %845 = vmatpush1.msra.mxu1 %v2812_v33 }
  0x9f   :  { %775 = vmatprep.subr.mxu0 %v2814_v34  ;;  %846 = vmatprep.subr.mxu1 %v2816_v35 }
  0xa0   :  { %776 = vmatpush1.msra.mxu0 %v2822_v36  ;;  %847 = vmatpush1.msra.mxu1 %v2824_v37 }
  0xa1   :  { %777 = vmatprep.subr.mxu0 %v2830_v39  ;;  %848 = vmatprep.subr.mxu1 %v2832_v40 }
  0xa2   :  { %778 = vmatpush1.msra.mxu0 %v2836_v41  ;;  %849 = vmatpush1.msra.mxu1 %v2838_v42 }
  0xa3   :  { %779 = vmatprep.subr.mxu0 %v2840_v43  ;;  %850 = vmatprep.subr.mxu1 %v2842_v44 }
  0xa4   :  { %780 = vmatpush1.msra.mxu0 %v2848_v45  ;;  %851 = vmatpush1.msra.mxu1 %v2850_v46 }
  0xa5   :  { %781 = vmatprep.subr.mxu0 %v2856_v48  ;;  %852 = vmatprep.subr.mxu1 %v2858_v49 }
  0xa6   :  { %782 = vmatpush1.msra.mxu0 %v2862_v50  ;;  %853 = vmatpush1.msra.mxu1 %v2864_v51 }
  0xa7   :  { %783 = vmatprep.subr.mxu0 %v2866_v52  ;;  %854 = vmatprep.subr.mxu1 %v2868_v53  ;;  %v3711_v52 = vld [vmem:[#allocation34_spill] sm:$0xff] }
  0xa8   :  { %784 = vmatpush1.msra.mxu0 %v2874_v54  ;;  %855 = vmatpush1.msra.mxu1 %v2876_v55 }
  0xa9   :  { %785 = vmatprep.subr.mxu0 %v2882_v57  ;;  %856 = vmatprep.subr.mxu1 %v2884_v58 }
  0xaa   :  { %786 = vmatpush1.msra.mxu0 %v2888_v59  ;;  %857 = vmatpush1.msra.mxu1 %v2890_v60 }
  0xab   :  { %787 = vmatprep.subr.mxu0 %v2892_v61  ;;  %858 = vmatprep.subr.mxu1 %v2894_v62 }
  0xac   :  { %788 = vmatpush1.msra.mxu0 %v3710_v2  ;;  %859 = vmatpush1.msra.mxu1 %v3711_v52  ;;  %v171_v52 = vld [vmem:[#allocation12] sm:$0xf] }
  0xad   :  { %789 = vmatprep.subr.mxu0 %v2908_v11  ;;  %860 = vmatprep.subr.mxu1 %v2910_v20  ;;  %v173_v20 = vlaneseq }
  0xae   :  { %790 = vmatpush1.msra.mxu0 %v2914_v29  ;;  %861 = vmatpush1.msra.mxu1 %v2916_v38 }
  0xaf   :  { %791 = vmatprep.subr.mxu0 %v2918_v47  ;;  %862 = vmatprep.subr.mxu1 %v2920_v56  ;;  %v174_v29 = vshrl.u32 %v173_v20, 7 }
  0xb0   :  { %792 = vmatpush1.msra.mxu0 %v2924_v0  ;;  %825 = vmatprep.mubr.f32.mxu0 %v3709_v63 }
  0xb1   :  { %863 = vmatpush1.msra.mxu1 %v2928_v1  ;;  %896 = vmatprep.mubr.f32.mxu1 %v3709_v63  ;;  %v175_v47 = vsub.s32 0, %v174_v29  ;;  %v183_v56 = vsub.s32 2, %v174_v29  ;;  %v179_v1 = vsub.s32 1, %v174_v29  ;;  %v187_v62 = vsub.s32 3, %v174_v29 }
  0xb2   :  { %1001 = vmatprep.subr.mxu0 %v2728_v3  ;;  %1072 = vmatprep.subr.mxu1 %v2730_v4 }
  0xb3   :  { %v176_v63 = vrot.slane %v171_v52, %v175_v47  ;;  %v3012_v61 = vrot.slane %v171_v52, %v183_v56  ;;  %v180_v60 = vrot.slane %v171_v52, %v179_v1  ;;  %v3014_v20 = vrot.slane %v171_v52, %v187_v62 }
 0x120   :  { %v3004_v11 = vpop.f32.mrf.mxu0  ;;  %v3006_v38 = vpop.f32.mrf.mxu1 }
 0x122   :  { %v3008_v0 = vpop.f32.mrf.mxu0  ;;  %v3010_v2 = vpop.f32.mrf.mxu1 }
 0x126   :  { %v265_v3 = vpop.f32.mrf.mxu0  ;;  %v378_v4 = vpop.f32.mrf.mxu1 }
 0x127   :  { %v3016_v59 = vadd.f32 %v265_v3, %v176_v63  ;;  %v3019_v58 = vadd.f32 %v378_v4, %v3012_v61 }
 0x128   :  { %v267_v57 = vpop.f32.mrf.mxu0  ;;  %v380_v55 = vpop.f32.mrf.mxu1 }
 0x129   :  { %3712 = vst [vmem:[#allocation43_spill] sm:$0xff] %v3016_v59  ;;  %3713 = vst [vmem:[#allocation44_spill] sm:$0xff] %v3019_v58  ;;  %v3021_v54 = vadd.f32 %v267_v57, %v180_v60  ;;  %v3024_v53 = vadd.f32 %v380_v55, %v3014_v20 }
 0x12b   :  { %3714 = vst [vmem:[#allocation45_spill] sm:$0xff] %v3021_v54  ;;  %3715 = vst [vmem:[#allocation46_spill] sm:$0xff] %v3024_v53 }
 0x12c   :  { %v271_v29 = vpop.f32.mrf.mxu0  ;;  %v384_v47 = vpop.f32.mrf.mxu1 }
 0x12d   :  { %v3026_v56 = vadd.f32 %v271_v29, %v176_v63  ;;  %v3029_v1 = vadd.f32 %v384_v47, %v3012_v61 }
 0x12e   :  { %v273_v52 = vpop.f32.mrf.mxu0  ;;  %v386_v62 = vpop.f32.mrf.mxu1 }
 0x12f   :  { %3716 = vst [vmem:[#allocation47_spill] sm:$0xff] %v3026_v56  ;;  %3717 = vst [vmem:[#allocation48_spill] sm:$0xff] %v3029_v1  ;;  %v3031_v3 = vadd.f32 %v273_v52, %v180_v60  ;;  %v3034_v4 = vadd.f32 %v386_v62, %v3014_v20 }
 0x131   :  { %3718 = vst [vmem:[#allocation49_spill] sm:$0xff] %v3031_v3  ;;  %3719 = vst [vmem:[#allocation50_spill] sm:$0xff] %v3034_v4 }
 0x132   :  { %v277_v58 = vpop.f32.mrf.mxu0  ;;  %v390_v57 = vpop.f32.mrf.mxu1 }
 0x133   :  { %v3036_v54 = vadd.f32 %v277_v58, %v176_v63  ;;  %v3039_v55 = vadd.f32 %v390_v57, %v3012_v61 }
 0x134   :  { %v279_v53 = vpop.f32.mrf.mxu0  ;;  %v392_v29 = vpop.f32.mrf.mxu1 }
 0x135   :  { %3720 = vst [vmem:[#allocation51_spill] sm:$0xff] %v3036_v54  ;;  %3721 = vst [vmem:[#allocation52_spill] sm:$0xff] %v3039_v55  ;;  %v3041_v56 = vadd.f32 %v279_v53, %v180_v60  ;;  %v3044_v47 = vadd.f32 %v392_v29, %v3014_v20 }
 0x137   :  { %3722 = vst [vmem:[#allocation53_spill] sm:$0xff] %v3041_v56  ;;  %3723 = vst [vmem:[#allocation54_spill] sm:$0xff] %v3044_v47 }
 0x138   :  { %v283_v1 = vpop.f32.mrf.mxu0  ;;  %v396_v52 = vpop.f32.mrf.mxu1 }
 0x139   :  { %v3046_v3 = vadd.f32 %v283_v1, %v176_v63  ;;  %v3049_v62 = vadd.f32 %v396_v52, %v3012_v61 }
 0x13a   :  { %v285_v4 = vpop.f32.mrf.mxu0  ;;  %v398_v58 = vpop.f32.mrf.mxu1 }
 0x13b   :  { %3724 = vst [vmem:[#allocation55_spill] sm:$0xff] %v3046_v3  ;;  %3725 = vst [vmem:[#allocation56_spill] sm:$0xff] %v3049_v62  ;;  %v3051_v54 = vadd.f32 %v285_v4, %v180_v60  ;;  %v3054_v57 = vadd.f32 %v398_v58, %v3014_v20 }
 0x13d   :  { %3726 = vst [vmem:[#allocation57_spill] sm:$0xff] %v3051_v54  ;;  %3727 = vst [vmem:[#allocation58_spill] sm:$0xff] %v3054_v57 }
 0x13e   :  { %v289_v55 = vpop.f32.mrf.mxu0  ;;  %v402_v53 = vpop.f32.mrf.mxu1 }
 0x13f   :  { %v3056_v56 = vadd.f32 %v289_v55, %v176_v63  ;;  %v3059_v29 = vadd.f32 %v402_v53, %v3012_v61 }
 0x140   :  { %v291_v47 = vpop.f32.mrf.mxu0  ;;  %v404_v1 = vpop.f32.mrf.mxu1 }
 0x141   :  { %3728 = vst [vmem:[#allocation59_spill] sm:$0xff] %v3056_v56  ;;  %3729 = vst [vmem:[#allocation60_spill] sm:$0xff] %v3059_v29  ;;  %v3061_v3 = vadd.f32 %v291_v47, %v180_v60  ;;  %v3064_v52 = vadd.f32 %v404_v1, %v3014_v20 }
 0x143   :  { %3730 = vst [vmem:[#allocation61_spill] sm:$0xff] %v3061_v3  ;;  %3731 = vst [vmem:[#allocation62_spill] sm:$0xff] %v3064_v52 }
 0x144   :  { %v295_v62 = vpop.f32.mrf.mxu0  ;;  %v408_v4 = vpop.f32.mrf.mxu1 }
 0x145   :  { %v3066_v54 = vadd.f32 %v295_v62, %v176_v63  ;;  %v3069_v58 = vadd.f32 %v408_v4, %v3012_v61 }
 0x146   :  { %v297_v57 = vpop.f32.mrf.mxu0  ;;  %v410_v55 = vpop.f32.mrf.mxu1 }
 0x147   :  { %3732 = vst [vmem:[#allocation63_spill] sm:$0xff] %v3066_v54  ;;  %3733 = vst [vmem:[#allocation64_spill] sm:$0xff] %v3069_v58  ;;  %v3071_v56 = vadd.f32 %v297_v57, %v180_v60  ;;  %v3074_v53 = vadd.f32 %v410_v55, %v3014_v20  ;;  %v260_v57 = vadd.f32 %v3004_v11, %v176_v63 }
 0x148   :  { %v262_v55 = vadd.f32 %v3008_v0, %v180_v60 }
 0x149   :  { %3734 = vst [vmem:[#allocation65_spill] sm:$0xff] %v3071_v56  ;;  %3735 = vst [vmem:[#allocation66_spill] sm:$0xff] %v3074_v53 }
 0x14a   :  { %v301_v29 = vpop.f32.mrf.mxu0  ;;  %v414_v47 = vpop.f32.mrf.mxu1 }
 0x14b   :  { %v3076_v3 = vadd.f32 %v301_v29, %v176_v63  ;;  %v3079_v1 = vadd.f32 %v414_v47, %v3012_v61  ;;  %v373_v47 = vadd.f32 %v3006_v38, %v3012_v61 }
 0x14c   :  { %v303_v52 = vpop.f32.mrf.mxu0  ;;  %v416_v62 = vpop.f32.mrf.mxu1 }
 0x14d   :  { %3736 = vst [vmem:[#allocation67_spill] sm:$0xff] %v3076_v3  ;;  %3737 = vst [vmem:[#allocation68_spill] sm:$0xff] %v3079_v1  ;;  %v3081_v54 = vadd.f32 %v303_v52, %v180_v60  ;;  %v3084_v4 = vadd.f32 %v416_v62, %v3014_v20  ;;  %v375_v62 = vadd.f32 %v3010_v2, %v3014_v20 }
 0x14f   :  { %3738 = vst [vmem:[#allocation69_spill] sm:$0xff] %v3081_v54  ;;  %3739 = vst [vmem:[#allocation70_spill] sm:$0xff] %v3084_v4  ;;  %v3350_v4 = vld [vmem:[#allocation11 + $0x18] sm:$0xff] }
 0x150   :  { %v587_v58 = vpop.f32.mrf.mxu0  ;;  %v658_v3 = vpop.f32.mrf.mxu1 }
 0x151   :  { %v663_v53 = vadd.f32 %v587_v58, %v260_v57  ;;  %v665_v52 = vadd.f32 %v658_v3, %v373_v47 }
 0x152   :  { %v589_v56 = vpop.f32.mrf.mxu0  ;;  %v660_v54 = vpop.f32.mrf.mxu1 }
 0x153   :  { %v672_v59 = vmul.f32 0.5, %v663_v53  ;;  %v664_v29 = vadd.f32 %v589_v56, %v262_v55  ;;  %v666_v63 = vadd.f32 %v660_v54, %v375_v62 }
 0x155   :  { %2423 = vtanh.f32 %v672_v59  ;;  %v677_v1 = vmul.f32 0.5, %v664_v29  ;;  %v684_v11 = vmul.f32 0.5, %v666_v63  ;;  %v97_v59 = vld [vmem:[%s3616_s5] sm:$0xff]  ;;  %s2663_s5 = smov [#allocation16]  }
 0x156   :  { %s2396_s27 = sshll.u32 %s2663_s5, 4  ;;  %s2397_s27 = int_to_ptr.vmem [resolvable:$true] %s2396_s27 }
 0x157   :  { %2425 = vtanh.f32 %v677_v1  ;;  %s2603_s28 = scalar_lea.vmem %s2397_s27, 128  ;;  %p2608_p12 = scmp.lt.s32.totalorder %s2397_s27, %s2397_s27 }
 0x158   :  { %2427 = vtanh.f32 %v665_v52  ;;  %p2604_p11 = scmp.ne.s32.totalorder %s2397_s27, %s2603_s28  ;;  %p2609_p13 = scmp.lt.s32.totalorder %s2603_s28, %s2603_s28 }
 0x159   :  { %2429 = vtanh.f32 %v684_v11 }
 0x15a   :  { %p2610_p0 = por %p2609_p13, %p2608_p12 }
 0x15c   :  { %p2611_p1 = pnand %p2610_p0, %p2604_p11 }
 0x162   :  { %v2424_v0 = vpop.eup %2423 }
 0x163   :  { %v674_v60 = vmul.f32 0.5, %v2424_v0 }
 0x164   :  { %v2426_v58 = vpop.eup %2425 }
 0x165   :  { %v675_v53 = vadd.f32 0.5, %v674_v60  ;;  %v679_v56 = vmul.f32 0.5, %v2426_v58  ;;  %v2428_v38 = vpop.eup %2427 }
 0x166   :  { %v2430_v54 = vpop.eup %2429 }
 0x167   :  { %v680_v61 = vadd.f32 0.5, %v679_v56  ;;  %v689_v1 = vmul.f32 %v2428_v38, %v675_v53  ;;  %v686_v2 = vmul.f32 0.5, %v2430_v54  ;;  %v3172_v56 = vld [vmem:[#allocation11 + $0x1e8] sm:$0xff]  ;;  %v3180_v38 = vld [vmem:[#allocation11 + $0x1f0] sm:$0xff] }
 0x168   :  { %v3192_v54 = vld [vmem:[#allocation11 + $0x1d0] sm:$0xff] }
 0x169   :  { %v688_v3 = vmul.f32 %v680_v61, %v97_v59  ;;  %v687_v20 = vadd.f32 0.5, %v686_v2  ;;  %v3174_v59 = vld [vmem:[#allocation11 + $0x1f8] sm:$0xff]  ;;  %v3178_v61 = vld [vmem:[#allocation11 + $0x1e0] sm:$0xff]  ;;  %v3196_v2 = vld [vmem:[#allocation11 + $0x1a8] sm:$0xff] }
 0x16b   :  { %v3095_v57 = vadd.f32 %v689_v1, %v688_v3  ;;  %v3184_v3 = vld [vmem:[#allocation11 + $0x1c8] sm:$0xff]  ;;  %v3186_v1 = vld [vmem:[#allocation11 + $0x1d8] sm:$0xff] }
 0x16d   :  { %2431 = vtanh.f32 %v3095_v57 }
 0x17a   :  { %v2432_v55 = vpop.eup %2431 }
 0x17b   :  { %v692_v29 = vmul.f32 %v2432_v55, %v687_v20  ;;  %v3198_v20 = vld [vmem:[#allocation11 + $0x1b8] sm:$0xff]  ;;  %v3202_v55 = vld [vmem:[#allocation11 + $0x1a0] sm:$0xff] }
 0x17d   :  { %826 = vmatmul.mubr.f32.vlgmr.msra.gmra.mxu0 %v692_v29  ;;  %897 = vmatmul.mubr.f32.vlgmr.msra.gmra.mxu1 %v692_v29  ;;  %v3204_v29 = vld [vmem:[#allocation11 + $0x1b0] sm:$0xff] }
 0x17e   :  { %1002 = vmatpush1.msra.mxu0 %v2732_v5  ;;  %1073 = vmatpush1.msra.mxu1 %v2734_v6  ;;  %v3740_v5 = vld [vmem:[#allocation23_spill] sm:$0xff]  ;;  %v3741_v6 = vld [vmem:[#allocation24_spill] sm:$0xff] }
 0x17f   :  { %1003 = vmatprep.subr.mxu0 %v2736_v7  ;;  %1074 = vmatprep.subr.mxu1 %v2738_v8  ;;  %v3742_v7 = vld [vmem:[#allocation25_spill] sm:$0xff]  ;;  %v3743_v8 = vld [vmem:[#allocation26_spill] sm:$0xff]  ;;  %3765 = vst [vmem:[#allocation23_spill] sm:$0xff] %v3172_v56  ;;  %3766 = vst [vmem:[#allocation24_spill] sm:$0xff] %v3174_v59 }
 0x180   :  { %1004 = vmatpush1.msra.mxu0 %v2744_v9  ;;  %1075 = vmatpush1.msra.mxu1 %v2746_v10  ;;  %v3744_v9 = vld [vmem:[#allocation27_spill] sm:$0xff]  ;;  %v3745_v10 = vld [vmem:[#allocation28_spill] sm:$0xff] }
 0x181   :  { %1005 = vmatprep.subr.mxu0 %v2752_v12  ;;  %1076 = vmatprep.subr.mxu1 %v2754_v13  ;;  %v3746_v12 = vld [vmem:[#allocation29_spill] sm:$0xff]  ;;  %v3747_v13 = vld [vmem:[#allocation30_spill] sm:$0xff] }
 0x182   :  { %1006 = vmatpush1.msra.mxu0 %v2758_v14  ;;  %1077 = vmatpush1.msra.mxu1 %v2760_v15  ;;  %v3748_v14 = vld [vmem:[#allocation31_spill] sm:$0xff]  ;;  %v3749_v15 = vld [vmem:[#allocation32_spill] sm:$0xff] }
 0x183   :  { %1007 = vmatprep.subr.mxu0 %v2762_v16  ;;  %1078 = vmatprep.subr.mxu1 %v2764_v17  ;;  %v3750_v16 = vld [vmem:[#allocation33_spill] sm:$0xff]  ;;  %v3751_v17 = vld [vmem:[#allocation34_spill] sm:$0xff] }
 0x184   :  { %1008 = vmatpush1.msra.mxu0 %v2770_v18  ;;  %1079 = vmatpush1.msra.mxu1 %v2772_v19  ;;  %v3752_v18 = vld [vmem:[#allocation35_spill] sm:$0xff]  ;;  %v3753_v19 = vld [vmem:[#allocation36_spill] sm:$0xff] }
 0x185   :  { %1009 = vmatprep.subr.mxu0 %v2778_v21  ;;  %1080 = vmatprep.subr.mxu1 %v2780_v22  ;;  %v3754_v21 = vld [vmem:[#allocation37_spill] sm:$0xff]  ;;  %v3755_v22 = vld [vmem:[#allocation38_spill] sm:$0xff] }
 0x186   :  { %1010 = vmatpush1.msra.mxu0 %v2784_v23  ;;  %1081 = vmatpush1.msra.mxu1 %v2786_v24  ;;  %v3756_v23 = vld [vmem:[#allocation39_spill] sm:$0xff]  ;;  %v3757_v24 = vld [vmem:[#allocation40_spill] sm:$0xff] }
 0x187   :  { %1011 = vmatprep.subr.mxu0 %v2788_v25  ;;  %1082 = vmatprep.subr.mxu1 %v2790_v26  ;;  %v3758_v25 = vld [vmem:[#allocation41_spill] sm:$0xff]  ;;  %v3759_v26 = vmov 0.0  }
 0x188   :  { %1012 = vmatpush1.msra.mxu0 %v2796_v27  ;;  %1083 = vmatpush1.msra.mxu1 %v2798_v28  ;;  %v3760_v27 = vld [vmem:[#allocation42_spill] sm:$0xff]  ;;  %3783 = vst [vmem:[#allocation41_spill] sm:$0xff] %v3350_v4 }
 0x189   :  { %1013 = vmatprep.subr.mxu0 %v2804_v30  ;;  %1084 = vmatprep.subr.mxu1 %v2806_v31  ;;  %v3761_v30 = vld [vmem:[#allocation43_spill] sm:$0xff] }
 0x18a   :  { %1014 = vmatpush1.msra.mxu0 %v2810_v32  ;;  %1085 = vmatpush1.msra.mxu1 %v2812_v33 }
 0x18b   :  { %1015 = vmatprep.subr.mxu0 %v2814_v34  ;;  %1086 = vmatprep.subr.mxu1 %v2816_v35  ;;  %v3762_v35 = vld [vmem:[#allocation45_spill] sm:$0xff] }
 0x18c   :  { %1016 = vmatpush1.msra.mxu0 %v2822_v36  ;;  %1087 = vmatpush1.msra.mxu1 %v2824_v37  ;;  %v3763_v37 = vld [vmem:[#allocation44_spill] sm:$0xff] }
 0x18d   :  { %1017 = vmatprep.subr.mxu0 %v2830_v39  ;;  %1088 = vmatprep.subr.mxu1 %v2832_v40 }
 0x18e   :  { %1018 = vmatpush1.msra.mxu0 %v2836_v41  ;;  %1089 = vmatpush1.msra.mxu1 %v2838_v42  ;;  %v3764_v42 = vld [vmem:[#allocation46_spill] sm:$0xff] }
 0x18f   :  { %1019 = vmatprep.subr.mxu0 %v2840_v43  ;;  %1090 = vmatprep.subr.mxu1 %v2842_v44 }
 0x190   :  { %1020 = vmatpush1.msra.mxu0 %v2848_v45  ;;  %1091 = vmatpush1.msra.mxu1 %v2850_v46 }
 0x191   :  { %1021 = vmatprep.subr.mxu0 %v2856_v48  ;;  %1092 = vmatprep.subr.mxu1 %v2858_v49 }
 0x192   :  { %1022 = vmatpush1.msra.mxu0 %v2862_v50  ;;  %1093 = vmatpush1.msra.mxu1 %v2864_v51 }
 0x193   :  { %1023 = vmatprep.subr.mxu0 %v3740_v5  ;;  %1094 = vmatprep.subr.mxu1 %v3741_v6  ;;  %v3208_v5 = vld [vmem:[#allocation11 + $0x188] sm:$0xff]  ;;  %v3210_v6 = vld [vmem:[#allocation11 + $0x198] sm:$0xff] }
 0x194   :  { %1024 = vmatpush1.msra.mxu0 %v3742_v7  ;;  %1095 = vmatpush1.msra.mxu1 %v3743_v8  ;;  %v3214_v7 = vld [vmem:[#allocation11 + $0x180] sm:$0xff]  ;;  %v3216_v8 = vld [vmem:[#allocation11 + $0x190] sm:$0xff] }
 0x195   :  { %1025 = vmatprep.subr.mxu0 %v3744_v9  ;;  %1096 = vmatprep.subr.mxu1 %v3745_v10  ;;  %v3220_v9 = vld [vmem:[#allocation11 + $0x168] sm:$0xff]  ;;  %v3222_v10 = vld [vmem:[#allocation11 + $0x178] sm:$0xff] }
 0x196   :  { %1026 = vmatpush1.msra.mxu0 %v3746_v12  ;;  %1097 = vmatpush1.msra.mxu1 %v3747_v13  ;;  %v3226_v12 = vld [vmem:[#allocation11 + $0x160] sm:$0xff]  ;;  %v3228_v13 = vld [vmem:[#allocation11 + $0x170] sm:$0xff] }
 0x197   :  { %1027 = vmatprep.subr.mxu0 %v3748_v14  ;;  %1098 = vmatprep.subr.mxu1 %v3749_v15  ;;  %v3232_v14 = vld [vmem:[#allocation11 + $0x148] sm:$0xff]  ;;  %v3234_v15 = vld [vmem:[#allocation11 + $0x158] sm:$0xff] }
 0x198   :  { %1028 = vmatpush1.msra.mxu0 %v3750_v16  ;;  %1099 = vmatpush1.msra.mxu1 %v3751_v17  ;;  %v3238_v16 = vld [vmem:[#allocation11 + $0x140] sm:$0xff]  ;;  %v3240_v17 = vld [vmem:[#allocation11 + $0x150] sm:$0xff] }
 0x199   :  { %1029 = vmatprep.subr.mxu0 %v3752_v18  ;;  %1100 = vmatprep.subr.mxu1 %v3753_v19  ;;  %v3244_v18 = vld [vmem:[#allocation11 + $0x128] sm:$0xff]  ;;  %v3246_v19 = vld [vmem:[#allocation11 + $0x138] sm:$0xff] }
 0x19a   :  { %1030 = vmatpush1.msra.mxu0 %v3754_v21  ;;  %1101 = vmatpush1.msra.mxu1 %v3755_v22  ;;  %v3250_v21 = vld [vmem:[#allocation11 + $0x120] sm:$0xff]  ;;  %v3252_v22 = vld [vmem:[#allocation11 + $0x130] sm:$0xff] }
 0x19b   :  { %1031 = vmatprep.subr.mxu0 %v3756_v23  ;;  %1102 = vmatprep.subr.mxu1 %v3757_v24  ;;  %v3256_v23 = vld [vmem:[#allocation11 + $0x108] sm:$0xff]  ;;  %v3258_v24 = vld [vmem:[#allocation11 + $0x118] sm:$0xff] }
 0x19c   :  { %1032 = vmatpush1.msra.mxu0 %v3758_v25  ;;  %1065 = vmatprep.mubr.f32.mxu0 %v3759_v26  ;;  %v3262_v25 = vld [vmem:[#allocation11 + $0x100] sm:$0xff] }
 0x19d   :  { %1103 = vmatpush1.msra.mxu1 %v3760_v27  ;;  %1136 = vmatprep.mubr.f32.mxu1 %v3759_v26  ;;  %v3264_v27 = vld [vmem:[#allocation11 + $0x110] sm:$0xff] }
 0x19e   :  { %1241 = vmatprep.subr.mxu0 %v3172_v56  ;;  %1312 = vmatprep.subr.mxu1 %v3174_v59 }
 0x23d   :  { %v827_v28 = vpop.f32.mrf.mxu0  ;;  %v898_v32 = vpop.f32.mrf.mxu1 }
 0x23e   :  { %v903_v31 = vadd.f32 %v827_v28, %v3761_v30  ;;  %v905_v39 = vadd.f32 %v898_v32, %v3763_v37  ;;  %v3268_v28 = vld [vmem:[#allocation11 + $0xe8] sm:$0xff]  ;;  %v3270_v30 = vld [vmem:[#allocation11 + $0xf8] sm:$0xff]  ;;  %v3276_v32 = vld [vmem:[#allocation11 + $0xf0] sm:$0xff] }
 0x23f   :  { %v829_v33 = vpop.f32.mrf.mxu0  ;;  %v900_v41 = vpop.f32.mrf.mxu1  ;;  %v3288_v37 = vld [vmem:[#allocation11 + $0xa8] sm:$0xff] }
 0x240   :  { %v912_v34 = vmul.f32 0.5, %v903_v31  ;;  %v904_v36 = vadd.f32 %v829_v33, %v3762_v35  ;;  %v906_v43 = vadd.f32 %v900_v41, %v3764_v42  ;;  %v3272_v31 = vld [vmem:[#allocation11 + $0xe0] sm:$0xff]  ;;  %v3278_v33 = vld [vmem:[#allocation11 + $0xc8] sm:$0xff]  ;;  %v3296_v41 = vld [vmem:[#allocation11 + $0xb0] sm:$0xff] }
 0x241   :  { %v3284_v35 = vld [vmem:[#allocation11 + $0xc0] sm:$0xff]  ;;  %v3300_v42 = vld [vmem:[#allocation11 + $0x88] sm:$0xff] }
 0x242   :  { %2433 = vtanh.f32 %v912_v34  ;;  %v917_v40 = vmul.f32 0.5, %v904_v36  ;;  %v924_v44 = vmul.f32 0.5, %v906_v43  ;;  %v3280_v34 = vld [vmem:[#allocation11 + $0xd8] sm:$0xff]  ;;  %v3286_v36 = vld [vmem:[#allocation11 + $0xd0] sm:$0xff] }
 0x243   :  { %v3302_v43 = vld [vmem:[#allocation11 + $0x98] sm:$0xff] }
 0x244   :  { %2435 = vtanh.f32 %v917_v40  ;;  %v3294_v40 = vld [vmem:[#allocation11 + $0xa0] sm:$0xff]  ;;  %3767 = vst [vmem:[#allocation25_spill] sm:$0xff] %v3302_v43 }
 0x245   :  { %2437 = vtanh.f32 %v905_v39  ;;  %v3292_v39 = vld [vmem:[#allocation11 + $0xb8] sm:$0xff] }
 0x246   :  { %2439 = vtanh.f32 %v924_v44  ;;  %v3306_v44 = vld [vmem:[#allocation11 + $0x80] sm:$0xff] }
 0x247   :  { %3768 = vst [vmem:[#allocation26_spill] sm:$0xff] %v3306_v44 }
 0x24f   :  { %v2434_v45 = vpop.eup %2433 }
 0x250   :  { %v914_v46 = vmul.f32 0.5, %v2434_v45  ;;  %v3308_v45 = vld [vmem:[#allocation11 + $0x90] sm:$0xff] }
 0x251   :  { %v2436_v48 = vpop.eup %2435  ;;  %3769 = vst [vmem:[#allocation27_spill] sm:$0xff] %v3308_v45 }
 0x252   :  { %v915_v49 = vadd.f32 0.5, %v914_v46  ;;  %v919_v50 = vmul.f32 0.5, %v2436_v48  ;;  %v2438_v51 = vpop.eup %2437  ;;  %v3312_v46 = vld [vmem:[#allocation11 + $0x68] sm:$0xff]  ;;  %v3314_v48 = vld [vmem:[#allocation11 + $0x78] sm:$0xff] }
 0x253   :  { %v2440_v11 = vpop.eup %2439  ;;  %3770 = vst [vmem:[#allocation28_spill] sm:$0xff] %v3312_v46  ;;  %3771 = vst [vmem:[#allocation29_spill] sm:$0xff] %v3314_v48 }
 0x254   :  { %v920_v47 = vadd.f32 0.5, %v919_v50  ;;  %v929_v52 = vmul.f32 %v2438_v51, %v915_v49  ;;  %v926_v0 = vmul.f32 0.5, %v2440_v11  ;;  %v3318_v49 = vld [vmem:[#allocation11 + $0x60] sm:$0xff]  ;;  %v3320_v50 = vld [vmem:[#allocation11 + $0x70] sm:$0xff]  ;;  %v3324_v51 = vld [vmem:[#allocation11 + $0x48] sm:$0xff] }
 0x255   :  { %3772 = vst [vmem:[#allocation30_spill] sm:$0xff] %v3318_v49  ;;  %3773 = vst [vmem:[#allocation31_spill] sm:$0xff] %v3320_v50  ;;  %v3336_v11 = vld [vmem:[#allocation11 + $0x28] sm:$0xff] }
 0x256   :  { %v928_v62 = vmul.f32 %v920_v47, %v3095_v57  ;;  %v927_v60 = vadd.f32 0.5, %v926_v0  ;;  %v3190_v57 = vld [vmem:[#allocation11 + $0x1c0] sm:$0xff]  ;;  %3774 = vst [vmem:[#allocation32_spill] sm:$0xff] %v3324_v51  ;;  %v3326_v47 = vld [vmem:[#allocation11 + $0x58] sm:$0xff]  ;;  %3778 = vst [vmem:[#allocation36_spill] sm:$0xff] %v3336_v11 }
 0x257   :  { %3775 = vst [vmem:[#allocation33_spill] sm:$0xff] %v3326_v47  ;;  %v3338_v0 = vld [vmem:[#allocation11 + $0x38] sm:$0xff] }
 0x258   :  { %v3167_v63 = vadd.f32 %v929_v52, %v928_v62  ;;  %v3330_v52 = vld [vmem:[#allocation11 + $0x40] sm:$0xff]  ;;  %v3332_v62 = vld [vmem:[#allocation11 + $0x50] sm:$0xff]  ;;  %3779 = vst [vmem:[#allocation37_spill] sm:$0xff] %v3338_v0 }
 0x259   :  { %3776 = vst [vmem:[#allocation34_spill] sm:$0xff] %v3330_v52  ;;  %3777 = vst [vmem:[#allocation35_spill] sm:$0xff] %v3332_v62 }
 0x25a   :  { %2441 = vtanh.f32 %v3167_v63 }
 0x267   :  { %v2442_v58 = vpop.eup %2441 }
 0x268   :  { %v932_v53 = vmul.f32 %v2442_v58, %v927_v60  ;;  %v3342_v60 = vld [vmem:[#allocation11 + $0x20] sm:$0xff]  ;;  %v3344_v58 = vld [vmem:[#allocation11 + $0x30] sm:$0xff] }
 0x269   :  { %3780 = vst [vmem:[#allocation38_spill] sm:$0xff] %v3342_v60  ;;  %3781 = vst [vmem:[#allocation39_spill] sm:$0xff] %v3344_v58 }
 0x26a   :  { %1066 = vmatmul.mubr.f32.vlgmr.msra.gmra.mxu0 %v932_v53  ;;  %1137 = vmatmul.mubr.f32.vlgmr.msra.gmra.mxu1 %v932_v53  ;;  %v3348_v53 = vld [vmem:[#allocation11 + $0x8] sm:$0xff] }
 0x26b   :  { %1305 = vmatprep.mubr.f32.mxu0 %v3759_v26  ;;  %1376 = vmatprep.mubr.f32.mxu1 %v3759_v26  ;;  %3782 = vst [vmem:[#allocation40_spill] sm:$0xff] %v3348_v53  ;;  %v3354_v26 = vld [vmem:[#allocation11] sm:$0xff] }
 0x26c   :  { %1242 = vmatpush1.msra.mxu0 %v3178_v61  ;;  %1313 = vmatpush1.msra.mxu1 %v3180_v38  ;;  %3784 = vst [vmem:[#allocation42_spill] sm:$0xff] %v3354_v26 }
 0x26d   :  { %1243 = vmatprep.subr.mxu0 %v3184_v3  ;;  %1314 = vmatprep.subr.mxu1 %v3186_v1 }
 0x26e   :  { %1244 = vmatpush1.msra.mxu0 %v3190_v57  ;;  %1315 = vmatpush1.msra.mxu1 %v3192_v54 }
 0x26f   :  { %1245 = vmatprep.subr.mxu0 %v3196_v2  ;;  %1316 = vmatprep.subr.mxu1 %v3198_v20 }
 0x270   :  { %1246 = vmatpush1.msra.mxu0 %v3202_v55  ;;  %1317 = vmatpush1.msra.mxu1 %v3204_v29 }
 0x271   :  { %1247 = vmatprep.subr.mxu0 %v3208_v5  ;;  %1318 = vmatprep.subr.mxu1 %v3210_v6 }
 0x272   :  { %1248 = vmatpush1.msra.mxu0 %v3214_v7  ;;  %1319 = vmatpush1.msra.mxu1 %v3216_v8 }
 0x273   :  { %1249 = vmatprep.subr.mxu0 %v3220_v9  ;;  %1320 = vmatprep.subr.mxu1 %v3222_v10 }
 0x274   :  { %1250 = vmatpush1.msra.mxu0 %v3226_v12  ;;  %1321 = vmatpush1.msra.mxu1 %v3228_v13 }
 0x275   :  { %1251 = vmatprep.subr.mxu0 %v3232_v14  ;;  %1322 = vmatprep.subr.mxu1 %v3234_v15 }
 0x276   :  { %1252 = vmatpush1.msra.mxu0 %v3238_v16  ;;  %1323 = vmatpush1.msra.mxu1 %v3240_v17 }
 0x277   :  { %1253 = vmatprep.subr.mxu0 %v3244_v18  ;;  %1324 = vmatprep.subr.mxu1 %v3246_v19 }
 0x278   :  { %1254 = vmatpush1.msra.mxu0 %v3250_v21  ;;  %1325 = vmatpush1.msra.mxu1 %v3252_v22 }
 0x279   :  { %1255 = vmatprep.subr.mxu0 %v3256_v23  ;;  %1326 = vmatprep.subr.mxu1 %v3258_v24 }
 0x27a   :  { %1256 = vmatpush1.msra.mxu0 %v3262_v25  ;;  %1327 = vmatpush1.msra.mxu1 %v3264_v27 }
 0x27b   :  { %1257 = vmatprep.subr.mxu0 %v3268_v28  ;;  %1328 = vmatprep.subr.mxu1 %v3270_v30 }
 0x27c   :  { %1258 = vmatpush1.msra.mxu0 %v3272_v31  ;;  %1329 = vmatpush1.msra.mxu1 %v3276_v32 }
 0x27d   :  { %1259 = vmatprep.subr.mxu0 %v3278_v33  ;;  %1330 = vmatprep.subr.mxu1 %v3280_v34 }
 0x27e   :  { %1260 = vmatpush1.msra.mxu0 %v3284_v35  ;;  %1331 = vmatpush1.msra.mxu1 %v3286_v36 }
 0x27f   :  { %1261 = vmatprep.subr.mxu0 %v3288_v37  ;;  %1332 = vmatprep.subr.mxu1 %v3292_v39 }
 0x280   :  { %1262 = vmatpush1.msra.mxu0 %v3294_v40  ;;  %1333 = vmatpush1.msra.mxu1 %v3296_v41 }
 0x281   :  { %1263 = vmatprep.subr.mxu0 %v3300_v42  ;;  %1334 = vmatprep.subr.mxu1 %v3302_v43 }
 0x282   :  { %1264 = vmatpush1.msra.mxu0 %v3306_v44  ;;  %1335 = vmatpush1.msra.mxu1 %v3308_v45 }
 0x283   :  { %1265 = vmatprep.subr.mxu0 %v3312_v46  ;;  %1336 = vmatprep.subr.mxu1 %v3314_v48 }
 0x284   :  { %1266 = vmatpush1.msra.mxu0 %v3318_v49  ;;  %1337 = vmatpush1.msra.mxu1 %v3320_v50  ;;  %v3787_v50 = vld [vmem:[#allocation49_spill] sm:$0xff] }
 0x285   :  { %1267 = vmatprep.subr.mxu0 %v3324_v51  ;;  %1338 = vmatprep.subr.mxu1 %v3326_v47  ;;  %v3356_v51 = vld [vmem:[#allocation11 + $0x10] sm:$0xff] }
 0x286   :  { %1268 = vmatpush1.msra.mxu0 %v3330_v52  ;;  %1339 = vmatpush1.msra.mxu1 %v3332_v62  ;;  %3785 = vst [vmem:[#allocation43_spill] sm:$0xff] %v3356_v51 }
 0x287   :  { %1269 = vmatprep.subr.mxu0 %v3336_v11  ;;  %1340 = vmatprep.subr.mxu1 %v3338_v0  ;;  %v3786_v11 = vld [vmem:[#allocation47_spill] sm:$0xff] }
 0x288   :  { %1270 = vmatpush1.msra.mxu0 %v3342_v60  ;;  %1341 = vmatpush1.msra.mxu1 %v3344_v58 }
 0x289   :  { %1271 = vmatprep.subr.mxu0 %v3348_v53  ;;  %1342 = vmatprep.subr.mxu1 %v3350_v4  ;;  %v3788_v53 = vld [vmem:[#allocation48_spill] sm:$0xff] }
 0x28a   :  { %1272 = vmatpush1.msra.mxu0 %v3354_v26  ;;  %1343 = vmatpush1.msra.mxu1 %v3356_v51  ;;  %v3789_v51 = vld [vmem:[#allocation50_spill] sm:$0xff] }
 0x28b   :  { %1481 = vmatprep.subr.mxu0 %v3172_v56  ;;  %1552 = vmatprep.subr.mxu1 %v3174_v59 }
 0x32a   :  { %v1067_v0 = vpop.f32.mrf.mxu0  ;;  %v1138_v52 = vpop.f32.mrf.mxu1 }
 0x32b   :  { %v1143_v62 = vadd.f32 %v1067_v0, %v3786_v11  ;;  %v1145_v49 = vadd.f32 %v1138_v52, %v3788_v53  ;;  %v3800_v53 = vld [vmem:[#allocation35_spill] sm:$0xff] }
 0x32c   :  { %v1069_v47 = vpop.f32.mrf.mxu0  ;;  %v1140_v26 = vpop.f32.mrf.mxu1 }
 0x32d   :  { %v1152_v60 = vmul.f32 0.5, %v1143_v62  ;;  %v1144_v58 = vadd.f32 %v1069_v47, %v3787_v50  ;;  %v1146_v48 = vadd.f32 %v1140_v26, %v3789_v51  ;;  %v3797_v51 = vld [vmem:[#allocation32_spill] sm:$0xff] }
 0x32f   :  { %2443 = vtanh.f32 %v1152_v60  ;;  %v1157_v4 = vmul.f32 0.5, %v1144_v58  ;;  %v1164_v56 = vmul.f32 0.5, %v1146_v48  ;;  %v3798_v60 = vld [vmem:[#allocation33_spill] sm:$0xff]  ;;  %v3799_v58 = vld [vmem:[#allocation34_spill] sm:$0xff] }
 0x331   :  { %2445 = vtanh.f32 %v1157_v4 }
 0x332   :  { %2447 = vtanh.f32 %v1145_v49 }
 0x333   :  { %2449 = vtanh.f32 %v1164_v56  ;;  %v3791_v56 = vld [vmem:[#allocation26_spill] sm:$0xff] }
 0x33c   :  { %v2444_v46 = vpop.eup %2443 }
 0x33d   :  { %v1154_v59 = vmul.f32 0.5, %v2444_v46  ;;  %v3796_v46 = vld [vmem:[#allocation31_spill] sm:$0xff] }
 0x33e   :  { %v2446_v45 = vpop.eup %2445 }
 0x33f   :  { %v1155_v44 = vadd.f32 0.5, %v1154_v59  ;;  %v1159_v11 = vmul.f32 0.5, %v2446_v45  ;;  %v2448_v0 = vpop.eup %2447  ;;  %v3792_v59 = vld [vmem:[#allocation27_spill] sm:$0xff]  ;;  %v3795_v45 = vld [vmem:[#allocation30_spill] sm:$0xff] }
 0x340   :  { %v2450_v4 = vpop.eup %2449 }
 0x341   :  { %v1160_v62 = vadd.f32 0.5, %v1159_v11  ;;  %v1169_v43 = vmul.f32 %v2448_v0, %v1155_v44  ;;  %v1166_v49 = vmul.f32 0.5, %v2450_v4  ;;  %v3794_v44 = vld [vmem:[#allocation29_spill] sm:$0xff]  ;;  %v3801_v11 = vld [vmem:[#allocation36_spill] sm:$0xff] }
 0x342   :  { %v3802_v0 = vld [vmem:[#allocation37_spill] sm:$0xff]  ;;  %v3805_v4 = vld [vmem:[#allocation40_spill] sm:$0xff] }
 0x343   :  { %v1168_v50 = vmul.f32 %v1160_v62, %v3167_v63  ;;  %v1167_v52 = vadd.f32 0.5, %v1166_v49  ;;  %v3790_v63 = vld [vmem:[#allocation25_spill] sm:$0xff]  ;;  %v3803_v62 = vld [vmem:[#allocation38_spill] sm:$0xff] }
 0x344   :  { %v3806_v49 = vld [vmem:[#allocation41_spill] sm:$0xff] }
 0x345   :  { %v3371_v47 = vadd.f32 %v1169_v43, %v1168_v50  ;;  %v3793_v43 = vld [vmem:[#allocation28_spill] sm:$0xff]  ;;  %v3804_v50 = vld [vmem:[#allocation39_spill] sm:$0xff] }
 0x347   :  { %2451 = vtanh.f32 %v3371_v47 }
 0x354   :  { %v2452_v26 = vpop.eup %2451 }
 0x355   :  { %v1172_v48 = vmul.f32 %v2452_v26, %v1167_v52  ;;  %v3807_v52 = vld [vmem:[#allocation42_spill] sm:$0xff]  ;;  %v3808_v26 = vmov 0.0  }
 0x357   :  { %1306 = vmatmul.mubr.f32.vlgmr.msra.gmra.mxu0 %v1172_v48  ;;  %1377 = vmatmul.mubr.f32.vlgmr.msra.gmra.mxu1 %v1172_v48  ;;  %v3809_v48 = vld [vmem:[#allocation43_spill] sm:$0xff] }
 0x358   :  { %1482 = vmatpush1.msra.mxu0 %v3178_v61  ;;  %1553 = vmatpush1.msra.mxu1 %v3180_v38 }
 0x359   :  { %1483 = vmatprep.subr.mxu0 %v3184_v3  ;;  %1554 = vmatprep.subr.mxu1 %v3186_v1 }
 0x35a   :  { %1484 = vmatpush1.msra.mxu0 %v3190_v57  ;;  %1555 = vmatpush1.msra.mxu1 %v3192_v54 }
 0x35b   :  { %1485 = vmatprep.subr.mxu0 %v3196_v2  ;;  %1556 = vmatprep.subr.mxu1 %v3198_v20 }
 0x35c   :  { %1486 = vmatpush1.msra.mxu0 %v3202_v55  ;;  %1557 = vmatpush1.msra.mxu1 %v3204_v29 }
 0x35d   :  { %1487 = vmatprep.subr.mxu0 %v3208_v5  ;;  %1558 = vmatprep.subr.mxu1 %v3210_v6 }
 0x35e   :  { %1488 = vmatpush1.msra.mxu0 %v3214_v7  ;;  %1559 = vmatpush1.msra.mxu1 %v3216_v8 }
 0x35f   :  { %1489 = vmatprep.subr.mxu0 %v3220_v9  ;;  %1560 = vmatprep.subr.mxu1 %v3222_v10 }
 0x360   :  { %1490 = vmatpush1.msra.mxu0 %v3226_v12  ;;  %1561 = vmatpush1.msra.mxu1 %v3228_v13 }
 0x361   :  { %1491 = vmatprep.subr.mxu0 %v3232_v14  ;;  %1562 = vmatprep.subr.mxu1 %v3234_v15 }
 0x362   :  { %1492 = vmatpush1.msra.mxu0 %v3238_v16  ;;  %1563 = vmatpush1.msra.mxu1 %v3240_v17 }
 0x363   :  { %1493 = vmatprep.subr.mxu0 %v3244_v18  ;;  %1564 = vmatprep.subr.mxu1 %v3246_v19 }
 0x364   :  { %1494 = vmatpush1.msra.mxu0 %v3250_v21  ;;  %1565 = vmatpush1.msra.mxu1 %v3252_v22 }
 0x365   :  { %1495 = vmatprep.subr.mxu0 %v3256_v23  ;;  %1566 = vmatprep.subr.mxu1 %v3258_v24 }
 0x366   :  { %1496 = vmatpush1.msra.mxu0 %v3262_v25  ;;  %1567 = vmatpush1.msra.mxu1 %v3264_v27 }
 0x367   :  { %1497 = vmatprep.subr.mxu0 %v3268_v28  ;;  %1568 = vmatprep.subr.mxu1 %v3270_v30 }
 0x368   :  { %1498 = vmatpush1.msra.mxu0 %v3272_v31  ;;  %1569 = vmatpush1.msra.mxu1 %v3276_v32 }
 0x369   :  { %1499 = vmatprep.subr.mxu0 %v3278_v33  ;;  %1570 = vmatprep.subr.mxu1 %v3280_v34 }
 0x36a   :  { %1500 = vmatpush1.msra.mxu0 %v3284_v35  ;;  %1571 = vmatpush1.msra.mxu1 %v3286_v36 }
 0x36b   :  { %1501 = vmatprep.subr.mxu0 %v3288_v37  ;;  %1572 = vmatprep.subr.mxu1 %v3292_v39 }
 0x36c   :  { %1502 = vmatpush1.msra.mxu0 %v3294_v40  ;;  %1573 = vmatpush1.msra.mxu1 %v3296_v41 }
 0x36d   :  { %1503 = vmatprep.subr.mxu0 %v3300_v42  ;;  %1574 = vmatprep.subr.mxu1 %v3790_v63 }
 0x36e   :  { %1504 = vmatpush1.msra.mxu0 %v3791_v56  ;;  %1575 = vmatpush1.msra.mxu1 %v3792_v59 }
 0x36f   :  { %1505 = vmatprep.subr.mxu0 %v3793_v43  ;;  %1576 = vmatprep.subr.mxu1 %v3794_v44 }
 0x370   :  { %1506 = vmatpush1.msra.mxu0 %v3795_v45  ;;  %1577 = vmatpush1.msra.mxu1 %v3796_v46 }
 0x371   :  { %1507 = vmatprep.subr.mxu0 %v3797_v51  ;;  %1578 = vmatprep.subr.mxu1 %v3798_v60  ;;  %v3813_v51 = vld [vmem:[#allocation53_spill] sm:$0xff] }
 0x372   :  { %1508 = vmatpush1.msra.mxu0 %v3799_v58  ;;  %1579 = vmatpush1.msra.mxu1 %v3800_v53  ;;  %v3810_v53 = vld [vmem:[#allocation23_spill] sm:$0xff] }
 0x373   :  { %1509 = vmatprep.subr.mxu0 %v3801_v11  ;;  %1580 = vmatprep.subr.mxu1 %v3802_v0  ;;  %v3811_v11 = vld [vmem:[#allocation24_spill] sm:$0xff] }
 0x374   :  { %1510 = vmatpush1.msra.mxu0 %v3803_v62  ;;  %1581 = vmatpush1.msra.mxu1 %v3804_v50  ;;  %v3812_v62 = vld [vmem:[#allocation51_spill] sm:$0xff] }
 0x375   :  { %1511 = vmatprep.subr.mxu0 %v3805_v4  ;;  %1582 = vmatprep.subr.mxu1 %v3806_v49 }
 0x376   :  { %1512 = vmatpush1.msra.mxu0 %v3807_v52  ;;  %1545 = vmatprep.mubr.f32.mxu0 %v3808_v26  ;;  %v3814_v52 = vld [vmem:[#allocation52_spill] sm:$0xff] }
 0x377   :  { %1583 = vmatpush1.msra.mxu1 %v3809_v48  ;;  %1616 = vmatprep.mubr.f32.mxu1 %v3808_v26  ;;  %v3815_v26 = vld [vmem:[#allocation54_spill] sm:$0xff] }
 0x378   :  { %1721 = vmatprep.subr.mxu0 %v3810_v53  ;;  %1792 = vmatprep.subr.mxu1 %v3811_v11 }
 0x417   :  { %v1307_v0 = vpop.f32.mrf.mxu0  ;;  %v1378_v50 = vpop.f32.mrf.mxu1 }
 0x418   :  { %v1383_v58 = vadd.f32 %v1307_v0, %v3812_v62  ;;  %v1385_v46 = vadd.f32 %v1378_v50, %v3814_v52  ;;  %v3824_v52 = vld [vmem:[#allocation33_spill] sm:$0xff] }
 0x419   :  { %v1309_v60 = vpop.f32.mrf.mxu0  ;;  %v1380_v48 = vpop.f32.mrf.mxu1 }
 0x41a   :  { %v1392_v4 = vmul.f32 0.5, %v1383_v58  ;;  %v1384_v49 = vadd.f32 %v1309_v60, %v3813_v51  ;;  %v1386_v44 = vadd.f32 %v1380_v48, %v3815_v26  ;;  %v3825_v26 = vld [vmem:[#allocation34_spill] sm:$0xff]  ;;  %v3826_v48 = vld [vmem:[#allocation35_spill] sm:$0xff] }
 0x41c   :  { %2453 = vtanh.f32 %v1392_v4  ;;  %v1397_v45 = vmul.f32 0.5, %v1384_v49  ;;  %v1404_v53 = vmul.f32 0.5, %v1386_v44  ;;  %v3823_v49 = vld [vmem:[#allocation32_spill] sm:$0xff] }
 0x41e   :  { %2455 = vtanh.f32 %v1397_v45 }
 0x41f   :  { %2457 = vtanh.f32 %v1385_v46 }
 0x420   :  { %2459 = vtanh.f32 %v1404_v53  ;;  %v3821_v53 = vld [vmem:[#allocation30_spill] sm:$0xff] }
 0x429   :  { %v2454_v43 = vpop.eup %2453 }
 0x42a   :  { %v1394_v11 = vmul.f32 0.5, %v2454_v43  ;;  %v3820_v43 = vld [vmem:[#allocation29_spill] sm:$0xff] }
 0x42b   :  { %v2456_v59 = vpop.eup %2455 }
 0x42c   :  { %v1395_v56 = vadd.f32 0.5, %v1394_v11  ;;  %v1399_v0 = vmul.f32 0.5, %v2456_v59  ;;  %v2458_v62 = vpop.eup %2457  ;;  %v3819_v59 = vld [vmem:[#allocation28_spill] sm:$0xff]  ;;  %v3822_v11 = vld [vmem:[#allocation31_spill] sm:$0xff] }
 0x42d   :  { %v2460_v45 = vpop.eup %2459 }
 0x42e   :  { %v1400_v58 = vadd.f32 0.5, %v1399_v0  ;;  %v1409_v63 = vmul.f32 %v2458_v62, %v1395_v56  ;;  %v1406_v46 = vmul.f32 0.5, %v2460_v45  ;;  %v3818_v56 = vld [vmem:[#allocation27_spill] sm:$0xff]  ;;  %v3827_v0 = vld [vmem:[#allocation36_spill] sm:$0xff]  ;;  %v3828_v62 = vld [vmem:[#allocation37_spill] sm:$0xff] }
 0x42f   :  { %v3831_v45 = vld [vmem:[#allocation40_spill] sm:$0xff] }
 0x430   :  { %v1408_v51 = vmul.f32 %v1400_v58, %v3371_v47  ;;  %v1407_v50 = vadd.f32 0.5, %v1406_v46  ;;  %v3816_v47 = vld [vmem:[#allocation25_spill] sm:$0xff]  ;;  %v3829_v58 = vld [vmem:[#allocation38_spill] sm:$0xff] }
 0x431   :  { %v3832_v46 = vld [vmem:[#allocation41_spill] sm:$0xff] }
 0x432   :  { %v3445_v60 = vadd.f32 %v1409_v63, %v1408_v51  ;;  %v3817_v63 = vld [vmem:[#allocation26_spill] sm:$0xff]  ;;  %v3830_v51 = vld [vmem:[#allocation39_spill] sm:$0xff] }
 0x434   :  { %2461 = vtanh.f32 %v3445_v60 }
 0x441   :  { %v2462_v4 = vpop.eup %2461 }
 0x442   :  { %v1412_v44 = vmul.f32 %v2462_v4, %v1407_v50  ;;  %v3833_v50 = vld [vmem:[#allocation42_spill] sm:$0xff]  ;;  %v3834_v4 = vmov 0.0  }
 0x444   :  { %1546 = vmatmul.mubr.f32.vlgmr.msra.gmra.mxu0 %v1412_v44  ;;  %1617 = vmatmul.mubr.f32.vlgmr.msra.gmra.mxu1 %v1412_v44  ;;  %v3835_v44 = vld [vmem:[#allocation43_spill] sm:$0xff] }
 0x445   :  { %1722 = vmatpush1.msra.mxu0 %v3178_v61  ;;  %1793 = vmatpush1.msra.mxu1 %v3180_v38 }
 0x446   :  { %1723 = vmatprep.subr.mxu0 %v3184_v3  ;;  %1794 = vmatprep.subr.mxu1 %v3186_v1 }
 0x447   :  { %1724 = vmatpush1.msra.mxu0 %v3190_v57  ;;  %1795 = vmatpush1.msra.mxu1 %v3192_v54 }
 0x448   :  { %1725 = vmatprep.subr.mxu0 %v3196_v2  ;;  %1796 = vmatprep.subr.mxu1 %v3198_v20 }
 0x449   :  { %1726 = vmatpush1.msra.mxu0 %v3202_v55  ;;  %1797 = vmatpush1.msra.mxu1 %v3204_v29 }
 0x44a   :  { %1727 = vmatprep.subr.mxu0 %v3208_v5  ;;  %1798 = vmatprep.subr.mxu1 %v3210_v6 }
 0x44b   :  { %1728 = vmatpush1.msra.mxu0 %v3214_v7  ;;  %1799 = vmatpush1.msra.mxu1 %v3216_v8 }
 0x44c   :  { %1729 = vmatprep.subr.mxu0 %v3220_v9  ;;  %1800 = vmatprep.subr.mxu1 %v3222_v10 }
 0x44d   :  { %1730 = vmatpush1.msra.mxu0 %v3226_v12  ;;  %1801 = vmatpush1.msra.mxu1 %v3228_v13 }
 0x44e   :  { %1731 = vmatprep.subr.mxu0 %v3232_v14  ;;  %1802 = vmatprep.subr.mxu1 %v3234_v15 }
 0x44f   :  { %1732 = vmatpush1.msra.mxu0 %v3238_v16  ;;  %1803 = vmatpush1.msra.mxu1 %v3240_v17 }
 0x450   :  { %1733 = vmatprep.subr.mxu0 %v3244_v18  ;;  %1804 = vmatprep.subr.mxu1 %v3246_v19 }
 0x451   :  { %1734 = vmatpush1.msra.mxu0 %v3250_v21  ;;  %1805 = vmatpush1.msra.mxu1 %v3252_v22 }
 0x452   :  { %1735 = vmatprep.subr.mxu0 %v3256_v23  ;;  %1806 = vmatprep.subr.mxu1 %v3258_v24 }
 0x453   :  { %1736 = vmatpush1.msra.mxu0 %v3262_v25  ;;  %1807 = vmatpush1.msra.mxu1 %v3264_v27 }
 0x454   :  { %1737 = vmatprep.subr.mxu0 %v3268_v28  ;;  %1808 = vmatprep.subr.mxu1 %v3270_v30 }
 0x455   :  { %1738 = vmatpush1.msra.mxu0 %v3272_v31  ;;  %1809 = vmatpush1.msra.mxu1 %v3276_v32 }
 0x456   :  { %1739 = vmatprep.subr.mxu0 %v3278_v33  ;;  %1810 = vmatprep.subr.mxu1 %v3280_v34 }
 0x457   :  { %1740 = vmatpush1.msra.mxu0 %v3284_v35  ;;  %1811 = vmatpush1.msra.mxu1 %v3286_v36 }
 0x458   :  { %1741 = vmatprep.subr.mxu0 %v3288_v37  ;;  %1812 = vmatprep.subr.mxu1 %v3292_v39 }
 0x459   :  { %1742 = vmatpush1.msra.mxu0 %v3294_v40  ;;  %1813 = vmatpush1.msra.mxu1 %v3296_v41 }
 0x45a   :  { %1743 = vmatprep.subr.mxu0 %v3300_v42  ;;  %1814 = vmatprep.subr.mxu1 %v3816_v47 }
 0x45b   :  { %1744 = vmatpush1.msra.mxu0 %v3817_v63  ;;  %1815 = vmatpush1.msra.mxu1 %v3818_v56 }
 0x45c   :  { %1745 = vmatprep.subr.mxu0 %v3819_v59  ;;  %1816 = vmatprep.subr.mxu1 %v3820_v43 }
 0x45d   :  { %1746 = vmatpush1.msra.mxu0 %v3821_v53  ;;  %1817 = vmatpush1.msra.mxu1 %v3822_v11 }
 0x45e   :  { %1747 = vmatprep.subr.mxu0 %v3823_v49  ;;  %1818 = vmatprep.subr.mxu1 %v3824_v52  ;;  %v3839_v49 = vld [vmem:[#allocation57_spill] sm:$0xff] }
 0x45f   :  { %1748 = vmatpush1.msra.mxu0 %v3825_v26  ;;  %1819 = vmatpush1.msra.mxu1 %v3826_v48  ;;  %v3836_v48 = vld [vmem:[#allocation23_spill] sm:$0xff] }
 0x460   :  { %1749 = vmatprep.subr.mxu0 %v3827_v0  ;;  %1820 = vmatprep.subr.mxu1 %v3828_v62  ;;  %v3837_v0 = vld [vmem:[#allocation24_spill] sm:$0xff] }
 0x461   :  { %1750 = vmatpush1.msra.mxu0 %v3829_v58  ;;  %1821 = vmatpush1.msra.mxu1 %v3830_v51  ;;  %v3838_v58 = vld [vmem:[#allocation55_spill] sm:$0xff] }
 0x462   :  { %1751 = vmatprep.subr.mxu0 %v3831_v45  ;;  %1822 = vmatprep.subr.mxu1 %v3832_v46 }
 0x463   :  { %1752 = vmatpush1.msra.mxu0 %v3833_v50  ;;  %1785 = vmatprep.mubr.f32.mxu0 %v3834_v4  ;;  %v3840_v50 = vld [vmem:[#allocation56_spill] sm:$0xff] }
 0x464   :  { %1823 = vmatpush1.msra.mxu1 %v3835_v44  ;;  %1856 = vmatprep.mubr.f32.mxu1 %v3834_v4  ;;  %v3841_v4 = vld [vmem:[#allocation58_spill] sm:$0xff] }
 0x465   :  { %1961 = vmatprep.subr.mxu0 %v3836_v48  ;;  %2032 = vmatprep.subr.mxu1 %v3837_v0 }
 0x504   :  { %v1547_v62 = vpop.f32.mrf.mxu0  ;;  %v1618_v51 = vpop.f32.mrf.mxu1 }
 0x505   :  { %v1623_v26 = vadd.f32 %v1547_v62, %v3838_v58  ;;  %v1625_v11 = vadd.f32 %v1618_v51, %v3840_v50 }
 0x506   :  { %v1549_v52 = vpop.f32.mrf.mxu0  ;;  %v1620_v44 = vpop.f32.mrf.mxu1 }
 0x507   :  { %v1632_v45 = vmul.f32 0.5, %v1623_v26  ;;  %v1624_v46 = vadd.f32 %v1549_v52, %v3839_v49  ;;  %v1626_v43 = vadd.f32 %v1620_v44, %v3841_v4  ;;  %v2198_v4 = vld [vmem:[#allocation11 + $0x1e8] sm:$0xff]  ;;  %v2200_v44 = vld [vmem:[#allocation11 + $0x1f8] sm:$0xff] }
 0x509   :  { %2463 = vtanh.f32 %v1632_v45  ;;  %v1637_v53 = vmul.f32 0.5, %v1624_v46  ;;  %v1644_v48 = vmul.f32 0.5, %v1626_v43 }
 0x50b   :  { %2465 = vtanh.f32 %v1637_v53 }
 0x50c   :  { %2467 = vtanh.f32 %v1625_v11 }
 0x50d   :  { %2469 = vtanh.f32 %v1644_v48  ;;  %v2197_v48 = vld [vmem:[#allocation11 + $0x1e0] sm:$0xff] }
 0x516   :  { %v2464_v59 = vpop.eup %2463 }
 0x517   :  { %v1634_v0 = vmul.f32 0.5, %v2464_v59 }
 0x518   :  { %v2466_v56 = vpop.eup %2465 }
 0x519   :  { %v1635_v63 = vadd.f32 0.5, %v1634_v0  ;;  %v1639_v62 = vmul.f32 0.5, %v2466_v56  ;;  %v2468_v58 = vpop.eup %2467  ;;  %v2199_v0 = vld [vmem:[#allocation11 + $0x1f0] sm:$0xff] }
 0x51a   :  { %v2470_v53 = vpop.eup %2469 }
 0x51b   :  { %v1640_v26 = vadd.f32 0.5, %v1639_v62  ;;  %v1649_v47 = vmul.f32 %v2468_v58, %v1635_v63  ;;  %v1646_v11 = vmul.f32 0.5, %v2470_v53  ;;  %v2194_v62 = vld [vmem:[#allocation11 + $0x1c8] sm:$0xff]  ;;  %v2196_v58 = vld [vmem:[#allocation11 + $0x1d8] sm:$0xff] }
 0x51c   :  { %v2192_v53 = vld [vmem:[#allocation11 + $0x1b8] sm:$0xff] }
 0x51d   :  { %v1648_v49 = vmul.f32 %v1640_v26, %v3445_v60  ;;  %v1647_v51 = vadd.f32 0.5, %v1646_v11  ;;  %v2193_v26 = vld [vmem:[#allocation11 + $0x1c0] sm:$0xff] }
 0x51e   :  { %v2189_v11 = vld [vmem:[#allocation11 + $0x1a0] sm:$0xff] }
 0x51f   :  { %v3519_v52 = vadd.f32 %v1649_v47, %v1648_v49  ;;  %v2195_v49 = vld [vmem:[#allocation11 + $0x1d0] sm:$0xff] }
 0x521   :  { %2471 = vtanh.f32 %v3519_v52 }
 0x52e   :  { %v2472_v45 = vpop.eup %2471 }
 0x52f   :  { %v1652_v43 = vmul.f32 %v2472_v45, %v1647_v51  ;;  %v2191_v51 = vld [vmem:[#allocation11 + $0x1b0] sm:$0xff]  ;;  %v2186_v45 = vld [vmem:[#allocation11 + $0x188] sm:$0xff] }
 0x531   :  { %1786 = vmatmul.mubr.f32.vlgmr.msra.gmra.mxu0 %v1652_v43  ;;  %1857 = vmatmul.mubr.f32.vlgmr.msra.gmra.mxu1 %v1652_v43  ;;  %v2188_v43 = vld [vmem:[#allocation11 + $0x198] sm:$0xff] }
 0x532   :  { %1962 = vmatpush1.msra.mxu0 %v3178_v61  ;;  %2033 = vmatpush1.msra.mxu1 %v3180_v38  ;;  %v3842_v61 = vld [vmem:[#allocation25_spill] sm:$0xff]  ;;  %v3843_v38 = vld [vmem:[#allocation26_spill] sm:$0xff] }
 0x533   :  { %1963 = vmatprep.subr.mxu0 %v3184_v3  ;;  %2034 = vmatprep.subr.mxu1 %v3186_v1  ;;  %v3844_v3 = vld [vmem:[#allocation27_spill] sm:$0xff]  ;;  %v3845_v1 = vld [vmem:[#allocation28_spill] sm:$0xff] }
 0x534   :  { %1964 = vmatpush1.msra.mxu0 %v3190_v57  ;;  %2035 = vmatpush1.msra.mxu1 %v3192_v54  ;;  %v3846_v57 = vld [vmem:[#allocation29_spill] sm:$0xff]  ;;  %v3847_v54 = vld [vmem:[#allocation30_spill] sm:$0xff] }
 0x535   :  { %1965 = vmatprep.subr.mxu0 %v3196_v2  ;;  %2036 = vmatprep.subr.mxu1 %v3198_v20  ;;  %v3848_v2 = vld [vmem:[#allocation31_spill] sm:$0xff]  ;;  %v3849_v20 = vld [vmem:[#allocation32_spill] sm:$0xff] }
 0x536   :  { %1966 = vmatpush1.msra.mxu0 %v3202_v55  ;;  %2037 = vmatpush1.msra.mxu1 %v3204_v29  ;;  %v3850_v55 = vld [vmem:[#allocation33_spill] sm:$0xff]  ;;  %v3851_v29 = vld [vmem:[#allocation34_spill] sm:$0xff] }
 0x537   :  { %1967 = vmatprep.subr.mxu0 %v3208_v5  ;;  %2038 = vmatprep.subr.mxu1 %v3210_v6  ;;  %v3852_v5 = vld [vmem:[#allocation35_spill] sm:$0xff]  ;;  %v3853_v6 = vld [vmem:[#allocation36_spill] sm:$0xff] }
 0x538   :  { %1968 = vmatpush1.msra.mxu0 %v3214_v7  ;;  %2039 = vmatpush1.msra.mxu1 %v3216_v8  ;;  %v3854_v7 = vld [vmem:[#allocation37_spill] sm:$0xff]  ;;  %v3855_v8 = vld [vmem:[#allocation38_spill] sm:$0xff] }
 0x539   :  { %1969 = vmatprep.subr.mxu0 %v3220_v9  ;;  %2040 = vmatprep.subr.mxu1 %v3222_v10  ;;  %v3856_v9 = vld [vmem:[#allocation39_spill] sm:$0xff]  ;;  %v3857_v10 = vld [vmem:[#allocation40_spill] sm:$0xff] }
 0x53a   :  { %1970 = vmatpush1.msra.mxu0 %v3226_v12  ;;  %2041 = vmatpush1.msra.mxu1 %v3228_v13  ;;  %v3858_v12 = vld [vmem:[#allocation41_spill] sm:$0xff]  ;;  %v3859_v13 = vld [vmem:[#allocation42_spill] sm:$0xff] }
 0x53b   :  { %1971 = vmatprep.subr.mxu0 %v3232_v14  ;;  %2042 = vmatprep.subr.mxu1 %v3234_v15  ;;  %v3860_v14 = vmov 0.0   ;;  %v3861_v15 = vld [vmem:[#allocation43_spill] sm:$0xff] }
 0x53c   :  { %1972 = vmatpush1.msra.mxu0 %v3238_v16  ;;  %2043 = vmatpush1.msra.mxu1 %v3240_v17  ;;  %v3862_v17 = vld [vmem:[#allocation59_spill] sm:$0xff] }
 0x53d   :  { %1973 = vmatprep.subr.mxu0 %v3244_v18  ;;  %2044 = vmatprep.subr.mxu1 %v3246_v19 }
 0x53e   :  { %1974 = vmatpush1.msra.mxu0 %v3250_v21  ;;  %2045 = vmatpush1.msra.mxu1 %v3252_v22 }
 0x53f   :  { %1975 = vmatprep.subr.mxu0 %v3256_v23  ;;  %2046 = vmatprep.subr.mxu1 %v3258_v24  ;;  %v3863_v23 = vld [vmem:[#allocation61_spill] sm:$0xff] }
 0x540   :  { %1976 = vmatpush1.msra.mxu0 %v3262_v25  ;;  %2047 = vmatpush1.msra.mxu1 %v3264_v27  ;;  %v3864_v25 = vld [vmem:[#allocation60_spill] sm:$0xff] }
 0x541   :  { %1977 = vmatprep.subr.mxu0 %v3268_v28  ;;  %2048 = vmatprep.subr.mxu1 %v3270_v30 }
 0x542   :  { %1978 = vmatpush1.msra.mxu0 %v3272_v31  ;;  %2049 = vmatpush1.msra.mxu1 %v3276_v32  ;;  %v3865_v31 = vld [vmem:[#allocation62_spill] sm:$0xff] }
 0x543   :  { %1979 = vmatprep.subr.mxu0 %v3278_v33  ;;  %2050 = vmatprep.subr.mxu1 %v3280_v34 }
 0x544   :  { %1980 = vmatpush1.msra.mxu0 %v3284_v35  ;;  %2051 = vmatpush1.msra.mxu1 %v3286_v36 }
 0x545   :  { %1981 = vmatprep.subr.mxu0 %v3288_v37  ;;  %2052 = vmatprep.subr.mxu1 %v3292_v39 }
 0x546   :  { %1982 = vmatpush1.msra.mxu0 %v3294_v40  ;;  %2053 = vmatpush1.msra.mxu1 %v3296_v41 }
 0x547   :  { %1983 = vmatprep.subr.mxu0 %v3300_v42  ;;  %2054 = vmatprep.subr.mxu1 %v3842_v61  ;;  %v2185_v61 = vld [vmem:[#allocation11 + $0x180] sm:$0xff] }
 0x548   :  { %1984 = vmatpush1.msra.mxu0 %v3843_v38  ;;  %2055 = vmatpush1.msra.mxu1 %v3844_v3  ;;  %v2187_v38 = vld [vmem:[#allocation11 + $0x190] sm:$0xff]  ;;  %v2182_v3 = vld [vmem:[#allocation11 + $0x168] sm:$0xff] }
 0x549   :  { %1985 = vmatprep.subr.mxu0 %v3845_v1  ;;  %2056 = vmatprep.subr.mxu1 %v3846_v57  ;;  %v2184_v1 = vld [vmem:[#allocation11 + $0x178] sm:$0xff]  ;;  %v2181_v57 = vld [vmem:[#allocation11 + $0x160] sm:$0xff] }
 0x54a   :  { %1986 = vmatpush1.msra.mxu0 %v3847_v54  ;;  %2057 = vmatpush1.msra.mxu1 %v3848_v2  ;;  %v2183_v54 = vld [vmem:[#allocation11 + $0x170] sm:$0xff]  ;;  %v2178_v2 = vld [vmem:[#allocation11 + $0x148] sm:$0xff] }
 0x54b   :  { %1987 = vmatprep.subr.mxu0 %v3849_v20  ;;  %2058 = vmatprep.subr.mxu1 %v3850_v55  ;;  %v2180_v20 = vld [vmem:[#allocation11 + $0x158] sm:$0xff]  ;;  %v2177_v55 = vld [vmem:[#allocation11 + $0x140] sm:$0xff] }
 0x54c   :  { %1988 = vmatpush1.msra.mxu0 %v3851_v29  ;;  %2059 = vmatpush1.msra.mxu1 %v3852_v5  ;;  %v2179_v29 = vld [vmem:[#allocation11 + $0x150] sm:$0xff]  ;;  %v2174_v5 = vld [vmem:[#allocation11 + $0x128] sm:$0xff] }
 0x54d   :  { %1989 = vmatprep.subr.mxu0 %v3853_v6  ;;  %2060 = vmatprep.subr.mxu1 %v3854_v7  ;;  %v2176_v6 = vld [vmem:[#allocation11 + $0x138] sm:$0xff]  ;;  %v2173_v7 = vld [vmem:[#allocation11 + $0x120] sm:$0xff] }
 0x54e   :  { %1990 = vmatpush1.msra.mxu0 %v3855_v8  ;;  %2061 = vmatpush1.msra.mxu1 %v3856_v9  ;;  %v2175_v8 = vld [vmem:[#allocation11 + $0x130] sm:$0xff]  ;;  %v2170_v9 = vld [vmem:[#allocation11 + $0x108] sm:$0xff] }
 0x54f   :  { %1991 = vmatprep.subr.mxu0 %v3857_v10  ;;  %2062 = vmatprep.subr.mxu1 %v3858_v12  ;;  %v2172_v10 = vld [vmem:[#allocation11 + $0x118] sm:$0xff]  ;;  %v2169_v12 = vld [vmem:[#allocation11 + $0x100] sm:$0xff] }
 0x550   :  { %1992 = vmatpush1.msra.mxu0 %v3859_v13  ;;  %2025 = vmatprep.mubr.f32.mxu0 %v3860_v14  ;;  %v2171_v13 = vld [vmem:[#allocation11 + $0x110] sm:$0xff] }
 0x551   :  { %2063 = vmatpush1.msra.mxu1 %v3861_v15  ;;  %2096 = vmatprep.mubr.f32.mxu1 %v3860_v14  ;;  %v2168_v15 = vld [vmem:[#allocation11 + $0xf8] sm:$0xff] }
 0x552   :  { %2201 = vmatprep.subr.mxu0 %v2198_v4  ;;  %2272 = vmatprep.subr.mxu1 %v2200_v44  ;;  %v2139_v4 = vld [vmem:[#allocation11 + $0x10] sm:$0xff] }
 0x5f1   :  { %v1787_v16 = vpop.f32.mrf.mxu0  ;;  %v1858_v19 = vpop.f32.mrf.mxu1 }
 0x5f2   :  { %v1863_v18 = vadd.f32 %v1787_v16, %v3862_v17  ;;  %v1865_v27 = vadd.f32 %v1858_v19, %v3864_v25  ;;  %v2165_v16 = vld [vmem:[#allocation11 + $0xe0] sm:$0xff]  ;;  %v2167_v17 = vld [vmem:[#allocation11 + $0xf0] sm:$0xff]  ;;  %v2164_v19 = vld [vmem:[#allocation11 + $0xd8] sm:$0xff] }
 0x5f3   :  { %v1789_v21 = vpop.f32.mrf.mxu0  ;;  %v1860_v30 = vpop.f32.mrf.mxu1  ;;  %v2157_v25 = vld [vmem:[#allocation11 + $0xa0] sm:$0xff] }
 0x5f4   :  { %v1872_v22 = vmul.f32 0.5, %v1863_v18  ;;  %v1864_v24 = vadd.f32 %v1789_v21, %v3863_v23  ;;  %v1866_v32 = vadd.f32 %v1860_v30, %v3865_v31  ;;  %v2162_v18 = vld [vmem:[#allocation11 + $0xc8] sm:$0xff]  ;;  %v2161_v21 = vld [vmem:[#allocation11 + $0xc0] sm:$0xff]  ;;  %v2156_v30 = vld [vmem:[#allocation11 + $0x98] sm:$0xff] }
 0x5f5   :  { %v2158_v23 = vld [vmem:[#allocation11 + $0xa8] sm:$0xff]  ;;  %v2153_v31 = vld [vmem:[#allocation11 + $0x80] sm:$0xff] }
 0x5f6   :  { %2473 = vtanh.f32 %v1872_v22  ;;  %v1877_v28 = vmul.f32 0.5, %v1864_v24  ;;  %v1884_v33 = vmul.f32 0.5, %v1866_v32  ;;  %v2163_v22 = vld [vmem:[#allocation11 + $0xd0] sm:$0xff]  ;;  %v2160_v24 = vld [vmem:[#allocation11 + $0xb8] sm:$0xff] }
 0x5f7   :  { %v2155_v32 = vld [vmem:[#allocation11 + $0x90] sm:$0xff] }
 0x5f8   :  { %2475 = vtanh.f32 %v1877_v28  ;;  %v2154_v28 = vld [vmem:[#allocation11 + $0x88] sm:$0xff] }
 0x5f9   :  { %2477 = vtanh.f32 %v1865_v27  ;;  %v2159_v27 = vld [vmem:[#allocation11 + $0xb0] sm:$0xff] }
 0x5fa   :  { %2479 = vtanh.f32 %v1884_v33  ;;  %v2150_v33 = vld [vmem:[#allocation11 + $0x68] sm:$0xff] }
 0x603   :  { %v2474_v34 = vpop.eup %2473 }
 0x604   :  { %v1874_v35 = vmul.f32 0.5, %v2474_v34  ;;  %v2152_v34 = vld [vmem:[#allocation11 + $0x78] sm:$0xff] }
 0x605   :  { %v2476_v36 = vpop.eup %2475 }
 0x606   :  { %v1875_v37 = vadd.f32 0.5, %v1874_v35  ;;  %v1879_v39 = vmul.f32 0.5, %v2476_v36  ;;  %v2478_v40 = vpop.eup %2477  ;;  %v2149_v35 = vld [vmem:[#allocation11 + $0x60] sm:$0xff]  ;;  %v2151_v36 = vld [vmem:[#allocation11 + $0x70] sm:$0xff] }
 0x607   :  { %v2480_v63 = vpop.eup %2479 }
 0x608   :  { %v1880_v41 = vadd.f32 0.5, %v1879_v39  ;;  %v1889_v42 = vmul.f32 %v2478_v40, %v1875_v37  ;;  %v1886_v56 = vmul.f32 0.5, %v2480_v63  ;;  %v2146_v37 = vld [vmem:[#allocation11 + $0x48] sm:$0xff]  ;;  %v2148_v39 = vld [vmem:[#allocation11 + $0x58] sm:$0xff]  ;;  %v2145_v40 = vld [vmem:[#allocation11 + $0x40] sm:$0xff] }
 0x609   :  { %v2141_v63 = vld [vmem:[#allocation11 + $0x20] sm:$0xff] }
 0x60a   :  { %v1888_v60 = vmul.f32 %v1880_v41, %v3519_v52  ;;  %v1887_v59 = vadd.f32 0.5, %v1886_v56  ;;  %v2190_v52 = vld [vmem:[#allocation11 + $0x1a8] sm:$0xff]  ;;  %v2147_v41 = vld [vmem:[#allocation11 + $0x50] sm:$0xff] }
 0x60b   :  { %v2143_v56 = vld [vmem:[#allocation11 + $0x30] sm:$0xff] }
 0x60c   :  { %v3591_v47 = vadd.f32 %v1889_v42, %v1888_v60  ;;  %v2142_v42 = vld [vmem:[#allocation11 + $0x28] sm:$0xff]  ;;  %v2144_v60 = vld [vmem:[#allocation11 + $0x38] sm:$0xff] }
 0x60e   :  { %2481 = vtanh.f32 %v3591_v47 }
 0x61b   :  { %v2482_v46 = vpop.eup %2481 }
 0x61c   :  { %v1892_v50 = vmul.f32 %v2482_v46, %v1887_v59  ;;  %v2138_v59 = vld [vmem:[#allocation11 + $0x8] sm:$0xff]  ;;  %v2140_v46 = vld [vmem:[#allocation11 + $0x18] sm:$0xff] }
 0x61e   :  { %2026 = vmatmul.mubr.f32.vlgmr.msra.gmra.mxu0 %v1892_v50  ;;  %2097 = vmatmul.mubr.f32.vlgmr.msra.gmra.mxu1 %v1892_v50  ;;  %v2137_v50 = vld [vmem:[#allocation11] sm:$0xff] }
 0x61f   :  { %2265 = vmatprep.mubr.f32.mxu0 %v3860_v14  ;;  %2336 = vmatprep.mubr.f32.mxu1 %v3860_v14  ;;  %v2166_v14 = vld [vmem:[#allocation11 + $0xe8] sm:$0xff] }
 0x620   :  { %2202 = vmatpush1.msra.mxu0 %v2197_v48  ;;  %2273 = vmatpush1.msra.mxu1 %v2199_v0  ;;  %v3866_v48 = vld [vmem:[#allocation63_spill] sm:$0xff] }
 0x621   :  { %2203 = vmatprep.subr.mxu0 %v2194_v62  ;;  %2274 = vmatprep.subr.mxu1 %v2196_v58 }
 0x622   :  { %2204 = vmatpush1.msra.mxu0 %v2193_v26  ;;  %2275 = vmatpush1.msra.mxu1 %v2195_v49  ;;  %v3867_v49 = vld [vmem:[#allocation65_spill] sm:$0xff] }
 0x623   :  { %2205 = vmatprep.subr.mxu0 %v2190_v52  ;;  %2276 = vmatprep.subr.mxu1 %v2192_v53  ;;  %v3868_v53 = vld [vmem:[#allocation64_spill] sm:$0xff] }
 0x624   :  { %2206 = vmatpush1.msra.mxu0 %v2189_v11  ;;  %2277 = vmatpush1.msra.mxu1 %v2191_v51 }
 0x625   :  { %2207 = vmatprep.subr.mxu0 %v2186_v45  ;;  %2278 = vmatprep.subr.mxu1 %v2188_v43  ;;  %v3869_v43 = vld [vmem:[#allocation66_spill] sm:$0xff] }
 0x626   :  { %2208 = vmatpush1.msra.mxu0 %v2185_v61  ;;  %2279 = vmatpush1.msra.mxu1 %v2187_v38 }
 0x627   :  { %2209 = vmatprep.subr.mxu0 %v2182_v3  ;;  %2280 = vmatprep.subr.mxu1 %v2184_v1 }
 0x628   :  { %2210 = vmatpush1.msra.mxu0 %v2181_v57  ;;  %2281 = vmatpush1.msra.mxu1 %v2183_v54 }
 0x629   :  { %2211 = vmatprep.subr.mxu0 %v2178_v2  ;;  %2282 = vmatprep.subr.mxu1 %v2180_v20 }
 0x62a   :  { %2212 = vmatpush1.msra.mxu0 %v2177_v55  ;;  %2283 = vmatpush1.msra.mxu1 %v2179_v29 }
 0x62b   :  { %2213 = vmatprep.subr.mxu0 %v2174_v5  ;;  %2284 = vmatprep.subr.mxu1 %v2176_v6 }
 0x62c   :  { %2214 = vmatpush1.msra.mxu0 %v2173_v7  ;;  %2285 = vmatpush1.msra.mxu1 %v2175_v8 }
 0x62d   :  { %2215 = vmatprep.subr.mxu0 %v2170_v9  ;;  %2286 = vmatprep.subr.mxu1 %v2172_v10 }
 0x62e   :  { %2216 = vmatpush1.msra.mxu0 %v2169_v12  ;;  %2287 = vmatpush1.msra.mxu1 %v2171_v13 }
 0x62f   :  { %2217 = vmatprep.subr.mxu0 %v2166_v14  ;;  %2288 = vmatprep.subr.mxu1 %v2168_v15  ;;  %v3870_v14 = vld [vmem:[#allocation67_spill] sm:$0xff] }
 0x630   :  { %2218 = vmatpush1.msra.mxu0 %v2165_v16  ;;  %2289 = vmatpush1.msra.mxu1 %v2167_v17 }
 0x631   :  { %2219 = vmatprep.subr.mxu0 %v2162_v18  ;;  %2290 = vmatprep.subr.mxu1 %v2164_v19  ;;  %v3871_v19 = vld [vmem:[#allocation69_spill] sm:$0xff] }
 0x632   :  { %2220 = vmatpush1.msra.mxu0 %v2161_v21  ;;  %2291 = vmatpush1.msra.mxu1 %v2163_v22  ;;  %v3872_v22 = vld [vmem:[#allocation68_spill] sm:$0xff] }
 0x633   :  { %2221 = vmatprep.subr.mxu0 %v2158_v23  ;;  %2292 = vmatprep.subr.mxu1 %v2160_v24 }
 0x634   :  { %2222 = vmatpush1.msra.mxu0 %v2157_v25  ;;  %2293 = vmatpush1.msra.mxu1 %v2159_v27  ;;  %v3873_v25 = vld [vmem:[#allocation70_spill] sm:$0xff] }
 0x635   :  { %2223 = vmatprep.subr.mxu0 %v2154_v28  ;;  %2294 = vmatprep.subr.mxu1 %v2156_v30 }
 0x636   :  { %2224 = vmatpush1.msra.mxu0 %v2153_v31  ;;  %2295 = vmatpush1.msra.mxu1 %v2155_v32 }
 0x637   :  { %2225 = vmatprep.subr.mxu0 %v2150_v33  ;;  %2296 = vmatprep.subr.mxu1 %v2152_v34 }
 0x638   :  { %2226 = vmatpush1.msra.mxu0 %v2149_v35  ;;  %2297 = vmatpush1.msra.mxu1 %v2151_v36 }
 0x639   :  { %2227 = vmatprep.subr.mxu0 %v2146_v37  ;;  %2298 = vmatprep.subr.mxu1 %v2148_v39 }
 0x63a   :  { %2228 = vmatpush1.msra.mxu0 %v2145_v40  ;;  %2299 = vmatpush1.msra.mxu1 %v2147_v41 }
 0x63b   :  { %2229 = vmatprep.subr.mxu0 %v2142_v42  ;;  %2300 = vmatprep.subr.mxu1 %v2144_v60 }
 0x63c   :  { %2230 = vmatpush1.msra.mxu0 %v2141_v63  ;;  %2301 = vmatpush1.msra.mxu1 %v2143_v56 }
 0x63d   :  { %2231 = vmatprep.subr.mxu0 %v2138_v59  ;;  %2302 = vmatprep.subr.mxu1 %v2140_v46 }
 0x63e   :  { %2232 = vmatpush1.msra.mxu0 %v2137_v50  ;;  %2303 = vmatpush1.msra.mxu1 %v2139_v4 }
 0x6de   :  { %v2027_v44 = vpop.f32.mrf.mxu0  ;;  %v2098_v62 = vpop.f32.mrf.mxu1 }
 0x6df   :  { %v2103_v0 = vadd.f32 %v2027_v44, %v3866_v48  ;;  %v2105_v11 = vadd.f32 %v2098_v62, %v3868_v53 }
 0x6e0   :  { %v2029_v58 = vpop.f32.mrf.mxu0  ;;  %v2100_v45 = vpop.f32.mrf.mxu1 }
 0x6e1   :  { %v2112_v26 = vmul.f32 0.5, %v2103_v0  ;;  %v2104_v52 = vadd.f32 %v2029_v58, %v3867_v49  ;;  %v2106_v61 = vadd.f32 %v2100_v45, %v3869_v43 }
 0x6e3   :  { %2483 = vtanh.f32 %v2112_v26  ;;  %v2117_v51 = vmul.f32 0.5, %v2104_v52  ;;  %v2124_v38 = vmul.f32 0.5, %v2106_v61 }
 0x6e5   :  { %2485 = vtanh.f32 %v2117_v51 }
 0x6e6   :  { %2487 = vtanh.f32 %v2105_v11 }
 0x6e7   :  { %2489 = vtanh.f32 %v2124_v38 }
 0x6f0   :  { %v2484_v3 = vpop.eup %2483 }
 0x6f1   :  { %v2114_v1 = vmul.f32 0.5, %v2484_v3 }
 0x6f2   :  { %v2486_v57 = vpop.eup %2485 }
 0x6f3   :  { %v2115_v54 = vadd.f32 0.5, %v2114_v1  ;;  %v2119_v2 = vmul.f32 0.5, %v2486_v57  ;;  %v2488_v20 = vpop.eup %2487 }
 0x6f4   :  { %v2490_v7 = vpop.eup %2489 }
 0x6f5   :  { %v2120_v55 = vadd.f32 0.5, %v2119_v2  ;;  %v2129_v29 = vmul.f32 %v2488_v20, %v2115_v54  ;;  %v2126_v8 = vmul.f32 0.5, %v2490_v7 }
 0x6f7   :  { %v2128_v5 = vmul.f32 %v2120_v55, %v3591_v47  ;;  %v2127_v9 = vadd.f32 0.5, %v2126_v8 }
 0x6f9   :  { %v2130_v6 = vadd.f32 %v2129_v29, %v2128_v5 }
 0x6fb   :  { %2491 = vtanh.f32 %v2130_v6 }
 0x708   :  { %v2492_v10 = vpop.eup %2491 }
 0x709   :  { %v2132_v12 = vmul.f32 %v2492_v10, %v2127_v9 }
 0x70b   :  { %2266 = vmatmul.mubr.f32.vlgmr.msra.gmra.mxu0 %v2132_v12  ;;  %2337 = vmatmul.mubr.f32.vlgmr.msra.gmra.mxu1 %v2132_v12 }
 0x7cb   :  { %v2267_v13 = vpop.f32.mrf.mxu0  ;;  %v2338_v16 = vpop.f32.mrf.mxu1 }
 0x7cc   :  { %v2343_v15 = vadd.f32 %v2267_v13, %v3870_v14  ;;  %v2345_v47 = vadd.f32 %v2338_v16, %v3872_v22 }
 0x7cd   :  { %v2269_v17 = vpop.f32.mrf.mxu0  ;;  %v2340_v24 = vpop.f32.mrf.mxu1 }
 0x7ce   :  { %v2352_v18 = vmul.f32 0.5, %v2343_v15  ;;  %v2344_v21 = vadd.f32 %v2269_v17, %v3871_v19  ;;  %v2346_v27 = vadd.f32 %v2340_v24, %v3873_v25 }
 0x7d0   :  { %2493 = vtanh.f32 %v2352_v18  ;;  %v2357_v23 = vmul.f32 0.5, %v2344_v21  ;;  %v2364_v28 = vmul.f32 0.5, %v2346_v27 }
 0x7d2   :  { %2495 = vtanh.f32 %v2357_v23 }
 0x7d3   :  { %2497 = vtanh.f32 %v2345_v47 }
 0x7d4   :  { %2499 = vtanh.f32 %v2364_v28 }
 0x7dd   :  { %v2494_v30 = vpop.eup %2493 }
 0x7de   :  { %v2354_v31 = vmul.f32 0.5, %v2494_v30 }
 0x7df   :  { %v2496_v32 = vpop.eup %2495 }
 0x7e0   :  { %v2355_v33 = vadd.f32 0.5, %v2354_v31  ;;  %v2359_v34 = vmul.f32 0.5, %v2496_v32  ;;  %v2498_v35 = vpop.eup %2497 }
 0x7e2   :  { %v2360_v36 = vadd.f32 0.5, %v2359_v34  ;;  %v2369_v37 = vmul.f32 %v2498_v35, %v2355_v33 }
 0x7e4   :  { %v2368_v39 = vmul.f32 %v2360_v36, %v2130_v6 }
 0x7e6   :  { %v2370_v40 = vadd.f32 %v2369_v37, %v2368_v39 }
 0x7e8   :  { %2501 = vtanh.f32 %v2370_v40  ;;  %2379 = vst [vmem:[#allocation16] sm:$0xff] %v2370_v40 }
 0x7e9   :  { %2614 = shalt.err (!%p2611_p1)
}
 0x7ea   :  { %2399 = dma.vmem_to_hbm [thread:$0]  %s2397_s27, 128, %s3618_s7, [#allocation17]   ;;  %v2500_v41 = vpop.eup %2499 }
 0x7eb   :  { %v2366_v42 = vmul.f32 0.5, %v2500_v41  ;;  %s2664_s8 = smov [#allocation15]  }
 0x7ec   :  { %s2386_s9 = sshll.u32 %s2664_s8, 4  ;;  %s2387_s9 = int_to_ptr.vmem [resolvable:$true] %s2386_s9 }
 0x7ed   :  { %v2367_v60 = vadd.f32 0.5, %v2366_v42  ;;  %s2623_s10 = scalar_lea.vmem %s2387_s9, 128  ;;  %p2628_p3 = scmp.lt.s32.totalorder %s2387_s9, %s2387_s9 }
 0x7ee   :  { %p2624_p2 = scmp.ne.s32.totalorder %s2387_s9, %s2623_s10  ;;  %p2629_p4 = scmp.lt.s32.totalorder %s2623_s10, %s2623_s10 }
 0x7f0   :  { %p2630_p5 = por %p2629_p4, %p2628_p3 }
 0x7f2   :  { %p2631_p6 = pnand %p2630_p5, %p2624_p2 }
 0x7f5   :  { %v2502_v63 = vpop.eup %2501 }
 0x7f6   :  { %v2372_v56 = vmul.f32 %v2502_v63, %v2367_v60 }
 0x7f8   :  { %2378 = vst [vmem:[#allocation15] sm:$0xff] %v2372_v56 }
 0x7f9   :  { %2634 = shalt.err (!%p2631_p6)
}
 0x7fa   :  { %2389 = dma.vmem_to_hbm [thread:$0]  %s2387_s9, 128, %s3617_s6, [#allocation8]  }
 0x7fb   :  { %2649 = dma.done.wait [#allocation8], 128  }
 0x7fc   :  { %2650 = vsyncadd [#allocation8], 4294967168 }
 0x7fd   :  { %2651 = dma.done.wait [#allocation17], 128  }
 0x7fe   :  { %2652 = vsyncadd [#allocation17], 4294967168 }
 0x7ff   :  { %2406 = vsyncpa [#allocation7], 1 }
 0x800   :  { %2407 = vsyncpa [#allocation10], 1 }
 0x801   :  { %2408 = vsyncpa [#allocation13], 1 }
 0x802   :  { %2409 = vsyncpa [#allocation8], 1 }
 0x803   :  { %2410 = vsyncpa [#allocation17], 1 }

// kernel: tpu_custom_call.1
= control target key start
LH: loop header
LB: loop body
LE: loop exit
PB: predicated region body
PF: predicated region fallthrough
CT: control target
= control target key end

     0   :  { %13 = vsyncpa [#allocation7], 0  ;;  %s3611_s0 = inlined_call_operand.hbm [shape: f32[1,1,64,128], index: 0, kind: input, shape index: {}]   ;;  %s3612_s1 = inlined_call_operand.hbm [shape: f32[128,512], index: 1, kind: input, shape index: {}]   ;;  %s3613_s2 = inlined_call_operand.hbm [shape: f32[128,512], index: 2, kind: input, shape index: {}]   ;;  %s3614_s3 = inlined_call_operand.hbm [shape: f32[1,512], index: 3, kind: input, shape index: {}]   ;;  %s3615_s4 = inlined_call_operand.hbm [shape: f32[8,128], index: 4, kind: input, shape index: {}]   ;;  %s3616_s5 = inlined_call_operand.vmem [shape: f32[8,128], index: 5, kind: input, shape index: {}]   ;;  %s3617_s6 = inlined_call_operand.hbm [shape: f32[8,128], index: 6, kind: output, shape index: {0}]   ;;  %s3618_s7 = inlined_call_operand.hbm [shape: f32[8,128], index: 7, kind: output, shape index: {1}]  }
   0x1   :  { %14 = vsyncpa [#allocation10], 0 }
   0x2   :  { %15 = vsyncpa [#allocation13], 0 }
   0x3   :  { %16 = vsyncpa [#allocation8], 0 }
   0x4   :  { %17 = vsyncpa [#allocation17], 0  ;;  %s2653_s24 = smov [#allocation9]  }
   0x5   :  { %s35_s25 = sshll.u32 %s2653_s24, 4  ;;  %s36_s25 = int_to_ptr.vmem [resolvable:$true] %s35_s25 }
   0x6   :  { %s2511_s26 = scalar_lea.vmem %s36_s25, 8192  ;;  %p2516_p1 = scmp.lt.s32.totalorder %s36_s25, %s36_s25 }
   0x7   :  { %p2512_p0 = scmp.ne.s32.totalorder %s36_s25, %s2511_s26  ;;  %p2517_p2 = scmp.lt.s32.totalorder %s2511_s26, %s2511_s26 }
   0x9   :  { %p2518_p3 = por %p2517_p2, %p2516_p1 }
   0xb   :  { %p2519_p4 = pnand %p2518_p3, %p2512_p0 }
   0xd   :  { %2522 = shalt.err (!%p2519_p4)
}
   0xe   :  { %s2654_s27 = smov 512   ;;  %s2655_s28 = smov 32  }
   0xf   :  { %41 = dma.hbm_to_vmem [thread:$0]  %s3612_s1, 8192, %s36_s25, [#allocation10], %s2654_s27, %s2654_s27, %s2655_s28  }
  0x10   :  { %s2656_s8 = smov [#allocation12]   ;;  %s2657_s10 = smov [#allocation6]  }
  0x11   :  { %s60_s9 = sshll.u32 %s2656_s8, 4  ;;  %s23_s11 = sshll.u32 %s2657_s10, 4  ;;  %s61_s9 = int_to_ptr.vmem [resolvable:$true] %s60_s9  ;;  %s24_s11 = int_to_ptr.vmem [resolvable:$true] %s23_s11 }
  0x12   :  { %s2531_s12 = scalar_lea.vmem %s61_s9, 64  ;;  %p2536_p6 = scmp.lt.s32.totalorder %s61_s9, %s61_s9 }
  0x13   :  { %p2532_p5 = scmp.ne.s32.totalorder %s61_s9, %s2531_s12  ;;  %p2537_p7 = scmp.lt.s32.totalorder %s2531_s12, %s2531_s12 }
  0x15   :  { %p2538_p8 = por %p2537_p7, %p2536_p6 }
  0x17   :  { %p2539_p9 = pnand %p2538_p8, %p2532_p5 }
  0x19   :  { %2542 = shalt.err (!%p2539_p9)
}
  0x1a   :  { %63 = dma.hbm_to_vmem [thread:$0]  %s3614_s3, 64, %s61_s9, [#allocation13]  }
  0x1b   :  { %s2551_s15 = scalar_lea.vmem %s24_s11, 1024  ;;  %p2556_p11 = scmp.lt.s32.totalorder %s24_s11, %s24_s11 }
  0x1c   :  { %p2552_p10 = scmp.ne.s32.totalorder %s24_s11, %s2551_s15  ;;  %p2557_p12 = scmp.lt.s32.totalorder %s2551_s15, %s2551_s15 }
  0x1e   :  { %p2558_p13 = por %p2557_p12, %p2556_p11 }
  0x20   :  { %p2559_p0 = pnand %p2558_p13, %p2552_p10 }
  0x22   :  { %2562 = shalt.err (!%p2559_p0)
}
  0x23   :  { %s2658_s1 = smov 128   ;;  %s2659_s16 = smov 8  }
  0x24   :  { %29 = dma.hbm_to_vmem [thread:$0]  %s3611_s0, 1024, %s24_s11, [#allocation7], %s2658_s1, %s2658_s1, %s2659_s16  }
  0x25   :  { %s2660_s19 = smov [#allocation11]   ;;  %s2661_s21 = smov [#allocation14]  }
  0x26   :  { %s47_s20 = sshll.u32 %s2660_s19, 4  ;;  %s70_s22 = sshll.u32 %s2661_s21, 4  ;;  %s48_s20 = int_to_ptr.vmem [resolvable:$true] %s47_s20  ;;  %s71_s22 = int_to_ptr.vmem [resolvable:$true] %s70_s22 }
  0x27   :  { %s2571_s3 = scalar_lea.vmem %s48_s20, 8192  ;;  %p2576_p2 = scmp.lt.s32.totalorder %s48_s20, %s48_s20 }
  0x28   :  { %p2572_p1 = scmp.ne.s32.totalorder %s48_s20, %s2571_s3  ;;  %p2577_p3 = scmp.lt.s32.totalorder %s2571_s3, %s2571_s3 }
  0x2a   :  { %p2578_p4 = por %p2577_p3, %p2576_p2 }
  0x2c   :  { %p2579_p5 = pnand %p2578_p4, %p2572_p1 }
  0x2e   :  { %2582 = shalt.err (!%p2579_p5)
}
  0x2f   :  { %53 = dma.hbm_to_vmem [thread:$0]  %s3613_s2, 8192, %s48_s20, [#allocation10], %s2654_s27, %s2654_s27, %s2655_s28  }
  0x30   :  { %s2591_s0 = scalar_lea.vmem %s71_s22, 128  ;;  %p2596_p7 = scmp.lt.s32.totalorder %s71_s22, %s71_s22 }
  0x31   :  { %p2592_p6 = scmp.ne.s32.totalorder %s71_s22, %s2591_s0  ;;  %p2597_p8 = scmp.lt.s32.totalorder %s2591_s0, %s2591_s0 }
  0x33   :  { %p2598_p9 = por %p2597_p8, %p2596_p7 }
  0x35   :  { %p2599_p10 = pnand %p2598_p9, %p2592_p6 }
  0x37   :  { %2602 = shalt.err (!%p2599_p10)
}
  0x38   :  { %73 = dma.hbm_to_vmem [thread:$0]  %s3615_s4, 128, %s71_s22, [#allocation13]  }
  0x39   :  { %2643 = dma.done.wait [#allocation7], 1024  }
  0x3a   :  { %2644 = vsyncadd [#allocation7], 4294966272 }
  0x3b   :  { %2645 = dma.done.wait [#allocation10], 16384  }
  0x3c   :  { %2646 = vsyncadd [#allocation10], 4294950912 }
  0x3d   :  { %2647 = dma.done.wait [#allocation13], 192  }
  0x3e   :  { %2648 = vsyncadd [#allocation13], 4294967104  ;;  %v3619_v0 = vmov 0.0   ;;  %v168_v1 = vld [vmem:[#allocation9 + $0x1e8] sm:$0xff]  ;;  %v170_v2 = vld [vmem:[#allocation9 + $0x1f8] sm:$0xff] }
  0x3f   :  { %257 = vmatprep.mubr.f32.mxu0 %v3619_v0  ;;  %370 = vmatprep.mubr.f32.mxu1 %v3619_v0  ;;  %v167_v3 = vld [vmem:[#allocation9 + $0x1e0] sm:$0xff]  ;;  %v169_v4 = vld [vmem:[#allocation9 + $0x1f0] sm:$0xff]  ;;  %v164_v5 = vld [vmem:[#allocation9 + $0x1c8] sm:$0xff] }
  0x40   :  { %193 = vmatprep.subr.mxu0 %v168_v1  ;;  %306 = vmatprep.subr.mxu1 %v170_v2  ;;  %v166_v6 = vld [vmem:[#allocation9 + $0x1d8] sm:$0xff]  ;;  %v163_v7 = vld [vmem:[#allocation9 + $0x1c0] sm:$0xff]  ;;  %v165_v8 = vld [vmem:[#allocation9 + $0x1d0] sm:$0xff] }
  0x41   :  { %194 = vmatpush1.msra.mxu0 %v167_v3  ;;  %307 = vmatpush1.msra.mxu1 %v169_v4  ;;  %v160_v9 = vld [vmem:[#allocation9 + $0x1a8] sm:$0xff]  ;;  %v162_v10 = vld [vmem:[#allocation9 + $0x1b8] sm:$0xff]  ;;  %v159_v11 = vld [vmem:[#allocation9 + $0x1a0] sm:$0xff] }
  0x42   :  { %195 = vmatprep.subr.mxu0 %v164_v5  ;;  %308 = vmatprep.subr.mxu1 %v166_v6  ;;  %v161_v12 = vld [vmem:[#allocation9 + $0x1b0] sm:$0xff]  ;;  %v156_v13 = vld [vmem:[#allocation9 + $0x188] sm:$0xff]  ;;  %v158_v14 = vld [vmem:[#allocation9 + $0x198] sm:$0xff] }
  0x43   :  { %196 = vmatpush1.msra.mxu0 %v163_v7  ;;  %309 = vmatpush1.msra.mxu1 %v165_v8  ;;  %v155_v15 = vld [vmem:[#allocation9 + $0x180] sm:$0xff]  ;;  %v157_v16 = vld [vmem:[#allocation9 + $0x190] sm:$0xff]  ;;  %v152_v17 = vld [vmem:[#allocation9 + $0x168] sm:$0xff] }
  0x44   :  { %197 = vmatprep.subr.mxu0 %v160_v9  ;;  %310 = vmatprep.subr.mxu1 %v162_v10  ;;  %v154_v18 = vld [vmem:[#allocation9 + $0x178] sm:$0xff]  ;;  %v151_v19 = vld [vmem:[#allocation9 + $0x160] sm:$0xff]  ;;  %v153_v20 = vld [vmem:[#allocation9 + $0x170] sm:$0xff] }
  0x45   :  { %198 = vmatpush1.msra.mxu0 %v159_v11  ;;  %311 = vmatpush1.msra.mxu1 %v161_v12  ;;  %v148_v21 = vld [vmem:[#allocation9 + $0x148] sm:$0xff]  ;;  %v150_v22 = vld [vmem:[#allocation9 + $0x158] sm:$0xff]  ;;  %v147_v23 = vld [vmem:[#allocation9 + $0x140] sm:$0xff] }
  0x46   :  { %199 = vmatprep.subr.mxu0 %v156_v13  ;;  %312 = vmatprep.subr.mxu1 %v158_v14  ;;  %v149_v24 = vld [vmem:[#allocation9 + $0x150] sm:$0xff]  ;;  %v144_v25 = vld [vmem:[#allocation9 + $0x128] sm:$0xff]  ;;  %v146_v26 = vld [vmem:[#allocation9 + $0x138] sm:$0xff] }
  0x47   :  { %200 = vmatpush1.msra.mxu0 %v155_v15  ;;  %313 = vmatpush1.msra.mxu1 %v157_v16  ;;  %v143_v27 = vld [vmem:[#allocation9 + $0x120] sm:$0xff]  ;;  %v145_v28 = vld [vmem:[#allocation9 + $0x130] sm:$0xff]  ;;  %v140_v29 = vld [vmem:[#allocation9 + $0x108] sm:$0xff] }
  0x48   :  { %201 = vmatprep.subr.mxu0 %v152_v17  ;;  %314 = vmatprep.subr.mxu1 %v154_v18  ;;  %v142_v30 = vld [vmem:[#allocation9 + $0x118] sm:$0xff]  ;;  %v139_v31 = vld [vmem:[#allocation9 + $0x100] sm:$0xff]  ;;  %v141_v32 = vld [vmem:[#allocation9 + $0x110] sm:$0xff] }
  0x49   :  { %202 = vmatpush1.msra.mxu0 %v151_v19  ;;  %315 = vmatpush1.msra.mxu1 %v153_v20  ;;  %v136_v33 = vld [vmem:[#allocation9 + $0xe8] sm:$0xff]  ;;  %v138_v34 = vld [vmem:[#allocation9 + $0xf8] sm:$0xff]  ;;  %v135_v35 = vld [vmem:[#allocation9 + $0xe0] sm:$0xff] }
  0x4a   :  { %203 = vmatprep.subr.mxu0 %v148_v21  ;;  %316 = vmatprep.subr.mxu1 %v150_v22  ;;  %v137_v36 = vld [vmem:[#allocation9 + $0xf0] sm:$0xff]  ;;  %v132_v37 = vld [vmem:[#allocation9 + $0xc8] sm:$0xff]  ;;  %v134_v38 = vld [vmem:[#allocation9 + $0xd8] sm:$0xff] }
  0x4b   :  { %204 = vmatpush1.msra.mxu0 %v147_v23  ;;  %317 = vmatpush1.msra.mxu1 %v149_v24  ;;  %v131_v39 = vld [vmem:[#allocation9 + $0xc0] sm:$0xff]  ;;  %v133_v40 = vld [vmem:[#allocation9 + $0xd0] sm:$0xff]  ;;  %v128_v41 = vld [vmem:[#allocation9 + $0xa8] sm:$0xff] }
  0x4c   :  { %205 = vmatprep.subr.mxu0 %v144_v25  ;;  %318 = vmatprep.subr.mxu1 %v146_v26  ;;  %v130_v42 = vld [vmem:[#allocation9 + $0xb8] sm:$0xff]  ;;  %v127_v43 = vld [vmem:[#allocation9 + $0xa0] sm:$0xff]  ;;  %v129_v44 = vld [vmem:[#allocation9 + $0xb0] sm:$0xff] }
  0x4d   :  { %206 = vmatpush1.msra.mxu0 %v143_v27  ;;  %319 = vmatpush1.msra.mxu1 %v145_v28  ;;  %v124_v45 = vld [vmem:[#allocation9 + $0x88] sm:$0xff]  ;;  %v126_v46 = vld [vmem:[#allocation9 + $0x98] sm:$0xff]  ;;  %v123_v47 = vld [vmem:[#allocation9 + $0x80] sm:$0xff] }
  0x4e   :  { %207 = vmatprep.subr.mxu0 %v140_v29  ;;  %320 = vmatprep.subr.mxu1 %v142_v30  ;;  %v125_v48 = vld [vmem:[#allocation9 + $0x90] sm:$0xff]  ;;  %v120_v49 = vld [vmem:[#allocation9 + $0x68] sm:$0xff]  ;;  %v122_v50 = vld [vmem:[#allocation9 + $0x78] sm:$0xff] }
  0x4f   :  { %208 = vmatpush1.msra.mxu0 %v139_v31  ;;  %321 = vmatpush1.msra.mxu1 %v141_v32  ;;  %v119_v51 = vld [vmem:[#allocation9 + $0x60] sm:$0xff]  ;;  %v121_v52 = vld [vmem:[#allocation9 + $0x70] sm:$0xff]  ;;  %v116_v53 = vld [vmem:[#allocation9 + $0x48] sm:$0xff] }
  0x50   :  { %209 = vmatprep.subr.mxu0 %v136_v33  ;;  %322 = vmatprep.subr.mxu1 %v138_v34  ;;  %v118_v54 = vld [vmem:[#allocation9 + $0x58] sm:$0xff]  ;;  %v115_v55 = vld [vmem:[#allocation9 + $0x40] sm:$0xff]  ;;  %v117_v56 = vld [vmem:[#allocation9 + $0x50] sm:$0xff] }
  0x51   :  { %210 = vmatpush1.msra.mxu0 %v135_v35  ;;  %323 = vmatpush1.msra.mxu1 %v137_v36  ;;  %v112_v57 = vld [vmem:[#allocation9 + $0x28] sm:$0xff]  ;;  %v114_v58 = vld [vmem:[#allocation9 + $0x38] sm:$0xff]  ;;  %v111_v59 = vld [vmem:[#allocation9 + $0x20] sm:$0xff] }
  0x52   :  { %211 = vmatprep.subr.mxu0 %v132_v37  ;;  %324 = vmatprep.subr.mxu1 %v134_v38  ;;  %v113_v60 = vld [vmem:[#allocation9 + $0x30] sm:$0xff]  ;;  %v108_v61 = vld [vmem:[#allocation9 + $0x8] sm:$0xff]  ;;  %v110_v62 = vld [vmem:[#allocation9 + $0x18] sm:$0xff] }
  0x53   :  { %212 = vmatpush1.msra.mxu0 %v131_v39  ;;  %325 = vmatpush1.msra.mxu1 %v133_v40  ;;  %v107_v63 = vld [vmem:[#allocation9] sm:$0xff]  ;;  %v109_v1 = vld [vmem:[#allocation9 + $0x10] sm:$0xff]  ;;  %v2728_v3 = vld [vmem:[#allocation11 + $0x1e8] sm:$0xff] }
  0x54   :  { %213 = vmatprep.subr.mxu0 %v128_v41  ;;  %326 = vmatprep.subr.mxu1 %v130_v42  ;;  %v99_v2 = vld [vmem:[#allocation6] sm:$0xff]  ;;  %v2730_v4 = vld [vmem:[#allocation11 + $0x1f8] sm:$0xff]  ;;  %v2734_v6 = vld [vmem:[#allocation11 + $0x1f0] sm:$0xff] }
  0x55   :  { %214 = vmatpush1.msra.mxu0 %v127_v43  ;;  %327 = vmatpush1.msra.mxu1 %v129_v44  ;;  %v2732_v5 = vld [vmem:[#allocation11 + $0x1e0] sm:$0xff]  ;;  %v2736_v7 = vld [vmem:[#allocation11 + $0x1c8] sm:$0xff]  ;;  %v2738_v8 = vld [vmem:[#allocation11 + $0x1d8] sm:$0xff] }
  0x56   :  { %215 = vmatprep.subr.mxu0 %v124_v45  ;;  %328 = vmatprep.subr.mxu1 %v126_v46  ;;  %v2744_v9 = vld [vmem:[#allocation11 + $0x1c0] sm:$0xff]  ;;  %v2746_v10 = vld [vmem:[#allocation11 + $0x1d0] sm:$0xff]  ;;  %v100_v11 = vld [vmem:[#allocation6 + $0x8] sm:$0xff] }
  0x57   :  { %216 = vmatpush1.msra.mxu0 %v123_v47  ;;  %329 = vmatpush1.msra.mxu1 %v125_v48  ;;  %v2752_v12 = vld [vmem:[#allocation11 + $0x1a8] sm:$0xff]  ;;  %v2754_v13 = vld [vmem:[#allocation11 + $0x1b8] sm:$0xff]  ;;  %v2758_v14 = vld [vmem:[#allocation11 + $0x1a0] sm:$0xff] }
  0x58   :  { %217 = vmatprep.subr.mxu0 %v120_v49  ;;  %330 = vmatprep.subr.mxu1 %v122_v50  ;;  %v2760_v15 = vld [vmem:[#allocation11 + $0x1b0] sm:$0xff]  ;;  %v2762_v16 = vld [vmem:[#allocation11 + $0x188] sm:$0xff]  ;;  %v2764_v17 = vld [vmem:[#allocation11 + $0x198] sm:$0xff] }
  0x59   :  { %218 = vmatpush1.msra.mxu0 %v119_v51  ;;  %331 = vmatpush1.msra.mxu1 %v121_v52  ;;  %v2770_v18 = vld [vmem:[#allocation11 + $0x180] sm:$0xff]  ;;  %v2772_v19 = vld [vmem:[#allocation11 + $0x190] sm:$0xff]  ;;  %v2778_v21 = vld [vmem:[#allocation11 + $0x168] sm:$0xff] }
  0x5a   :  { %219 = vmatprep.subr.mxu0 %v116_v53  ;;  %332 = vmatprep.subr.mxu1 %v118_v54  ;;  %v101_v20 = vld [vmem:[#allocation6 + $0x10] sm:$0xff]  ;;  %v2780_v22 = vld [vmem:[#allocation11 + $0x178] sm:$0xff]  ;;  %v2784_v23 = vld [vmem:[#allocation11 + $0x160] sm:$0xff] }
  0x5b   :  { %220 = vmatpush1.msra.mxu0 %v115_v55  ;;  %333 = vmatpush1.msra.mxu1 %v117_v56  ;;  %v2786_v24 = vld [vmem:[#allocation11 + $0x170] sm:$0xff]  ;;  %v2788_v25 = vld [vmem:[#allocation11 + $0x148] sm:$0xff]  ;;  %v2790_v26 = vld [vmem:[#allocation11 + $0x158] sm:$0xff] }
  0x5c   :  { %221 = vmatprep.subr.mxu0 %v112_v57  ;;  %334 = vmatprep.subr.mxu1 %v114_v58  ;;  %v2796_v27 = vld [vmem:[#allocation11 + $0x140] sm:$0xff]  ;;  %v2798_v28 = vld [vmem:[#allocation11 + $0x150] sm:$0xff]  ;;  %v102_v29 = vld [vmem:[#allocation6 + $0x18] sm:$0xff] }
  0x5d   :  { %222 = vmatpush1.msra.mxu0 %v111_v59  ;;  %335 = vmatpush1.msra.mxu1 %v113_v60  ;;  %v2804_v30 = vld [vmem:[#allocation11 + $0x128] sm:$0xff]  ;;  %v2806_v31 = vld [vmem:[#allocation11 + $0x138] sm:$0xff]  ;;  %v2810_v32 = vld [vmem:[#allocation11 + $0x120] sm:$0xff] }
  0x5e   :  { %223 = vmatprep.subr.mxu0 %v108_v61  ;;  %336 = vmatprep.subr.mxu1 %v110_v62  ;;  %v2812_v33 = vld [vmem:[#allocation11 + $0x130] sm:$0xff]  ;;  %v2814_v34 = vld [vmem:[#allocation11 + $0x108] sm:$0xff]  ;;  %v2816_v35 = vld [vmem:[#allocation11 + $0x118] sm:$0xff] }
  0x5f   :  { %224 = vmatpush1.msra.mxu0 %v107_v63  ;;  %337 = vmatpush1.msra.mxu1 %v109_v1  ;;  %v2822_v36 = vld [vmem:[#allocation11 + $0x100] sm:$0xff]  ;;  %v2824_v37 = vld [vmem:[#allocation11 + $0x110] sm:$0xff]  ;;  %v2830_v39 = vld [vmem:[#allocation11 + $0xe8] sm:$0xff] }
  0x60   :  { %258 = vmatmul.mubr.f32.vlgmr.msra.gmra.mxu0 %v99_v2  ;;  %371 = vmatmul.mubr.f32.vlgmr.msra.gmra.mxu1 %v99_v2  ;;  %v103_v38 = vld [vmem:[#allocation6 + $0x20] sm:$0xff]  ;;  %v2832_v40 = vld [vmem:[#allocation11 + $0xf8] sm:$0xff]  ;;  %v2838_v42 = vld [vmem:[#allocation11 + $0xf0] sm:$0xff] }
  0x61   :  { %521 = vmatprep.subr.mxu0 %v2728_v3  ;;  %592 = vmatprep.subr.mxu1 %v2730_v4  ;;  %v2836_v41 = vld [vmem:[#allocation11 + $0xe0] sm:$0xff]  ;;  %v2840_v43 = vld [vmem:[#allocation11 + $0xc8] sm:$0xff]  ;;  %v2842_v44 = vld [vmem:[#allocation11 + $0xd8] sm:$0xff] }
  0x62   :  { %522 = vmatpush1.msra.mxu0 %v2732_v5  ;;  %593 = vmatpush1.msra.mxu1 %v2734_v6  ;;  %v2848_v45 = vld [vmem:[#allocation11 + $0xc0] sm:$0xff]  ;;  %v2850_v46 = vld [vmem:[#allocation11 + $0xd0] sm:$0xff]  ;;  %v104_v47 = vld [vmem:[#allocation6 + $0x28] sm:$0xff] }
  0x63   :  { %523 = vmatprep.subr.mxu0 %v2736_v7  ;;  %594 = vmatprep.subr.mxu1 %v2738_v8  ;;  %v2856_v48 = vld [vmem:[#allocation11 + $0xa8] sm:$0xff]  ;;  %v2858_v49 = vld [vmem:[#allocation11 + $0xb8] sm:$0xff]  ;;  %v2862_v50 = vld [vmem:[#allocation11 + $0xa0] sm:$0xff] }
  0x64   :  { %263 = vmatprep.mubr.f32.mxu0 %v3619_v0  ;;  %376 = vmatprep.mubr.f32.mxu1 %v3619_v0  ;;  %v2864_v51 = vld [vmem:[#allocation11 + $0xb0] sm:$0xff]  ;;  %v2866_v52 = vld [vmem:[#allocation11 + $0x88] sm:$0xff]  ;;  %v2868_v53 = vld [vmem:[#allocation11 + $0x98] sm:$0xff] }
  0x65   :  { %524 = vmatpush1.msra.mxu0 %v2744_v9  ;;  %595 = vmatpush1.msra.mxu1 %v2746_v10  ;;  %3689 = vst [vmem:[#allocation23_spill] sm:$0xff] %v2866_v52  ;;  %3690 = vst [vmem:[#allocation24_spill] sm:$0xff] %v2868_v53  ;;  %v2874_v54 = vld [vmem:[#allocation11 + $0x80] sm:$0xff]  ;;  %v2876_v55 = vld [vmem:[#allocation11 + $0x90] sm:$0xff] }
  0x66   :  { %264 = vmatmul.mubr.f32.gmra.mxu0 %v100_v11  ;;  %377 = vmatmul.mubr.f32.gmra.mxu1 %v100_v11  ;;  %3691 = vst [vmem:[#allocation25_spill] sm:$0xff] %v2874_v54  ;;  %3692 = vst [vmem:[#allocation26_spill] sm:$0xff] %v2876_v55  ;;  %v105_v56 = vld [vmem:[#allocation6 + $0x30] sm:$0xff]  ;;  %v2882_v57 = vld [vmem:[#allocation11 + $0x68] sm:$0xff] }
  0x67   :  { %525 = vmatprep.subr.mxu0 %v2752_v12  ;;  %596 = vmatprep.subr.mxu1 %v2754_v13  ;;  %3693 = vst [vmem:[#allocation27_spill] sm:$0xff] %v2882_v57  ;;  %v2884_v58 = vld [vmem:[#allocation11 + $0x78] sm:$0xff]  ;;  %v2888_v59 = vld [vmem:[#allocation11 + $0x60] sm:$0xff]  ;;  %v2890_v60 = vld [vmem:[#allocation11 + $0x70] sm:$0xff] }
  0x68   :  { %526 = vmatpush1.msra.mxu0 %v2758_v14  ;;  %597 = vmatpush1.msra.mxu1 %v2760_v15  ;;  %3694 = vst [vmem:[#allocation28_spill] sm:$0xff] %v2884_v58  ;;  %3695 = vst [vmem:[#allocation29_spill] sm:$0xff] %v2888_v59  ;;  %v2892_v61 = vld [vmem:[#allocation11 + $0x48] sm:$0xff]  ;;  %v2894_v62 = vld [vmem:[#allocation11 + $0x58] sm:$0xff] }
  0x69   :  { %527 = vmatprep.subr.mxu0 %v2762_v16  ;;  %598 = vmatprep.subr.mxu1 %v2764_v17  ;;  %3696 = vst [vmem:[#allocation30_spill] sm:$0xff] %v2890_v60  ;;  %3697 = vst [vmem:[#allocation31_spill] sm:$0xff] %v2892_v61  ;;  %v2900_v63 = vld [vmem:[#allocation11 + $0x40] sm:$0xff]  ;;  %v2902_v1 = vld [vmem:[#allocation11 + $0x50] sm:$0xff] }
  0x6a   :  { %269 = vmatprep.mubr.f32.mxu0 %v3619_v0  ;;  %382 = vmatprep.mubr.f32.mxu1 %v3619_v0  ;;  %3698 = vst [vmem:[#allocation32_spill] sm:$0xff] %v2894_v62  ;;  %3699 = vst [vmem:[#allocation33_spill] sm:$0xff] %v2900_v63  ;;  %v106_v2 = vld [vmem:[#allocation6 + $0x38] sm:$0xff]  ;;  %v2908_v11 = vld [vmem:[#allocation11 + $0x28] sm:$0xff] }
  0x6b   :  { %528 = vmatpush1.msra.mxu0 %v2770_v18  ;;  %599 = vmatpush1.msra.mxu1 %v2772_v19  ;;  %3700 = vst [vmem:[#allocation34_spill] sm:$0xff] %v2902_v1  ;;  %3701 = vst [vmem:[#allocation35_spill] sm:$0xff] %v2908_v11 }
  0x6c   :  { %270 = vmatmul.mubr.f32.gmra.mxu0 %v101_v20  ;;  %383 = vmatmul.mubr.f32.gmra.mxu1 %v101_v20  ;;  %v2910_v20 = vld [vmem:[#allocation11 + $0x38] sm:$0xff] }
  0x6d   :  { %529 = vmatprep.subr.mxu0 %v2778_v21  ;;  %600 = vmatprep.subr.mxu1 %v2780_v22  ;;  %3702 = vst [vmem:[#allocation36_spill] sm:$0xff] %v2910_v20 }
  0x6e   :  { %530 = vmatpush1.msra.mxu0 %v2784_v23  ;;  %601 = vmatpush1.msra.mxu1 %v2786_v24 }
  0x6f   :  { %531 = vmatprep.subr.mxu0 %v2788_v25  ;;  %602 = vmatprep.subr.mxu1 %v2790_v26 }
  0x70   :  { %275 = vmatprep.mubr.f32.mxu0 %v3619_v0  ;;  %388 = vmatprep.mubr.f32.mxu1 %v3619_v0 }
  0x71   :  { %532 = vmatpush1.msra.mxu0 %v2796_v27  ;;  %603 = vmatpush1.msra.mxu1 %v2798_v28 }
  0x72   :  { %276 = vmatmul.mubr.f32.gmra.mxu0 %v102_v29  ;;  %389 = vmatmul.mubr.f32.gmra.mxu1 %v102_v29  ;;  %v2914_v29 = vld [vmem:[#allocation11 + $0x20] sm:$0xff] }
  0x73   :  { %533 = vmatprep.subr.mxu0 %v2804_v30  ;;  %604 = vmatprep.subr.mxu1 %v2806_v31  ;;  %3703 = vst [vmem:[#allocation37_spill] sm:$0xff] %v2914_v29 }
  0x74   :  { %534 = vmatpush1.msra.mxu0 %v2810_v32  ;;  %605 = vmatpush1.msra.mxu1 %v2812_v33 }
  0x75   :  { %535 = vmatprep.subr.mxu0 %v2814_v34  ;;  %606 = vmatprep.subr.mxu1 %v2816_v35 }
  0x76   :  { %281 = vmatprep.mubr.f32.mxu0 %v3619_v0  ;;  %394 = vmatprep.mubr.f32.mxu1 %v3619_v0 }
  0x77   :  { %536 = vmatpush1.msra.mxu0 %v2822_v36  ;;  %607 = vmatpush1.msra.mxu1 %v2824_v37 }
  0x78   :  { %282 = vmatmul.mubr.f32.gmra.mxu0 %v103_v38  ;;  %395 = vmatmul.mubr.f32.gmra.mxu1 %v103_v38  ;;  %v2916_v38 = vld [vmem:[#allocation11 + $0x30] sm:$0xff] }
  0x79   :  { %537 = vmatprep.subr.mxu0 %v2830_v39  ;;  %608 = vmatprep.subr.mxu1 %v2832_v40  ;;  %3704 = vst [vmem:[#allocation38_spill] sm:$0xff] %v2916_v38 }
  0x7a   :  { %538 = vmatpush1.msra.mxu0 %v2836_v41  ;;  %609 = vmatpush1.msra.mxu1 %v2838_v42 }
  0x7b   :  { %539 = vmatprep.subr.mxu0 %v2840_v43  ;;  %610 = vmatprep.subr.mxu1 %v2842_v44 }
  0x7c   :  { %287 = vmatprep.mubr.f32.mxu0 %v3619_v0  ;;  %400 = vmatprep.mubr.f32.mxu1 %v3619_v0 }
  0x7d   :  { %540 = vmatpush1.msra.mxu0 %v2848_v45  ;;  %611 = vmatpush1.msra.mxu1 %v2850_v46 }
  0x7e   :  { %288 = vmatmul.mubr.f32.gmra.mxu0 %v104_v47  ;;  %401 = vmatmul.mubr.f32.gmra.mxu1 %v104_v47  ;;  %v2918_v47 = vld [vmem:[#allocation11 + $0x8] sm:$0xff] }
  0x7f   :  { %541 = vmatprep.subr.mxu0 %v2856_v48  ;;  %612 = vmatprep.subr.mxu1 %v2858_v49  ;;  %3705 = vst [vmem:[#allocation39_spill] sm:$0xff] %v2918_v47 }
  0x80   :  { %542 = vmatpush1.msra.mxu0 %v2862_v50  ;;  %613 = vmatpush1.msra.mxu1 %v2864_v51 }
  0x81   :  { %543 = vmatprep.subr.mxu0 %v2866_v52  ;;  %614 = vmatprep.subr.mxu1 %v2868_v53 }
  0x82   :  { %293 = vmatprep.mubr.f32.mxu0 %v3619_v0  ;;  %406 = vmatprep.mubr.f32.mxu1 %v3619_v0 }
  0x83   :  { %544 = vmatpush1.msra.mxu0 %v2874_v54  ;;  %615 = vmatpush1.msra.mxu1 %v2876_v55 }
  0x84   :  { %294 = vmatmul.mubr.f32.gmra.mxu0 %v105_v56  ;;  %407 = vmatmul.mubr.f32.gmra.mxu1 %v105_v56  ;;  %v2920_v56 = vld [vmem:[#allocation11 + $0x18] sm:$0xff] }
  0x85   :  { %545 = vmatprep.subr.mxu0 %v2882_v57  ;;  %616 = vmatprep.subr.mxu1 %v2884_v58  ;;  %3706 = vst [vmem:[#allocation40_spill] sm:$0xff] %v2920_v56 }
  0x86   :  { %546 = vmatpush1.msra.mxu0 %v2888_v59  ;;  %617 = vmatpush1.msra.mxu1 %v2890_v60 }
  0x87   :  { %547 = vmatprep.subr.mxu0 %v2892_v61  ;;  %618 = vmatprep.subr.mxu1 %v2894_v62 }
  0x88   :  { %299 = vmatprep.mubr.f32.mxu0 %v3619_v0  ;;  %412 = vmatprep.mubr.f32.mxu1 %v3619_v0  ;;  %v2924_v0 = vld [vmem:[#allocation11] sm:$0xff] }
  0x89   :  { %548 = vmatpush1.msra.mxu0 %v2900_v63  ;;  %619 = vmatpush1.msra.mxu1 %v2902_v1  ;;  %3707 = vst [vmem:[#allocation41_spill] sm:$0xff] %v2924_v0  ;;  %v2928_v1 = vld [vmem:[#allocation11 + $0x10] sm:$0xff]  ;;  %v3709_v63 = vmov 0.0  }
  0x8a   :  { %300 = vmatmul.mubr.f32.gmra.mxu0 %v106_v2  ;;  %413 = vmatmul.mubr.f32.gmra.mxu1 %v106_v2  ;;  %3708 = vst [vmem:[#allocation42_spill] sm:$0xff] %v2928_v1  ;;  %v95_v2 = vld [vmem:[#allocation14] sm:$0xff] }
  0x8b   :  { %549 = vmatprep.subr.mxu0 %v2908_v11  ;;  %620 = vmatprep.subr.mxu1 %v2910_v20 }
  0x8c   :  { %550 = vmatpush1.msra.mxu0 %v2914_v29  ;;  %621 = vmatpush1.msra.mxu1 %v2916_v38 }
  0x8d   :  { %551 = vmatprep.subr.mxu0 %v2918_v47  ;;  %622 = vmatprep.subr.mxu1 %v2920_v56 }
  0x8e   :  { %552 = vmatpush1.msra.mxu0 %v2924_v0  ;;  %585 = vmatprep.mubr.f32.mxu0 %v3709_v63 }
  0x8f   :  { %623 = vmatpush1.msra.mxu1 %v2928_v1  ;;  %656 = vmatprep.mubr.f32.mxu1 %v3709_v63 }
  0x90   :  { %586 = vmatmul.mubr.f32.vlgmr.msra.gmra.mxu0 %v95_v2  ;;  %657 = vmatmul.mubr.f32.vlgmr.msra.gmra.mxu1 %v95_v2  ;;  %v3710_v2 = vld [vmem:[#allocation33_spill] sm:$0xff] }
  0x91   :  { %761 = vmatprep.subr.mxu0 %v2728_v3  ;;  %832 = vmatprep.subr.mxu1 %v2730_v4 }
  0x92   :  { %762 = vmatpush1.msra.mxu0 %v2732_v5  ;;  %833 = vmatpush1.msra.mxu1 %v2734_v6 }
  0x93   :  { %763 = vmatprep.subr.mxu0 %v2736_v7  ;;  %834 = vmatprep.subr.mxu1 %v2738_v8 }
  0x94   :  { %764 = vmatpush1.msra.mxu0 %v2744_v9  ;;  %835 = vmatpush1.msra.mxu1 %v2746_v10 }
  0x95   :  { %765 = vmatprep.subr.mxu0 %v2752_v12  ;;  %836 = vmatprep.subr.mxu1 %v2754_v13 }
  0x96   :  { %766 = vmatpush1.msra.mxu0 %v2758_v14  ;;  %837 = vmatpush1.msra.mxu1 %v2760_v15 }
  0x97   :  { %767 = vmatprep.subr.mxu0 %v2762_v16  ;;  %838 = vmatprep.subr.mxu1 %v2764_v17 }
  0x98   :  { %768 = vmatpush1.msra.mxu0 %v2770_v18  ;;  %839 = vmatpush1.msra.mxu1 %v2772_v19 }
  0x99   :  { %769 = vmatprep.subr.mxu0 %v2778_v21  ;;  %840 = vmatprep.subr.mxu1 %v2780_v22 }
  0x9a   :  { %770 = vmatpush1.msra.mxu0 %v2784_v23  ;;  %841 = vmatpush1.msra.mxu1 %v2786_v24 }
  0x9b   :  { %771 = vmatprep.subr.mxu0 %v2788_v25  ;;  %842 = vmatprep.subr.mxu1 %v2790_v26 }
  0x9c   :  { %772 = vmatpush1.msra.mxu0 %v2796_v27  ;;  %843 = vmatpush1.msra.mxu1 %v2798_v28 }
  0x9d   :  { %773 = vmatprep.subr.mxu0 %v2804_v30  ;;  %844 = vmatprep.subr.mxu1 %v2806_v31 }
  0x9e   :  { %774 = vmatpush1.msra.mxu0 %v2810_v32  ;;  %845 = vmatpush1.msra.mxu1 %v2812_v33 }
  0x9f   :  { %775 = vmatprep.subr.mxu0 %v2814_v34  ;;  %846 = vmatprep.subr.mxu1 %v2816_v35 }
  0xa0   :  { %776 = vmatpush1.msra.mxu0 %v2822_v36  ;;  %847 = vmatpush1.msra.mxu1 %v2824_v37 }
  0xa1   :  { %777 = vmatprep.subr.mxu0 %v2830_v39  ;;  %848 = vmatprep.subr.mxu1 %v2832_v40 }
  0xa2   :  { %778 = vmatpush1.msra.mxu0 %v2836_v41  ;;  %849 = vmatpush1.msra.mxu1 %v2838_v42 }
  0xa3   :  { %779 = vmatprep.subr.mxu0 %v2840_v43  ;;  %850 = vmatprep.subr.mxu1 %v2842_v44 }
  0xa4   :  { %780 = vmatpush1.msra.mxu0 %v2848_v45  ;;  %851 = vmatpush1.msra.mxu1 %v2850_v46 }
  0xa5   :  { %781 = vmatprep.subr.mxu0 %v2856_v48  ;;  %852 = vmatprep.subr.mxu1 %v2858_v49 }
  0xa6   :  { %782 = vmatpush1.msra.mxu0 %v2862_v50  ;;  %853 = vmatpush1.msra.mxu1 %v2864_v51 }
  0xa7   :  { %783 = vmatprep.subr.mxu0 %v2866_v52  ;;  %854 = vmatprep.subr.mxu1 %v2868_v53  ;;  %v3711_v52 = vld [vmem:[#allocation34_spill] sm:$0xff] }
  0xa8   :  { %784 = vmatpush1.msra.mxu0 %v2874_v54  ;;  %855 = vmatpush1.msra.mxu1 %v2876_v55 }
  0xa9   :  { %785 = vmatprep.subr.mxu0 %v2882_v57  ;;  %856 = vmatprep.subr.mxu1 %v2884_v58 }
  0xaa   :  { %786 = vmatpush1.msra.mxu0 %v2888_v59  ;;  %857 = vmatpush1.msra.mxu1 %v2890_v60 }
  0xab   :  { %787 = vmatprep.subr.mxu0 %v2892_v61  ;;  %858 = vmatprep.subr.mxu1 %v2894_v62 }
  0xac   :  { %788 = vmatpush1.msra.mxu0 %v3710_v2  ;;  %859 = vmatpush1.msra.mxu1 %v3711_v52  ;;  %v171_v52 = vld [vmem:[#allocation12] sm:$0xf] }
  0xad   :  { %789 = vmatprep.subr.mxu0 %v2908_v11  ;;  %860 = vmatprep.subr.mxu1 %v2910_v20  ;;  %v173_v20 = vlaneseq }
  0xae   :  { %790 = vmatpush1.msra.mxu0 %v2914_v29  ;;  %861 = vmatpush1.msra.mxu1 %v2916_v38 }
  0xaf   :  { %791 = vmatprep.subr.mxu0 %v2918_v47  ;;  %862 = vmatprep.subr.mxu1 %v2920_v56  ;;  %v174_v29 = vshrl.u32 %v173_v20, 7 }
  0xb0   :  { %792 = vmatpush1.msra.mxu0 %v2924_v0  ;;  %825 = vmatprep.mubr.f32.mxu0 %v3709_v63 }
  0xb1   :  { %863 = vmatpush1.msra.mxu1 %v2928_v1  ;;  %896 = vmatprep.mubr.f32.mxu1 %v3709_v63  ;;  %v175_v47 = vsub.s32 0, %v174_v29  ;;  %v183_v56 = vsub.s32 2, %v174_v29  ;;  %v179_v1 = vsub.s32 1, %v174_v29  ;;  %v187_v62 = vsub.s32 3, %v174_v29 }
  0xb2   :  { %1001 = vmatprep.subr.mxu0 %v2728_v3  ;;  %1072 = vmatprep.subr.mxu1 %v2730_v4 }
  0xb3   :  { %v176_v63 = vrot.slane %v171_v52, %v175_v47  ;;  %v3012_v61 = vrot.slane %v171_v52, %v183_v56  ;;  %v180_v60 = vrot.slane %v171_v52, %v179_v1  ;;  %v3014_v20 = vrot.slane %v171_v52, %v187_v62 }
 0x120   :  { %v3004_v11 = vpop.f32.mrf.mxu0  ;;  %v3006_v38 = vpop.f32.mrf.mxu1 }
 0x122   :  { %v3008_v0 = vpop.f32.mrf.mxu0  ;;  %v3010_v2 = vpop.f32.mrf.mxu1 }
 0x126   :  { %v265_v3 = vpop.f32.mrf.mxu0  ;;  %v378_v4 = vpop.f32.mrf.mxu1 }
 0x127   :  { %v3016_v59 = vadd.f32 %v265_v3, %v176_v63  ;;  %v3019_v58 = vadd.f32 %v378_v4, %v3012_v61 }
 0x128   :  { %v267_v57 = vpop.f32.mrf.mxu0  ;;  %v380_v55 = vpop.f32.mrf.mxu1 }
 0x129   :  { %3712 = vst [vmem:[#allocation43_spill] sm:$0xff] %v3016_v59  ;;  %3713 = vst [vmem:[#allocation44_spill] sm:$0xff] %v3019_v58  ;;  %v3021_v54 = vadd.f32 %v267_v57, %v180_v60  ;;  %v3024_v53 = vadd.f32 %v380_v55, %v3014_v20 }
 0x12b   :  { %3714 = vst [vmem:[#allocation45_spill] sm:$0xff] %v3021_v54  ;;  %3715 = vst [vmem:[#allocation46_spill] sm:$0xff] %v3024_v53 }
 0x12c   :  { %v271_v29 = vpop.f32.mrf.mxu0  ;;  %v384_v47 = vpop.f32.mrf.mxu1 }
 0x12d   :  { %v3026_v56 = vadd.f32 %v271_v29, %v176_v63  ;;  %v3029_v1 = vadd.f32 %v384_v47, %v3012_v61 }
 0x12e   :  { %v273_v52 = vpop.f32.mrf.mxu0  ;;  %v386_v62 = vpop.f32.mrf.mxu1 }
 0x12f   :  { %3716 = vst [vmem:[#allocation47_spill] sm:$0xff] %v3026_v56  ;;  %3717 = vst [vmem:[#allocation48_spill] sm:$0xff] %v3029_v1  ;;  %v3031_v3 = vadd.f32 %v273_v52, %v180_v60  ;;  %v3034_v4 = vadd.f32 %v386_v62, %v3014_v20 }
 0x131   :  { %3718 = vst [vmem:[#allocation49_spill] sm:$0xff] %v3031_v3  ;;  %3719 = vst [vmem:[#allocation50_spill] sm:$0xff] %v3034_v4 }
 0x132   :  { %v277_v58 = vpop.f32.mrf.mxu0  ;;  %v390_v57 = vpop.f32.mrf.mxu1 }
 0x133   :  { %v3036_v54 = vadd.f32 %v277_v58, %v176_v63  ;;  %v3039_v55 = vadd.f32 %v390_v57, %v3012_v61 }
 0x134   :  { %v279_v53 = vpop.f32.mrf.mxu0  ;;  %v392_v29 = vpop.f32.mrf.mxu1 }
 0x135   :  { %3720 = vst [vmem:[#allocation51_spill] sm:$0xff] %v3036_v54  ;;  %3721 = vst [vmem:[#allocation52_spill] sm:$0xff] %v3039_v55  ;;  %v3041_v56 = vadd.f32 %v279_v53, %v180_v60  ;;  %v3044_v47 = vadd.f32 %v392_v29, %v3014_v20 }
 0x137   :  { %3722 = vst [vmem:[#allocation53_spill] sm:$0xff] %v3041_v56  ;;  %3723 = vst [vmem:[#allocation54_spill] sm:$0xff] %v3044_v47 }
 0x138   :  { %v283_v1 = vpop.f32.mrf.mxu0  ;;  %v396_v52 = vpop.f32.mrf.mxu1 }
 0x139   :  { %v3046_v3 = vadd.f32 %v283_v1, %v176_v63  ;;  %v3049_v62 = vadd.f32 %v396_v52, %v3012_v61 }
 0x13a   :  { %v285_v4 = vpop.f32.mrf.mxu0  ;;  %v398_v58 = vpop.f32.mrf.mxu1 }
 0x13b   :  { %3724 = vst [vmem:[#allocation55_spill] sm:$0xff] %v3046_v3  ;;  %3725 = vst [vmem:[#allocation56_spill] sm:$0xff] %v3049_v62  ;;  %v3051_v54 = vadd.f32 %v285_v4, %v180_v60  ;;  %v3054_v57 = vadd.f32 %v398_v58, %v3014_v20 }
 0x13d   :  { %3726 = vst [vmem:[#allocation57_spill] sm:$0xff] %v3051_v54  ;;  %3727 = vst [vmem:[#allocation58_spill] sm:$0xff] %v3054_v57 }
 0x13e   :  { %v289_v55 = vpop.f32.mrf.mxu0  ;;  %v402_v53 = vpop.f32.mrf.mxu1 }
 0x13f   :  { %v3056_v56 = vadd.f32 %v289_v55, %v176_v63  ;;  %v3059_v29 = vadd.f32 %v402_v53, %v3012_v61 }
 0x140   :  { %v291_v47 = vpop.f32.mrf.mxu0  ;;  %v404_v1 = vpop.f32.mrf.mxu1 }
 0x141   :  { %3728 = vst [vmem:[#allocation59_spill] sm:$0xff] %v3056_v56  ;;  %3729 = vst [vmem:[#allocation60_spill] sm:$0xff] %v3059_v29  ;;  %v3061_v3 = vadd.f32 %v291_v47, %v180_v60  ;;  %v3064_v52 = vadd.f32 %v404_v1, %v3014_v20 }
 0x143   :  { %3730 = vst [vmem:[#allocation61_spill] sm:$0xff] %v3061_v3  ;;  %3731 = vst [vmem:[#allocation62_spill] sm:$0xff] %v3064_v52 }
 0x144   :  { %v295_v62 = vpop.f32.mrf.mxu0  ;;  %v408_v4 = vpop.f32.mrf.mxu1 }
 0x145   :  { %v3066_v54 = vadd.f32 %v295_v62, %v176_v63  ;;  %v3069_v58 = vadd.f32 %v408_v4, %v3012_v61 }
 0x146   :  { %v297_v57 = vpop.f32.mrf.mxu0  ;;  %v410_v55 = vpop.f32.mrf.mxu1 }
 0x147   :  { %3732 = vst [vmem:[#allocation63_spill] sm:$0xff] %v3066_v54  ;;  %3733 = vst [vmem:[#allocation64_spill] sm:$0xff] %v3069_v58  ;;  %v3071_v56 = vadd.f32 %v297_v57, %v180_v60  ;;  %v3074_v53 = vadd.f32 %v410_v55, %v3014_v20  ;;  %v260_v57 = vadd.f32 %v3004_v11, %v176_v63 }
 0x148   :  { %v262_v55 = vadd.f32 %v3008_v0, %v180_v60 }
 0x149   :  { %3734 = vst [vmem:[#allocation65_spill] sm:$0xff] %v3071_v56  ;;  %3735 = vst [vmem:[#allocation66_spill] sm:$0xff] %v3074_v53 }
 0x14a   :  { %v301_v29 = vpop.f32.mrf.mxu0  ;;  %v414_v47 = vpop.f32.mrf.mxu1 }
 0x14b   :  { %v3076_v3 = vadd.f32 %v301_v29, %v176_v63  ;;  %v3079_v1 = vadd.f32 %v414_v47, %v3012_v61  ;;  %v373_v47 = vadd.f32 %v3006_v38, %v3012_v61 }
 0x14c   :  { %v303_v52 = vpop.f32.mrf.mxu0  ;;  %v416_v62 = vpop.f32.mrf.mxu1 }
 0x14d   :  { %3736 = vst [vmem:[#allocation67_spill] sm:$0xff] %v3076_v3  ;;  %3737 = vst [vmem:[#allocation68_spill] sm:$0xff] %v3079_v1  ;;  %v3081_v54 = vadd.f32 %v303_v52, %v180_v60  ;;  %v3084_v4 = vadd.f32 %v416_v62, %v3014_v20  ;;  %v375_v62 = vadd.f32 %v3010_v2, %v3014_v20 }
 0x14f   :  { %3738 = vst [vmem:[#allocation69_spill] sm:$0xff] %v3081_v54  ;;  %3739 = vst [vmem:[#allocation70_spill] sm:$0xff] %v3084_v4  ;;  %v3350_v4 = vld [vmem:[#allocation11 + $0x18] sm:$0xff] }
 0x150   :  { %v587_v58 = vpop.f32.mrf.mxu0  ;;  %v658_v3 = vpop.f32.mrf.mxu1 }
 0x151   :  { %v663_v53 = vadd.f32 %v587_v58, %v260_v57  ;;  %v665_v52 = vadd.f32 %v658_v3, %v373_v47 }
 0x152   :  { %v589_v56 = vpop.f32.mrf.mxu0  ;;  %v660_v54 = vpop.f32.mrf.mxu1 }
 0x153   :  { %v672_v59 = vmul.f32 0.5, %v663_v53  ;;  %v664_v29 = vadd.f32 %v589_v56, %v262_v55  ;;  %v666_v63 = vadd.f32 %v660_v54, %v375_v62 }
 0x155   :  { %2423 = vtanh.f32 %v672_v59  ;;  %v677_v1 = vmul.f32 0.5, %v664_v29  ;;  %v684_v11 = vmul.f32 0.5, %v666_v63  ;;  %v97_v59 = vld [vmem:[%s3616_s5] sm:$0xff]  ;;  %s2663_s5 = smov [#allocation16]  }
 0x156   :  { %s2396_s27 = sshll.u32 %s2663_s5, 4  ;;  %s2397_s27 = int_to_ptr.vmem [resolvable:$true] %s2396_s27 }
 0x157   :  { %2425 = vtanh.f32 %v677_v1  ;;  %s2603_s28 = scalar_lea.vmem %s2397_s27, 128  ;;  %p2608_p12 = scmp.lt.s32.totalorder %s2397_s27, %s2397_s27 }
 0x158   :  { %2427 = vtanh.f32 %v665_v52  ;;  %p2604_p11 = scmp.ne.s32.totalorder %s2397_s27, %s2603_s28  ;;  %p2609_p13 = scmp.lt.s32.totalorder %s2603_s28, %s2603_s28 }
 0x159   :  { %2429 = vtanh.f32 %v684_v11 }
 0x15a   :  { %p2610_p0 = por %p2609_p13, %p2608_p12 }
 0x15c   :  { %p2611_p1 = pnand %p2610_p0, %p2604_p11 }
 0x162   :  { %v2424_v0 = vpop.eup %2423 }
 0x163   :  { %v674_v60 = vmul.f32 0.5, %v2424_v0 }
 0x164   :  { %v2426_v58 = vpop.eup %2425 }
 0x165   :  { %v675_v53 = vadd.f32 0.5, %v674_v60  ;;  %v679_v56 = vmul.f32 0.5, %v2426_v58  ;;  %v2428_v38 = vpop.eup %2427 }
 0x166   :  { %v2430_v54 = vpop.eup %2429 }
 0x167   :  { %v680_v61 = vadd.f32 0.5, %v679_v56  ;;  %v689_v1 = vmul.f32 %v2428_v38, %v675_v53  ;;  %v686_v2 = vmul.f32 0.5, %v2430_v54  ;;  %v3172_v56 = vld [vmem:[#allocation11 + $0x1e8] sm:$0xff]  ;;  %v3180_v38 = vld [vmem:[#allocation11 + $0x1f0] sm:$0xff] }
 0x168   :  { %v3192_v54 = vld [vmem:[#allocation11 + $0x1d0] sm:$0xff] }
 0x169   :  { %v688_v3 = vmul.f32 %v680_v61, %v97_v59  ;;  %v687_v20 = vadd.f32 0.5, %v686_v2  ;;  %v3174_v59 = vld [vmem:[#allocation11 + $0x1f8] sm:$0xff]  ;;  %v3178_v61 = vld [vmem:[#allocation11 + $0x1e0] sm:$0xff]  ;;  %v3196_v2 = vld [vmem:[#allocation11 + $0x1a8] sm:$0xff] }
 0x16b   :  { %v3095_v57 = vadd.f32 %v689_v1, %v688_v3  ;;  %v3184_v3 = vld [vmem:[#allocation11 + $0x1c8] sm:$0xff]  ;;  %v3186_v1 = vld [vmem:[#allocation11 + $0x1d8] sm:$0xff] }
 0x16d   :  { %2431 = vtanh.f32 %v3095_v57 }
 0x17a   :  { %v2432_v55 = vpop.eup %2431 }
 0x17b   :  { %v692_v29 = vmul.f32 %v2432_v55, %v687_v20  ;;  %v3198_v20 = vld [vmem:[#allocation11 + $0x1b8] sm:$0xff]  ;;  %v3202_v55 = vld [vmem:[#allocation11 + $0x1a0] sm:$0xff] }
 0x17d   :  { %826 = vmatmul.mubr.f32.vlgmr.msra.gmra.mxu0 %v692_v29  ;;  %897 = vmatmul.mubr.f32.vlgmr.msra.gmra.mxu1 %v692_v29  ;;  %v3204_v29 = vld [vmem:[#allocation11 + $0x1b0] sm:$0xff] }
 0x17e   :  { %1002 = vmatpush1.msra.mxu0 %v2732_v5  ;;  %1073 = vmatpush1.msra.mxu1 %v2734_v6  ;;  %v3740_v5 = vld [vmem:[#allocation23_spill] sm:$0xff]  ;;  %v3741_v6 = vld [vmem:[#allocation24_spill] sm:$0xff] }
 0x17f   :  { %1003 = vmatprep.subr.mxu0 %v2736_v7  ;;  %1074 = vmatprep.subr.mxu1 %v2738_v8  ;;  %v3742_v7 = vld [vmem:[#allocation25_spill] sm:$0xff]  ;;  %v3743_v8 = vld [vmem:[#allocation26_spill] sm:$0xff]  ;;  %3765 = vst [vmem:[#allocation23_spill] sm:$0xff] %v3172_v56  ;;  %3766 = vst [vmem:[#allocation24_spill] sm:$0xff] %v3174_v59 }
 0x180   :  { %1004 = vmatpush1.msra.mxu0 %v2744_v9  ;;  %1075 = vmatpush1.msra.mxu1 %v2746_v10  ;;  %v3744_v9 = vld [vmem:[#allocation27_spill] sm:$0xff]  ;;  %v3745_v10 = vld [vmem:[#allocation28_spill] sm:$0xff] }
 0x181   :  { %1005 = vmatprep.subr.mxu0 %v2752_v12  ;;  %1076 = vmatprep.subr.mxu1 %v2754_v13  ;;  %v3746_v12 = vld [vmem:[#allocation29_spill] sm:$0xff]  ;;  %v3747_v13 = vld [vmem:[#allocation30_spill] sm:$0xff] }
 0x182   :  { %1006 = vmatpush1.msra.mxu0 %v2758_v14  ;;  %1077 = vmatpush1.msra.mxu1 %v2760_v15  ;;  %v3748_v14 = vld [vmem:[#allocation31_spill] sm:$0xff]  ;;  %v3749_v15 = vld [vmem:[#allocation32_spill] sm:$0xff] }
 0x183   :  { %1007 = vmatprep.subr.mxu0 %v2762_v16  ;;  %1078 = vmatprep.subr.mxu1 %v2764_v17  ;;  %v3750_v16 = vld [vmem:[#allocation33_spill] sm:$0xff]  ;;  %v3751_v17 = vld [vmem:[#allocation34_spill] sm:$0xff] }
 0x184   :  { %1008 = vmatpush1.msra.mxu0 %v2770_v18  ;;  %1079 = vmatpush1.msra.mxu1 %v2772_v19  ;;  %v3752_v18 = vld [vmem:[#allocation35_spill] sm:$0xff]  ;;  %v3753_v19 = vld [vmem:[#allocation36_spill] sm:$0xff] }
 0x185   :  { %1009 = vmatprep.subr.mxu0 %v2778_v21  ;;  %1080 = vmatprep.subr.mxu1 %v2780_v22  ;;  %v3754_v21 = vld [vmem:[#allocation37_spill] sm:$0xff]  ;;  %v3755_v22 = vld [vmem:[#allocation38_spill] sm:$0xff] }
 0x186   :  { %1010 = vmatpush1.msra.mxu0 %v2784_v23  ;;  %1081 = vmatpush1.msra.mxu1 %v2786_v24  ;;  %v3756_v23 = vld [vmem:[#allocation39_spill] sm:$0xff]  ;;  %v3757_v24 = vld [vmem:[#allocation40_spill] sm:$0xff] }
 0x187   :  { %1011 = vmatprep.subr.mxu0 %v2788_v25  ;;  %1082 = vmatprep.subr.mxu1 %v2790_v26  ;;  %v3758_v25 = vld [vmem:[#allocation41_spill] sm:$0xff]  ;;  %v3759_v26 = vmov 0.0  }
 0x188   :  { %1012 = vmatpush1.msra.mxu0 %v2796_v27  ;;  %1083 = vmatpush1.msra.mxu1 %v2798_v28  ;;  %v3760_v27 = vld [vmem:[#allocation42_spill] sm:$0xff]  ;;  %3783 = vst [vmem:[#allocation41_spill] sm:$0xff] %v3350_v4 }
 0x189   :  { %1013 = vmatprep.subr.mxu0 %v2804_v30  ;;  %1084 = vmatprep.subr.mxu1 %v2806_v31  ;;  %v3761_v30 = vld [vmem:[#allocation43_spill] sm:$0xff] }
 0x18a   :  { %1014 = vmatpush1.msra.mxu0 %v2810_v32  ;;  %1085 = vmatpush1.msra.mxu1 %v2812_v33 }
 0x18b   :  { %1015 = vmatprep.subr.mxu0 %v2814_v34  ;;  %1086 = vmatprep.subr.mxu1 %v2816_v35  ;;  %v3762_v35 = vld [vmem:[#allocation45_spill] sm:$0xff] }
 0x18c   :  { %1016 = vmatpush1.msra.mxu0 %v2822_v36  ;;  %1087 = vmatpush1.msra.mxu1 %v2824_v37  ;;  %v3763_v37 = vld [vmem:[#allocation44_spill] sm:$0xff] }
 0x18d   :  { %1017 = vmatprep.subr.mxu0 %v2830_v39  ;;  %1088 = vmatprep.subr.mxu1 %v2832_v40 }
 0x18e   :  { %1018 = vmatpush1.msra.mxu0 %v2836_v41  ;;  %1089 = vmatpush1.msra.mxu1 %v2838_v42  ;;  %v3764_v42 = vld [vmem:[#allocation46_spill] sm:$0xff] }
 0x18f   :  { %1019 = vmatprep.subr.mxu0 %v2840_v43  ;;  %1090 = vmatprep.subr.mxu1 %v2842_v44 }
 0x190   :  { %1020 = vmatpush1.msra.mxu0 %v2848_v45  ;;  %1091 = vmatpush1.msra.mxu1 %v2850_v46 }
 0x191   :  { %1021 = vmatprep.subr.mxu0 %v2856_v48  ;;  %1092 = vmatprep.subr.mxu1 %v2858_v49 }
 0x192   :  { %1022 = vmatpush1.msra.mxu0 %v2862_v50  ;;  %1093 = vmatpush1.msra.mxu1 %v2864_v51 }
 0x193   :  { %1023 = vmatprep.subr.mxu0 %v3740_v5  ;;  %1094 = vmatprep.subr.mxu1 %v3741_v6  ;;  %v3208_v5 = vld [vmem:[#allocation11 + $0x188] sm:$0xff]  ;;  %v3210_v6 = vld [vmem:[#allocation11 + $0x198] sm:$0xff] }
 0x194   :  { %1024 = vmatpush1.msra.mxu0 %v3742_v7  ;;  %1095 = vmatpush1.msra.mxu1 %v3743_v8  ;;  %v3214_v7 = vld [vmem:[#allocation11 + $0x180] sm:$0xff]  ;;  %v3216_v8 = vld [vmem:[#allocation11 + $0x190] sm:$0xff] }
 0x195   :  { %1025 = vmatprep.subr.mxu0 %v3744_v9  ;;  %1096 = vmatprep.subr.mxu1 %v3745_v10  ;;  %v3220_v9 = vld [vmem:[#allocation11 + $0x168] sm:$0xff]  ;;  %v3222_v10 = vld [vmem:[#allocation11 + $0x178] sm:$0xff] }
 0x196   :  { %1026 = vmatpush1.msra.mxu0 %v3746_v12  ;;  %1097 = vmatpush1.msra.mxu1 %v3747_v13  ;;  %v3226_v12 = vld [vmem:[#allocation11 + $0x160] sm:$0xff]  ;;  %v3228_v13 = vld [vmem:[#allocation11 + $0x170] sm:$0xff] }
 0x197   :  { %1027 = vmatprep.subr.mxu0 %v3748_v14  ;;  %1098 = vmatprep.subr.mxu1 %v3749_v15  ;;  %v3232_v14 = vld [vmem:[#allocation11 + $0x148] sm:$0xff]  ;;  %v3234_v15 = vld [vmem:[#allocation11 + $0x158] sm:$0xff] }
 0x198   :  { %1028 = vmatpush1.msra.mxu0 %v3750_v16  ;;  %1099 = vmatpush1.msra.mxu1 %v3751_v17  ;;  %v3238_v16 = vld [vmem:[#allocation11 + $0x140] sm:$0xff]  ;;  %v3240_v17 = vld [vmem:[#allocation11 + $0x150] sm:$0xff] }
 0x199   :  { %1029 = vmatprep.subr.mxu0 %v3752_v18  ;;  %1100 = vmatprep.subr.mxu1 %v3753_v19  ;;  %v3244_v18 = vld [vmem:[#allocation11 + $0x128] sm:$0xff]  ;;  %v3246_v19 = vld [vmem:[#allocation11 + $0x138] sm:$0xff] }
 0x19a   :  { %1030 = vmatpush1.msra.mxu0 %v3754_v21  ;;  %1101 = vmatpush1.msra.mxu1 %v3755_v22  ;;  %v3250_v21 = vld [vmem:[#allocation11 + $0x120] sm:$0xff]  ;;  %v3252_v22 = vld [vmem:[#allocation11 + $0x130] sm:$0xff] }
 0x19b   :  { %1031 = vmatprep.subr.mxu0 %v3756_v23  ;;  %1102 = vmatprep.subr.mxu1 %v3757_v24  ;;  %v3256_v23 = vld [vmem:[#allocation11 + $0x108] sm:$0xff]  ;;  %v3258_v24 = vld [vmem:[#allocation11 + $0x118] sm:$0xff] }
 0x19c   :  { %1032 = vmatpush1.msra.mxu0 %v3758_v25  ;;  %1065 = vmatprep.mubr.f32.mxu0 %v3759_v26  ;;  %v3262_v25 = vld [vmem:[#allocation11 + $0x100] sm:$0xff] }
 0x19d   :  { %1103 = vmatpush1.msra.mxu1 %v3760_v27  ;;  %1136 = vmatprep.mubr.f32.mxu1 %v3759_v26  ;;  %v3264_v27 = vld [vmem:[#allocation11 + $0x110] sm:$0xff] }
 0x19e   :  { %1241 = vmatprep.subr.mxu0 %v3172_v56  ;;  %1312 = vmatprep.subr.mxu1 %v3174_v59 }
 0x23d   :  { %v827_v28 = vpop.f32.mrf.mxu0  ;;  %v898_v32 = vpop.f32.mrf.mxu1 }
 0x23e   :  { %v903_v31 = vadd.f32 %v827_v28, %v3761_v30  ;;  %v905_v39 = vadd.f32 %v898_v32, %v3763_v37  ;;  %v3268_v28 = vld [vmem:[#allocation11 + $0xe8] sm:$0xff]  ;;  %v3270_v30 = vld [vmem:[#allocation11 + $0xf8] sm:$0xff]  ;;  %v3276_v32 = vld [vmem:[#allocation11 + $0xf0] sm:$0xff] }
 0x23f   :  { %v829_v33 = vpop.f32.mrf.mxu0  ;;  %v900_v41 = vpop.f32.mrf.mxu1  ;;  %v3288_v37 = vld [vmem:[#allocation11 + $0xa8] sm:$0xff] }
 0x240   :  { %v912_v34 = vmul.f32 0.5, %v903_v31  ;;  %v904_v36 = vadd.f32 %v829_v33, %v3762_v35  ;;  %v906_v43 = vadd.f32 %v900_v41, %v3764_v42  ;;  %v3272_v31 = vld [vmem:[#allocation11 + $0xe0] sm:$0xff]  ;;  %v3278_v33 = vld [vmem:[#allocation11 + $0xc8] sm:$0xff]  ;;  %v3296_v41 = vld [vmem:[#allocation11 + $0xb0] sm:$0xff] }
 0x241   :  { %v3284_v35 = vld [vmem:[#allocation11 + $0xc0] sm:$0xff]  ;;  %v3300_v42 = vld [vmem:[#allocation11 + $0x88] sm:$0xff] }
 0x242   :  { %2433 = vtanh.f32 %v912_v34  ;;  %v917_v40 = vmul.f32 0.5, %v904_v36  ;;  %v924_v44 = vmul.f32 0.5, %v906_v43  ;;  %v3280_v34 = vld [vmem:[#allocation11 + $0xd8] sm:$0xff]  ;;  %v3286_v36 = vld [vmem:[#allocation11 + $0xd0] sm:$0xff] }
 0x243   :  { %v3302_v43 = vld [vmem:[#allocation11 + $0x98] sm:$0xff] }
 0x244   :  { %2435 = vtanh.f32 %v917_v40  ;;  %v3294_v40 = vld [vmem:[#allocation11 + $0xa0] sm:$0xff]  ;;  %3767 = vst [vmem:[#allocation25_spill] sm:$0xff] %v3302_v43 }
 0x245   :  { %2437 = vtanh.f32 %v905_v39  ;;  %v3292_v39 = vld [vmem:[#allocation11 + $0xb8] sm:$0xff] }
 0x246   :  { %2439 = vtanh.f32 %v924_v44  ;;  %v3306_v44 = vld [vmem:[#allocation11 + $0x80] sm:$0xff] }
 0x247   :  { %3768 = vst [vmem:[#allocation26_spill] sm:$0xff] %v3306_v44 }
 0x24f   :  { %v2434_v45 = vpop.eup %2433 }
 0x250   :  { %v914_v46 = vmul.f32 0.5, %v2434_v45  ;;  %v3308_v45 = vld [vmem:[#allocation11 + $0x90] sm:$0xff] }
 0x251   :  { %v2436_v48 = vpop.eup %2435  ;;  %3769 = vst [vmem:[#allocation27_spill] sm:$0xff] %v3308_v45 }
 0x252   :  { %v915_v49 = vadd.f32 0.5, %v914_v46  ;;  %v919_v50 = vmul.f32 0.5, %v2436_v48  ;;  %v2438_v51 = vpop.eup %2437  ;;  %v3312_v46 = vld [vmem:[#allocation11 + $0x68] sm:$0xff]  ;;  %v3314_v48 = vld [vmem:[#allocation11 + $0x78] sm:$0xff] }
 0x253   :  { %v2440_v11 = vpop.eup %2439  ;;  %3770 = vst [vmem:[#allocation28_spill] sm:$0xff] %v3312_v46  ;;  %3771 = vst [vmem:[#allocation29_spill] sm:$0xff] %v3314_v48 }
 0x254   :  { %v920_v47 = vadd.f32 0.5, %v919_v50  ;;  %v929_v52 = vmul.f32 %v2438_v51, %v915_v49  ;;  %v926_v0 = vmul.f32 0.5, %v2440_v11  ;;  %v3318_v49 = vld [vmem:[#allocation11 + $0x60] sm:$0xff]  ;;  %v3320_v50 = vld [vmem:[#allocation11 + $0x70] sm:$0xff]  ;;  %v3324_v51 = vld [vmem:[#allocation11 + $0x48] sm:$0xff] }
 0x255   :  { %3772 = vst [vmem:[#allocation30_spill] sm:$0xff] %v3318_v49  ;;  %3773 = vst [vmem:[#allocation31_spill] sm:$0xff] %v3320_v50  ;;  %v3336_v11 = vld [vmem:[#allocation11 + $0x28] sm:$0xff] }
 0x256   :  { %v928_v62 = vmul.f32 %v920_v47, %v3095_v57  ;;  %v927_v60 = vadd.f32 0.5, %v926_v0  ;;  %v3190_v57 = vld [vmem:[#allocation11 + $0x1c0] sm:$0xff]  ;;  %3774 = vst [vmem:[#allocation32_spill] sm:$0xff] %v3324_v51  ;;  %v3326_v47 = vld [vmem:[#allocation11 + $0x58] sm:$0xff]  ;;  %3778 = vst [vmem:[#allocation36_spill] sm:$0xff] %v3336_v11 }
 0x257   :  { %3775 = vst [vmem:[#allocation33_spill] sm:$0xff] %v3326_v47  ;;  %v3338_v0 = vld [vmem:[#allocation11 + $0x38] sm:$0xff] }
 0x258   :  { %v3167_v63 = vadd.f32 %v929_v52, %v928_v62  ;;  %v3330_v52 = vld [vmem:[#allocation11 + $0x40] sm:$0xff]  ;;  %v3332_v62 = vld [vmem:[#allocation11 + $0x50] sm:$0xff]  ;;  %3779 = vst [vmem:[#allocation37_spill] sm:$0xff] %v3338_v0 }
 0x259   :  { %3776 = vst [vmem:[#allocation34_spill] sm:$0xff] %v3330_v52  ;;  %3777 = vst [vmem:[#allocation35_spill] sm:$0xff] %v3332_v62 }
 0x25a   :  { %2441 = vtanh.f32 %v3167_v63 }
 0x267   :  { %v2442_v58 = vpop.eup %2441 }
 0x268   :  { %v932_v53 = vmul.f32 %v2442_v58, %v927_v60  ;;  %v3342_v60 = vld [vmem:[#allocation11 + $0x20] sm:$0xff]  ;;  %v3344_v58 = vld [vmem:[#allocation11 + $0x30] sm:$0xff] }
 0x269   :  { %3780 = vst [vmem:[#allocation38_spill] sm:$0xff] %v3342_v60  ;;  %3781 = vst [vmem:[#allocation39_spill] sm:$0xff] %v3344_v58 }
 0x26a   :  { %1066 = vmatmul.mubr.f32.vlgmr.msra.gmra.mxu0 %v932_v53  ;;  %1137 = vmatmul.mubr.f32.vlgmr.msra.gmra.mxu1 %v932_v53  ;;  %v3348_v53 = vld [vmem:[#allocation11 + $0x8] sm:$0xff] }
 0x26b   :  { %1305 = vmatprep.mubr.f32.mxu0 %v3759_v26  ;;  %1376 = vmatprep.mubr.f32.mxu1 %v3759_v26  ;;  %3782 = vst [vmem:[#allocation40_spill] sm:$0xff] %v3348_v53  ;;  %v3354_v26 = vld [vmem:[#allocation11] sm:$0xff] }
 0x26c   :  { %1242 = vmatpush1.msra.mxu0 %v3178_v61  ;;  %1313 = vmatpush1.msra.mxu1 %v3180_v38  ;;  %3784 = vst [vmem:[#allocation42_spill] sm:$0xff] %v3354_v26 }
 0x26d   :  { %1243 = vmatprep.subr.mxu0 %v3184_v3  ;;  %1314 = vmatprep.subr.mxu1 %v3186_v1 }
 0x26e   :  { %1244 = vmatpush1.msra.mxu0 %v3190_v57  ;;  %1315 = vmatpush1.msra.mxu1 %v3192_v54 }
 0x26f   :  { %1245 = vmatprep.subr.mxu0 %v3196_v2  ;;  %1316 = vmatprep.subr.mxu1 %v3198_v20 }
 0x270   :  { %1246 = vmatpush1.msra.mxu0 %v3202_v55  ;;  %1317 = vmatpush1.msra.mxu1 %v3204_v29 }
 0x271   :  { %1247 = vmatprep.subr.mxu0 %v3208_v5  ;;  %1318 = vmatprep.subr.mxu1 %v3210_v6 }
 0x272   :  { %1248 = vmatpush1.msra.mxu0 %v3214_v7  ;;  %1319 = vmatpush1.msra.mxu1 %v3216_v8 }
 0x273   :  { %1249 = vmatprep.subr.mxu0 %v3220_v9  ;;  %1320 = vmatprep.subr.mxu1 %v3222_v10 }
 0x274   :  { %1250 = vmatpush1.msra.mxu0 %v3226_v12  ;;  %1321 = vmatpush1.msra.mxu1 %v3228_v13 }
 0x275   :  { %1251 = vmatprep.subr.mxu0 %v3232_v14  ;;  %1322 = vmatprep.subr.mxu1 %v3234_v15 }
 0x276   :  { %1252 = vmatpush1.msra.mxu0 %v3238_v16  ;;  %1323 = vmatpush1.msra.mxu1 %v3240_v17 }
 0x277   :  { %1253 = vmatprep.subr.mxu0 %v3244_v18  ;;  %1324 = vmatprep.subr.mxu1 %v3246_v19 }
 0x278   :  { %1254 = vmatpush1.msra.mxu0 %v3250_v21  ;;  %1325 = vmatpush1.msra.mxu1 %v3252_v22 }
 0x279   :  { %1255 = vmatprep.subr.mxu0 %v3256_v23  ;;  %1326 = vmatprep.subr.mxu1 %v3258_v24 }
 0x27a   :  { %1256 = vmatpush1.msra.mxu0 %v3262_v25  ;;  %1327 = vmatpush1.msra.mxu1 %v3264_v27 }
 0x27b   :  { %1257 = vmatprep.subr.mxu0 %v3268_v28  ;;  %1328 = vmatprep.subr.mxu1 %v3270_v30 }
 0x27c   :  { %1258 = vmatpush1.msra.mxu0 %v3272_v31  ;;  %1329 = vmatpush1.msra.mxu1 %v3276_v32 }
 0x27d   :  { %1259 = vmatprep.subr.mxu0 %v3278_v33  ;;  %1330 = vmatprep.subr.mxu1 %v3280_v34 }
 0x27e   :  { %1260 = vmatpush1.msra.mxu0 %v3284_v35  ;;  %1331 = vmatpush1.msra.mxu1 %v3286_v36 }
 0x27f   :  { %1261 = vmatprep.subr.mxu0 %v3288_v37  ;;  %1332 = vmatprep.subr.mxu1 %v3292_v39 }
 0x280   :  { %1262 = vmatpush1.msra.mxu0 %v3294_v40  ;;  %1333 = vmatpush1.msra.mxu1 %v3296_v41 }
 0x281   :  { %1263 = vmatprep.subr.mxu0 %v3300_v42  ;;  %1334 = vmatprep.subr.mxu1 %v3302_v43 }
 0x282   :  { %1264 = vmatpush1.msra.mxu0 %v3306_v44  ;;  %1335 = vmatpush1.msra.mxu1 %v3308_v45 }
 0x283   :  { %1265 = vmatprep.subr.mxu0 %v3312_v46  ;;  %1336 = vmatprep.subr.mxu1 %v3314_v48 }
 0x284   :  { %1266 = vmatpush1.msra.mxu0 %v3318_v49  ;;  %1337 = vmatpush1.msra.mxu1 %v3320_v50  ;;  %v3787_v50 = vld [vmem:[#allocation49_spill] sm:$0xff] }
 0x285   :  { %1267 = vmatprep.subr.mxu0 %v3324_v51  ;;  %1338 = vmatprep.subr.mxu1 %v3326_v47  ;;  %v3356_v51 = vld [vmem:[#allocation11 + $0x10] sm:$0xff] }
 0x286   :  { %1268 = vmatpush1.msra.mxu0 %v3330_v52  ;;  %1339 = vmatpush1.msra.mxu1 %v3332_v62  ;;  %3785 = vst [vmem:[#allocation43_spill] sm:$0xff] %v3356_v51 }
 0x287   :  { %1269 = vmatprep.subr.mxu0 %v3336_v11  ;;  %1340 = vmatprep.subr.mxu1 %v3338_v0  ;;  %v3786_v11 = vld [vmem:[#allocation47_spill] sm:$0xff] }
 0x288   :  { %1270 = vmatpush1.msra.mxu0 %v3342_v60  ;;  %1341 = vmatpush1.msra.mxu1 %v3344_v58 }
 0x289   :  { %1271 = vmatprep.subr.mxu0 %v3348_v53  ;;  %1342 = vmatprep.subr.mxu1 %v3350_v4  ;;  %v3788_v53 = vld [vmem:[#allocation48_spill] sm:$0xff] }
 0x28a   :  { %1272 = vmatpush1.msra.mxu0 %v3354_v26  ;;  %1343 = vmatpush1.msra.mxu1 %v3356_v51  ;;  %v3789_v51 = vld [vmem:[#allocation50_spill] sm:$0xff] }
 0x28b   :  { %1481 = vmatprep.subr.mxu0 %v3172_v56  ;;  %1552 = vmatprep.subr.mxu1 %v3174_v59 }
 0x32a   :  { %v1067_v0 = vpop.f32.mrf.mxu0  ;;  %v1138_v52 = vpop.f32.mrf.mxu1 }
 0x32b   :  { %v1143_v62 = vadd.f32 %v1067_v0, %v3786_v11  ;;  %v1145_v49 = vadd.f32 %v1138_v52, %v3788_v53  ;;  %v3800_v53 = vld [vmem:[#allocation35_spill] sm:$0xff] }
 0x32c   :  { %v1069_v47 = vpop.f32.mrf.mxu0  ;;  %v1140_v26 = vpop.f32.mrf.mxu1 }
 0x32d   :  { %v1152_v60 = vmul.f32 0.5, %v1143_v62  ;;  %v1144_v58 = vadd.f32 %v1069_v47, %v3787_v50  ;;  %v1146_v48 = vadd.f32 %v1140_v26, %v3789_v51  ;;  %v3797_v51 = vld [vmem:[#allocation32_spill] sm:$0xff] }
 0x32f   :  { %2443 = vtanh.f32 %v1152_v60  ;;  %v1157_v4 = vmul.f32 0.5, %v1144_v58  ;;  %v1164_v56 = vmul.f32 0.5, %v1146_v48  ;;  %v3798_v60 = vld [vmem:[#allocation33_spill] sm:$0xff]  ;;  %v3799_v58 = vld [vmem:[#allocation34_spill] sm:$0xff] }
 0x331   :  { %2445 = vtanh.f32 %v1157_v4 }
 0x332   :  { %2447 = vtanh.f32 %v1145_v49 }
 0x333   :  { %2449 = vtanh.f32 %v1164_v56  ;;  %v3791_v56 = vld [vmem:[#allocation26_spill] sm:$0xff] }
 0x33c   :  { %v2444_v46 = vpop.eup %2443 }
 0x33d   :  { %v1154_v59 = vmul.f32 0.5, %v2444_v46  ;;  %v3796_v46 = vld [vmem:[#allocation31_spill] sm:$0xff] }
 0x33e   :  { %v2446_v45 = vpop.eup %2445 }
 0x33f   :  { %v1155_v44 = vadd.f32 0.5, %v1154_v59  ;;  %v1159_v11 = vmul.f32 0.5, %v2446_v45  ;;  %v2448_v0 = vpop.eup %2447  ;;  %v3792_v59 = vld [vmem:[#allocation27_spill] sm:$0xff]  ;;  %v3795_v45 = vld [vmem:[#allocation30_spill] sm:$0xff] }
 0x340   :  { %v2450_v4 = vpop.eup %2449 }
 0x341   :  { %v1160_v62 = vadd.f32 0.5, %v1159_v11  ;;  %v1169_v43 = vmul.f32 %v2448_v0, %v1155_v44  ;;  %v1166_v49 = vmul.f32 0.5, %v2450_v4  ;;  %v3794_v44 = vld [vmem:[#allocation29_spill] sm:$0xff]  ;;  %v3801_v11 = vld [vmem:[#allocation36_spill] sm:$0xff] }
 0x342   :  { %v3802_v0 = vld [vmem:[#allocation37_spill] sm:$0xff]  ;;  %v3805_v4 = vld [vmem:[#allocation40_spill] sm:$0xff] }
 0x343   :  { %v1168_v50 = vmul.f32 %v1160_v62, %v3167_v63  ;;  %v1167_v52 = vadd.f32 0.5, %v1166_v49  ;;  %v3790_v63 = vld [vmem:[#allocation25_spill] sm:$0xff]  ;;  %v3803_v62 = vld [vmem:[#allocation38_spill] sm:$0xff] }
 0x344   :  { %v3806_v49 = vld [vmem:[#allocation41_spill] sm:$0xff] }
 0x345   :  { %v3371_v47 = vadd.f32 %v1169_v43, %v1168_v50  ;;  %v3793_v43 = vld [vmem:[#allocation28_spill] sm:$0xff]  ;;  %v3804_v50 = vld [vmem:[#allocation39_spill] sm:$0xff] }
 0x347   :  { %2451 = vtanh.f32 %v3371_v47 }
 0x354   :  { %v2452_v26 = vpop.eup %2451 }
 0x355   :  { %v1172_v48 = vmul.f32 %v2452_v26, %v1167_v52  ;;  %v3807_v52 = vld [vmem:[#allocation42_spill] sm:$0xff]  ;;  %v3808_v26 = vmov 0.0  }
 0x357   :  { %1306 = vmatmul.mubr.f32.vlgmr.msra.gmra.mxu0 %v1172_v48  ;;  %1377 = vmatmul.mubr.f32.vlgmr.msra.gmra.mxu1 %v1172_v48  ;;  %v3809_v48 = vld [vmem:[#allocation43_spill] sm:$0xff] }
 0x358   :  { %1482 = vmatpush1.msra.mxu0 %v3178_v61  ;;  %1553 = vmatpush1.msra.mxu1 %v3180_v38 }
 0x359   :  { %1483 = vmatprep.subr.mxu0 %v3184_v3  ;;  %1554 = vmatprep.subr.mxu1 %v3186_v1 }
 0x35a   :  { %1484 = vmatpush1.msra.mxu0 %v3190_v57  ;;  %1555 = vmatpush1.msra.mxu1 %v3192_v54 }
 0x35b   :  { %1485 = vmatprep.subr.mxu0 %v3196_v2  ;;  %1556 = vmatprep.subr.mxu1 %v3198_v20 }
 0x35c   :  { %1486 = vmatpush1.msra.mxu0 %v3202_v55  ;;  %1557 = vmatpush1.msra.mxu1 %v3204_v29 }
 0x35d   :  { %1487 = vmatprep.subr.mxu0 %v3208_v5  ;;  %1558 = vmatprep.subr.mxu1 %v3210_v6 }
 0x35e   :  { %1488 = vmatpush1.msra.mxu0 %v3214_v7  ;;  %1559 = vmatpush1.msra.mxu1 %v3216_v8 }
 0x35f   :  { %1489 = vmatprep.subr.mxu0 %v3220_v9  ;;  %1560 = vmatprep.subr.mxu1 %v3222_v10 }
 0x360   :  { %1490 = vmatpush1.msra.mxu0 %v3226_v12  ;;  %1561 = vmatpush1.msra.mxu1 %v3228_v13 }
 0x361   :  { %1491 = vmatprep.subr.mxu0 %v3232_v14  ;;  %1562 = vmatprep.subr.mxu1 %v3234_v15 }
 0x362   :  { %1492 = vmatpush1.msra.mxu0 %v3238_v16  ;;  %1563 = vmatpush1.msra.mxu1 %v3240_v17 }
 0x363   :  { %1493 = vmatprep.subr.mxu0 %v3244_v18  ;;  %1564 = vmatprep.subr.mxu1 %v3246_v19 }
 0x364   :  { %1494 = vmatpush1.msra.mxu0 %v3250_v21  ;;  %1565 = vmatpush1.msra.mxu1 %v3252_v22 }
 0x365   :  { %1495 = vmatprep.subr.mxu0 %v3256_v23  ;;  %1566 = vmatprep.subr.mxu1 %v3258_v24 }
 0x366   :  { %1496 = vmatpush1.msra.mxu0 %v3262_v25  ;;  %1567 = vmatpush1.msra.mxu1 %v3264_v27 }
 0x367   :  { %1497 = vmatprep.subr.mxu0 %v3268_v28  ;;  %1568 = vmatprep.subr.mxu1 %v3270_v30 }
 0x368   :  { %1498 = vmatpush1.msra.mxu0 %v3272_v31  ;;  %1569 = vmatpush1.msra.mxu1 %v3276_v32 }
 0x369   :  { %1499 = vmatprep.subr.mxu0 %v3278_v33  ;;  %1570 = vmatprep.subr.mxu1 %v3280_v34 }
 0x36a   :  { %1500 = vmatpush1.msra.mxu0 %v3284_v35  ;;  %1571 = vmatpush1.msra.mxu1 %v3286_v36 }
 0x36b   :  { %1501 = vmatprep.subr.mxu0 %v3288_v37  ;;  %1572 = vmatprep.subr.mxu1 %v3292_v39 }
 0x36c   :  { %1502 = vmatpush1.msra.mxu0 %v3294_v40  ;;  %1573 = vmatpush1.msra.mxu1 %v3296_v41 }
 0x36d   :  { %1503 = vmatprep.subr.mxu0 %v3300_v42  ;;  %1574 = vmatprep.subr.mxu1 %v3790_v63 }
 0x36e   :  { %1504 = vmatpush1.msra.mxu0 %v3791_v56  ;;  %1575 = vmatpush1.msra.mxu1 %v3792_v59 }
 0x36f   :  { %1505 = vmatprep.subr.mxu0 %v3793_v43  ;;  %1576 = vmatprep.subr.mxu1 %v3794_v44 }
 0x370   :  { %1506 = vmatpush1.msra.mxu0 %v3795_v45  ;;  %1577 = vmatpush1.msra.mxu1 %v3796_v46 }
 0x371   :  { %1507 = vmatprep.subr.mxu0 %v3797_v51  ;;  %1578 = vmatprep.subr.mxu1 %v3798_v60  ;;  %v3813_v51 = vld [vmem:[#allocation53_spill] sm:$0xff] }
 0x372   :  { %1508 = vmatpush1.msra.mxu0 %v3799_v58  ;;  %1579 = vmatpush1.msra.mxu1 %v3800_v53  ;;  %v3810_v53 = vld [vmem:[#allocation23_spill] sm:$0xff] }
 0x373   :  { %1509 = vmatprep.subr.mxu0 %v3801_v11  ;;  %1580 = vmatprep.subr.mxu1 %v3802_v0  ;;  %v3811_v11 = vld [vmem:[#allocation24_spill] sm:$0xff] }
 0x374   :  { %1510 = vmatpush1.msra.mxu0 %v3803_v62  ;;  %1581 = vmatpush1.msra.mxu1 %v3804_v50  ;;  %v3812_v62 = vld [vmem:[#allocation51_spill] sm:$0xff] }
 0x375   :  { %1511 = vmatprep.subr.mxu0 %v3805_v4  ;;  %1582 = vmatprep.subr.mxu1 %v3806_v49 }
 0x376   :  { %1512 = vmatpush1.msra.mxu0 %v3807_v52  ;;  %1545 = vmatprep.mubr.f32.mxu0 %v3808_v26  ;;  %v3814_v52 = vld [vmem:[#allocation52_spill] sm:$0xff] }
 0x377   :  { %1583 = vmatpush1.msra.mxu1 %v3809_v48  ;;  %1616 = vmatprep.mubr.f32.mxu1 %v3808_v26  ;;  %v3815_v26 = vld [vmem:[#allocation54_spill] sm:$0xff] }
 0x378   :  { %1721 = vmatprep.subr.mxu0 %v3810_v53  ;;  %1792 = vmatprep.subr.mxu1 %v3811_v11 }
 0x417   :  { %v1307_v0 = vpop.f32.mrf.mxu0  ;;  %v1378_v50 = vpop.f32.mrf.mxu1 }
 0x418   :  { %v1383_v58 = vadd.f32 %v1307_v0, %v3812_v62  ;;  %v1385_v46 = vadd.f32 %v1378_v50, %v3814_v52  ;;  %v3824_v52 = vld [vmem:[#allocation33_spill] sm:$0xff] }
 0x419   :  { %v1309_v60 = vpop.f32.mrf.mxu0  ;;  %v1380_v48 = vpop.f32.mrf.mxu1 }
 0x41a   :  { %v1392_v4 = vmul.f32 0.5, %v1383_v58  ;;  %v1384_v49 = vadd.f32 %v1309_v60, %v3813_v51  ;;  %v1386_v44 = vadd.f32 %v1380_v48, %v3815_v26  ;;  %v3825_v26 = vld [vmem:[#allocation34_spill] sm:$0xff]  ;;  %v3826_v48 = vld [vmem:[#allocation35_spill] sm:$0xff] }
 0x41c   :  { %2453 = vtanh.f32 %v1392_v4  ;;  %v1397_v45 = vmul.f32 0.5, %v1384_v49  ;;  %v1404_v53 = vmul.f32 0.5, %v1386_v44  ;;  %v3823_v49 = vld [vmem:[#allocation32_spill] sm:$0xff] }
 0x41e   :  { %2455 = vtanh.f32 %v1397_v45 }
 0x41f   :  { %2457 = vtanh.f32 %v1385_v46 }
 0x420   :  { %2459 = vtanh.f32 %v1404_v53  ;;  %v3821_v53 = vld [vmem:[#allocation30_spill] sm:$0xff] }
 0x429   :  { %v2454_v43 = vpop.eup %2453 }
 0x42a   :  { %v1394_v11 = vmul.f32 0.5, %v2454_v43  ;;  %v3820_v43 = vld [vmem:[#allocation29_spill] sm:$0xff] }
 0x42b   :  { %v2456_v59 = vpop.eup %2455 }
 0x42c   :  { %v1395_v56 = vadd.f32 0.5, %v1394_v11  ;;  %v1399_v0 = vmul.f32 0.5, %v2456_v59  ;;  %v2458_v62 = vpop.eup %2457  ;;  %v3819_v59 = vld [vmem:[#allocation28_spill] sm:$0xff]  ;;  %v3822_v11 = vld [vmem:[#allocation31_spill] sm:$0xff] }
 0x42d   :  { %v2460_v45 = vpop.eup %2459 }
 0x42e   :  { %v1400_v58 = vadd.f32 0.5, %v1399_v0  ;;  %v1409_v63 = vmul.f32 %v2458_v62, %v1395_v56  ;;  %v1406_v46 = vmul.f32 0.5, %v2460_v45  ;;  %v3818_v56 = vld [vmem:[#allocation27_spill] sm:$0xff]  ;;  %v3827_v0 = vld [vmem:[#allocation36_spill] sm:$0xff]  ;;  %v3828_v62 = vld [vmem:[#allocation37_spill] sm:$0xff] }
 0x42f   :  { %v3831_v45 = vld [vmem:[#allocation40_spill] sm:$0xff] }
 0x430   :  { %v1408_v51 = vmul.f32 %v1400_v58, %v3371_v47  ;;  %v1407_v50 = vadd.f32 0.5, %v1406_v46  ;;  %v3816_v47 = vld [vmem:[#allocation25_spill] sm:$0xff]  ;;  %v3829_v58 = vld [vmem:[#allocation38_spill] sm:$0xff] }
 0x431   :  { %v3832_v46 = vld [vmem:[#allocation41_spill] sm:$0xff] }
 0x432   :  { %v3445_v60 = vadd.f32 %v1409_v63, %v1408_v51  ;;  %v3817_v63 = vld [vmem:[#allocation26_spill] sm:$0xff]  ;;  %v3830_v51 = vld [vmem:[#allocation39_spill] sm:$0xff] }
 0x434   :  { %2461 = vtanh.f32 %v3445_v60 }
 0x441   :  { %v2462_v4 = vpop.eup %2461 }
 0x442   :  { %v1412_v44 = vmul.f32 %v2462_v4, %v1407_v50  ;;  %v3833_v50 = vld [vmem:[#allocation42_spill] sm:$0xff]  ;;  %v3834_v4 = vmov 0.0  }
 0x444   :  { %1546 = vmatmul.mubr.f32.vlgmr.msra.gmra.mxu0 %v1412_v44  ;;  %1617 = vmatmul.mubr.f32.vlgmr.msra.gmra.mxu1 %v1412_v44  ;;  %v3835_v44 = vld [vmem:[#allocation43_spill] sm:$0xff] }
 0x445   :  { %1722 = vmatpush1.msra.mxu0 %v3178_v61  ;;  %1793 = vmatpush1.msra.mxu1 %v3180_v38 }
 0x446   :  { %1723 = vmatprep.subr.mxu0 %v3184_v3  ;;  %1794 = vmatprep.subr.mxu1 %v3186_v1 }
 0x447   :  { %1724 = vmatpush1.msra.mxu0 %v3190_v57  ;;  %1795 = vmatpush1.msra.mxu1 %v3192_v54 }
 0x448   :  { %1725 = vmatprep.subr.mxu0 %v3196_v2  ;;  %1796 = vmatprep.subr.mxu1 %v3198_v20 }
 0x449   :  { %1726 = vmatpush1.msra.mxu0 %v3202_v55  ;;  %1797 = vmatpush1.msra.mxu1 %v3204_v29 }
 0x44a   :  { %1727 = vmatprep.subr.mxu0 %v3208_v5  ;;  %1798 = vmatprep.subr.mxu1 %v3210_v6 }
 0x44b   :  { %1728 = vmatpush1.msra.mxu0 %v3214_v7  ;;  %1799 = vmatpush1.msra.mxu1 %v3216_v8 }
 0x44c   :  { %1729 = vmatprep.subr.mxu0 %v3220_v9  ;;  %1800 = vmatprep.subr.mxu1 %v3222_v10 }
 0x44d   :  { %1730 = vmatpush1.msra.mxu0 %v3226_v12  ;;  %1801 = vmatpush1.msra.mxu1 %v3228_v13 }
 0x44e   :  { %1731 = vmatprep.subr.mxu0 %v3232_v14  ;;  %1802 = vmatprep.subr.mxu1 %v3234_v15 }
 0x44f   :  { %1732 = vmatpush1.msra.mxu0 %v3238_v16  ;;  %1803 = vmatpush1.msra.mxu1 %v3240_v17 }
 0x450   :  { %1733 = vmatprep.subr.mxu0 %v3244_v18  ;;  %1804 = vmatprep.subr.mxu1 %v3246_v19 }
 0x451   :  { %1734 = vmatpush1.msra.mxu0 %v3250_v21  ;;  %1805 = vmatpush1.msra.mxu1 %v3252_v22 }
 0x452   :  { %1735 = vmatprep.subr.mxu0 %v3256_v23  ;;  %1806 = vmatprep.subr.mxu1 %v3258_v24 }
 0x453   :  { %1736 = vmatpush1.msra.mxu0 %v3262_v25  ;;  %1807 = vmatpush1.msra.mxu1 %v3264_v27 }
 0x454   :  { %1737 = vmatprep.subr.mxu0 %v3268_v28  ;;  %1808 = vmatprep.subr.mxu1 %v3270_v30 }
 0x455   :  { %1738 = vmatpush1.msra.mxu0 %v3272_v31  ;;  %1809 = vmatpush1.msra.mxu1 %v3276_v32 }
 0x456   :  { %1739 = vmatprep.subr.mxu0 %v3278_v33  ;;  %1810 = vmatprep.subr.mxu1 %v3280_v34 }
 0x457   :  { %1740 = vmatpush1.msra.mxu0 %v3284_v35  ;;  %1811 = vmatpush1.msra.mxu1 %v3286_v36 }
 0x458   :  { %1741 = vmatprep.subr.mxu0 %v3288_v37  ;;  %1812 = vmatprep.subr.mxu1 %v3292_v39 }
 0x459   :  { %1742 = vmatpush1.msra.mxu0 %v3294_v40  ;;  %1813 = vmatpush1.msra.mxu1 %v3296_v41 }
 0x45a   :  { %1743 = vmatprep.subr.mxu0 %v3300_v42  ;;  %1814 = vmatprep.subr.mxu1 %v3816_v47 }
 0x45b   :  { %1744 = vmatpush1.msra.mxu0 %v3817_v63  ;;  %1815 = vmatpush1.msra.mxu1 %v3818_v56 }
 0x45c   :  { %1745 = vmatprep.subr.mxu0 %v3819_v59  ;;  %1816 = vmatprep.subr.mxu1 %v3820_v43 }
 0x45d   :  { %1746 = vmatpush1.msra.mxu0 %v3821_v53  ;;  %1817 = vmatpush1.msra.mxu1 %v3822_v11 }
 0x45e   :  { %1747 = vmatprep.subr.mxu0 %v3823_v49  ;;  %1818 = vmatprep.subr.mxu1 %v3824_v52  ;;  %v3839_v49 = vld [vmem:[#allocation57_spill] sm:$0xff] }
 0x45f   :  { %1748 = vmatpush1.msra.mxu0 %v3825_v26  ;;  %1819 = vmatpush1.msra.mxu1 %v3826_v48  ;;  %v3836_v48 = vld [vmem:[#allocation23_spill] sm:$0xff] }
 0x460   :  { %1749 = vmatprep.subr.mxu0 %v3827_v0  ;;  %1820 = vmatprep.subr.mxu1 %v3828_v62  ;;  %v3837_v0 = vld [vmem:[#allocation24_spill] sm:$0xff] }
 0x461   :  { %1750 = vmatpush1.msra.mxu0 %v3829_v58  ;;  %1821 = vmatpush1.msra.mxu1 %v3830_v51  ;;  %v3838_v58 = vld [vmem:[#allocation55_spill] sm:$0xff] }
 0x462   :  { %1751 = vmatprep.subr.mxu0 %v3831_v45  ;;  %1822 = vmatprep.subr.mxu1 %v3832_v46 }
 0x463   :  { %1752 = vmatpush1.msra.mxu0 %v3833_v50  ;;  %1785 = vmatprep.mubr.f32.mxu0 %v3834_v4  ;;  %v3840_v50 = vld [vmem:[#allocation56_spill] sm:$0xff] }
 0x464   :  { %1823 = vmatpush1.msra.mxu1 %v3835_v44  ;;  %1856 = vmatprep.mubr.f32.mxu1 %v3834_v4  ;;  %v3841_v4 = vld [vmem:[#allocation58_spill] sm:$0xff] }
 0x465   :  { %1961 = vmatprep.subr.mxu0 %v3836_v48  ;;  %2032 = vmatprep.subr.mxu1 %v3837_v0 }
 0x504   :  { %v1547_v62 = vpop.f32.mrf.mxu0  ;;  %v1618_v51 = vpop.f32.mrf.mxu1 }
 0x505   :  { %v1623_v26 = vadd.f32 %v1547_v62, %v3838_v58  ;;  %v1625_v11 = vadd.f32 %v1618_v51, %v3840_v50 }
 0x506   :  { %v1549_v52 = vpop.f32.mrf.mxu0  ;;  %v1620_v44 = vpop.f32.mrf.mxu1 }
 0x507   :  { %v1632_v45 = vmul.f32 0.5, %v1623_v26  ;;  %v1624_v46 = vadd.f32 %v1549_v52, %v3839_v49  ;;  %v1626_v43 = vadd.f32 %v1620_v44, %v3841_v4  ;;  %v2198_v4 = vld [vmem:[#allocation11 + $0x1e8] sm:$0xff]  ;;  %v2200_v44 = vld [vmem:[#allocation11 + $0x1f8] sm:$0xff] }
 0x509   :  { %2463 = vtanh.f32 %v1632_v45  ;;  %v1637_v53 = vmul.f32 0.5, %v1624_v46  ;;  %v1644_v48 = vmul.f32 0.5, %v1626_v43 }
 0x50b   :  { %2465 = vtanh.f32 %v1637_v53 }
 0x50c   :  { %2467 = vtanh.f32 %v1625_v11 }
 0x50d   :  { %2469 = vtanh.f32 %v1644_v48  ;;  %v2197_v48 = vld [vmem:[#allocation11 + $0x1e0] sm:$0xff] }
 0x516   :  { %v2464_v59 = vpop.eup %2463 }
 0x517   :  { %v1634_v0 = vmul.f32 0.5, %v2464_v59 }
 0x518   :  { %v2466_v56 = vpop.eup %2465 }
 0x519   :  { %v1635_v63 = vadd.f32 0.5, %v1634_v0  ;;  %v1639_v62 = vmul.f32 0.5, %v2466_v56  ;;  %v2468_v58 = vpop.eup %2467  ;;  %v2199_v0 = vld [vmem:[#allocation11 + $0x1f0] sm:$0xff] }
 0x51a   :  { %v2470_v53 = vpop.eup %2469 }
 0x51b   :  { %v1640_v26 = vadd.f32 0.5, %v1639_v62  ;;  %v1649_v47 = vmul.f32 %v2468_v58, %v1635_v63  ;;  %v1646_v11 = vmul.f32 0.5, %v2470_v53  ;;  %v2194_v62 = vld [vmem:[#allocation11 + $0x1c8] sm:$0xff]  ;;  %v2196_v58 = vld [vmem:[#allocation11 + $0x1d8] sm:$0xff] }
 0x51c   :  { %v2192_v53 = vld [vmem:[#allocation11 + $0x1b8] sm:$0xff] }
 0x51d   :  { %v1648_v49 = vmul.f32 %v1640_v26, %v3445_v60  ;;  %v1647_v51 = vadd.f32 0.5, %v1646_v11  ;;  %v2193_v26 = vld [vmem:[#allocation11 + $0x1c0] sm:$0xff] }
 0x51e   :  { %v2189_v11 = vld [vmem:[#allocation11 + $0x1a0] sm:$0xff] }
 0x51f   :  { %v3519_v52 = vadd.f32 %v1649_v47, %v1648_v49  ;;  %v2195_v49 = vld [vmem:[#allocation11 + $0x1d0] sm:$0xff] }
 0x521   :  { %2471 = vtanh.f32 %v3519_v52 }
 0x52e   :  { %v2472_v45 = vpop.eup %2471 }
 0x52f   :  { %v1652_v43 = vmul.f32 %v2472_v45, %v1647_v51  ;;  %v2191_v51 = vld [vmem:[#allocation11 + $0x1b0] sm:$0xff]  ;;  %v2186_v45 = vld [vmem:[#allocation11 + $0x188] sm:$0xff] }
 0x531   :  { %1786 = vmatmul.mubr.f32.vlgmr.msra.gmra.mxu0 %v1652_v43  ;;  %1857 = vmatmul.mubr.f32.vlgmr.msra.gmra.mxu1 %v1652_v43  ;;  %v2188_v43 = vld [vmem:[#allocation11 + $0x198] sm:$0xff] }
 0x532   :  { %1962 = vmatpush1.msra.mxu0 %v3178_v61  ;;  %2033 = vmatpush1.msra.mxu1 %v3180_v38  ;;  %v3842_v61 = vld [vmem:[#allocation25_spill] sm:$0xff]  ;;  %v3843_v38 = vld [vmem:[#allocation26_spill] sm:$0xff] }
 0x533   :  { %1963 = vmatprep.subr.mxu0 %v3184_v3  ;;  %2034 = vmatprep.subr.mxu1 %v3186_v1  ;;  %v3844_v3 = vld [vmem:[#allocation27_spill] sm:$0xff]  ;;  %v3845_v1 = vld [vmem:[#allocation28_spill] sm:$0xff] }
 0x534   :  { %1964 = vmatpush1.msra.mxu0 %v3190_v57  ;;  %2035 = vmatpush1.msra.mxu1 %v3192_v54  ;;  %v3846_v57 = vld [vmem:[#allocation29_spill] sm:$0xff]  ;;  %v3847_v54 = vld [vmem:[#allocation30_spill] sm:$0xff] }
 0x535   :  { %1965 = vmatprep.subr.mxu0 %v3196_v2  ;;  %2036 = vmatprep.subr.mxu1 %v3198_v20  ;;  %v3848_v2 = vld [vmem:[#allocation31_spill] sm:$0xff]  ;;  %v3849_v20 = vld [vmem:[#allocation32_spill] sm:$0xff] }
 0x536   :  { %1966 = vmatpush1.msra.mxu0 %v3202_v55  ;;  %2037 = vmatpush1.msra.mxu1 %v3204_v29  ;;  %v3850_v55 = vld [vmem:[#allocation33_spill] sm:$0xff]  ;;  %v3851_v29 = vld [vmem:[#allocation34_spill] sm:$0xff] }
 0x537   :  { %1967 = vmatprep.subr.mxu0 %v3208_v5  ;;  %2038 = vmatprep.subr.mxu1 %v3210_v6  ;;  %v3852_v5 = vld [vmem:[#allocation35_spill] sm:$0xff]  ;;  %v3853_v6 = vld [vmem:[#allocation36_spill] sm:$0xff] }
 0x538   :  { %1968 = vmatpush1.msra.mxu0 %v3214_v7  ;;  %2039 = vmatpush1.msra.mxu1 %v3216_v8  ;;  %v3854_v7 = vld [vmem:[#allocation37_spill] sm:$0xff]  ;;  %v3855_v8 = vld [vmem:[#allocation38_spill] sm:$0xff] }
 0x539   :  { %1969 = vmatprep.subr.mxu0 %v3220_v9  ;;  %2040 = vmatprep.subr.mxu1 %v3222_v10  ;;  %v3856_v9 = vld [vmem:[#allocation39_spill] sm:$0xff]  ;;  %v3857_v10 = vld [vmem:[#allocation40_spill] sm:$0xff] }
 0x53a   :  { %1970 = vmatpush1.msra.mxu0 %v3226_v12  ;;  %2041 = vmatpush1.msra.mxu1 %v3228_v13  ;;  %v3858_v12 = vld [vmem:[#allocation41_spill] sm:$0xff]  ;;  %v3859_v13 = vld [vmem:[#allocation42_spill] sm:$0xff] }
 0x53b   :  { %1971 = vmatprep.subr.mxu0 %v3232_v14  ;;  %2042 = vmatprep.subr.mxu1 %v3234_v15  ;;  %v3860_v14 = vmov 0.0   ;;  %v3861_v15 = vld [vmem:[#allocation43_spill] sm:$0xff] }
 0x53c   :  { %1972 = vmatpush1.msra.mxu0 %v3238_v16  ;;  %2043 = vmatpush1.msra.mxu1 %v3240_v17  ;;  %v3862_v17 = vld [vmem:[#allocation59_spill] sm:$0xff] }
 0x53d   :  { %1973 = vmatprep.subr.mxu0 %v3244_v18  ;;  %2044 = vmatprep.subr.mxu1 %v3246_v19 }
 0x53e   :  { %1974 = vmatpush1.msra.mxu0 %v3250_v21  ;;  %2045 = vmatpush1.msra.mxu1 %v3252_v22 }
 0x53f   :  { %1975 = vmatprep.subr.mxu0 %v3256_v23  ;;  %2046 = vmatprep.subr.mxu1 %v3258_v24  ;;  %v3863_v23 = vld [vmem:[#allocation61_spill] sm:$0xff] }
 0x540   :  { %1976 = vmatpush1.msra.mxu0 %v3262_v25  ;;  %2047 = vmatpush1.msra.mxu1 %v3264_v27  ;;  %v3864_v25 = vld [vmem:[#allocation60_spill] sm:$0xff] }
 0x541   :  { %1977 = vmatprep.subr.mxu0 %v3268_v28  ;;  %2048 = vmatprep.subr.mxu1 %v3270_v30 }
 0x542   :  { %1978 = vmatpush1.msra.mxu0 %v3272_v31  ;;  %2049 = vmatpush1.msra.mxu1 %v3276_v32  ;;  %v3865_v31 = vld [vmem:[#allocation62_spill] sm:$0xff] }
 0x543   :  { %1979 = vmatprep.subr.mxu0 %v3278_v33  ;;  %2050 = vmatprep.subr.mxu1 %v3280_v34 }
 0x544   :  { %1980 = vmatpush1.msra.mxu0 %v3284_v35  ;;  %2051 = vmatpush1.msra.mxu1 %v3286_v36 }
 0x545   :  { %1981 = vmatprep.subr.mxu0 %v3288_v37  ;;  %2052 = vmatprep.subr.mxu1 %v3292_v39 }
 0x546   :  { %1982 = vmatpush1.msra.mxu0 %v3294_v40  ;;  %2053 = vmatpush1.msra.mxu1 %v3296_v41 }
 0x547   :  { %1983 = vmatprep.subr.mxu0 %v3300_v42  ;;  %2054 = vmatprep.subr.mxu1 %v3842_v61  ;;  %v2185_v61 = vld [vmem:[#allocation11 + $0x180] sm:$0xff] }
 0x548   :  { %1984 = vmatpush1.msra.mxu0 %v3843_v38  ;;  %2055 = vmatpush1.msra.mxu1 %v3844_v3  ;;  %v2187_v38 = vld [vmem:[#allocation11 + $0x190] sm:$0xff]  ;;  %v2182_v3 = vld [vmem:[#allocation11 + $0x168] sm:$0xff] }
 0x549   :  { %1985 = vmatprep.subr.mxu0 %v3845_v1  ;;  %2056 = vmatprep.subr.mxu1 %v3846_v57  ;;  %v2184_v1 = vld [vmem:[#allocation11 + $0x178] sm:$0xff]  ;;  %v2181_v57 = vld [vmem:[#allocation11 + $0x160] sm:$0xff] }
 0x54a   :  { %1986 = vmatpush1.msra.mxu0 %v3847_v54  ;;  %2057 = vmatpush1.msra.mxu1 %v3848_v2  ;;  %v2183_v54 = vld [vmem:[#allocation11 + $0x170] sm:$0xff]  ;;  %v2178_v2 = vld [vmem:[#allocation11 + $0x148] sm:$0xff] }
 0x54b   :  { %1987 = vmatprep.subr.mxu0 %v3849_v20  ;;  %2058 = vmatprep.subr.mxu1 %v3850_v55  ;;  %v2180_v20 = vld [vmem:[#allocation11 + $0x158] sm:$0xff]  ;;  %v2177_v55 = vld [vmem:[#allocation11 + $0x140] sm:$0xff] }
 0x54c   :  { %1988 = vmatpush1.msra.mxu0 %v3851_v29  ;;  %2059 = vmatpush1.msra.mxu1 %v3852_v5  ;;  %v2179_v29 = vld [vmem:[#allocation11 + $0x150] sm:$0xff]  ;;  %v2174_v5 = vld [vmem:[#allocation11 + $0x128] sm:$0xff] }
 0x54d   :  { %1989 = vmatprep.subr.mxu0 %v3853_v6  ;;  %2060 = vmatprep.subr.mxu1 %v3854_v7  ;;  %v2176_v6 = vld [vmem:[#allocation11 + $0x138] sm:$0xff]  ;;  %v2173_v7 = vld [vmem:[#allocation11 + $0x120] sm:$0xff] }
 0x54e   :  { %1990 = vmatpush1.msra.mxu0 %v3855_v8  ;;  %2061 = vmatpush1.msra.mxu1 %v3856_v9  ;;  %v2175_v8 = vld [vmem:[#allocation11 + $0x130] sm:$0xff]  ;;  %v2170_v9 = vld [vmem:[#allocation11 + $0x108] sm:$0xff] }
 0x54f   :  { %1991 = vmatprep.subr.mxu0 %v3857_v10  ;;  %2062 = vmatprep.subr.mxu1 %v3858_v12  ;;  %v2172_v10 = vld [vmem:[#allocation11 + $0x118] sm:$0xff]  ;;  %v2169_v12 = vld [vmem:[#allocation11 + $0x100] sm:$0xff] }
 0x550   :  { %1992 = vmatpush1.msra.mxu0 %v3859_v13  ;;  %2025 = vmatprep.mubr.f32.mxu0 %v3860_v14  ;;  %v2171_v13 = vld [vmem:[#allocation11 + $0x110] sm:$0xff] }
 0x551   :  { %2063 = vmatpush1.msra.mxu1 %v3861_v15  ;;  %2096 = vmatprep.mubr.f32.mxu1 %v3860_v14  ;;  %v2168_v15 = vld [vmem:[#allocation11 + $0xf8] sm:$0xff] }
 0x552   :  { %2201 = vmatprep.subr.mxu0 %v2198_v4  ;;  %2272 = vmatprep.subr.mxu1 %v2200_v44  ;;  %v2139_v4 = vld [vmem:[#allocation11 + $0x10] sm:$0xff] }
 0x5f1   :  { %v1787_v16 = vpop.f32.mrf.mxu0  ;;  %v1858_v19 = vpop.f32.mrf.mxu1 }
 0x5f2   :  { %v1863_v18 = vadd.f32 %v1787_v16, %v3862_v17  ;;  %v1865_v27 = vadd.f32 %v1858_v19, %v3864_v25  ;;  %v2165_v16 = vld [vmem:[#allocation11 + $0xe0] sm:$0xff]  ;;  %v2167_v17 = vld [vmem:[#allocation11 + $0xf0] sm:$0xff]  ;;  %v2164_v19 = vld [vmem:[#allocation11 + $0xd8] sm:$0xff] }
 0x5f3   :  { %v1789_v21 = vpop.f32.mrf.mxu0  ;;  %v1860_v30 = vpop.f32.mrf.mxu1  ;;  %v2157_v25 = vld [vmem:[#allocation11 + $0xa0] sm:$0xff] }
 0x5f4   :  { %v1872_v22 = vmul.f32 0.5, %v1863_v18  ;;  %v1864_v24 = vadd.f32 %v1789_v21, %v3863_v23  ;;  %v1866_v32 = vadd.f32 %v1860_v30, %v3865_v31  ;;  %v2162_v18 = vld [vmem:[#allocation11 + $0xc8] sm:$0xff]  ;;  %v2161_v21 = vld [vmem:[#allocation11 + $0xc0] sm:$0xff]  ;;  %v2156_v30 = vld [vmem:[#allocation11 + $0x98] sm:$0xff] }
 0x5f5   :  { %v2158_v23 = vld [vmem:[#allocation11 + $0xa8] sm:$0xff]  ;;  %v2153_v31 = vld [vmem:[#allocation11 + $0x80] sm:$0xff] }
 0x5f6   :  { %2473 = vtanh.f32 %v1872_v22  ;;  %v1877_v28 = vmul.f32 0.5, %v1864_v24  ;;  %v1884_v33 = vmul.f32 0.5, %v1866_v32  ;;  %v2163_v22 = vld [vmem:[#allocation11 + $0xd0] sm:$0xff]  ;;  %v2160_v24 = vld [vmem:[#allocation11 + $0xb8] sm:$0xff] }
 0x5f7   :  { %v2155_v32 = vld [vmem:[#allocation11 + $0x90] sm:$0xff] }
 0x5f8   :  { %2475 = vtanh.f32 %v1877_v28  ;;  %v2154_v28 = vld [vmem:[#allocation11 + $0x88] sm:$0xff] }
 0x5f9   :  { %2477 = vtanh.f32 %v1865_v27  ;;  %v2159_v27 = vld [vmem:[#allocation11 + $0xb0] sm:$0xff] }
 0x5fa   :  { %2479 = vtanh.f32 %v1884_v33  ;;  %v2150_v33 = vld [vmem:[#allocation11 + $0x68] sm:$0xff] }
 0x603   :  { %v2474_v34 = vpop.eup %2473 }
 0x604   :  { %v1874_v35 = vmul.f32 0.5, %v2474_v34  ;;  %v2152_v34 = vld [vmem:[#allocation11 + $0x78] sm:$0xff] }
 0x605   :  { %v2476_v36 = vpop.eup %2475 }
 0x606   :  { %v1875_v37 = vadd.f32 0.5, %v1874_v35  ;;  %v1879_v39 = vmul.f32 0.5, %v2476_v36  ;;  %v2478_v40 = vpop.eup %2477  ;;  %v2149_v35 = vld [vmem:[#allocation11 + $0x60] sm:$0xff]  ;;  %v2151_v36 = vld [vmem:[#allocation11 + $0x70] sm:$0xff] }
 0x607   :  { %v2480_v63 = vpop.eup %2479 }
 0x608   :  { %v1880_v41 = vadd.f32 0.5, %v1879_v39  ;;  %v1889_v42 = vmul.f32 %v2478_v40, %v1875_v37  ;;  %v1886_v56 = vmul.f32 0.5, %v2480_v63  ;;  %v2146_v37 = vld [vmem:[#allocation11 + $0x48] sm:$0xff]  ;;  %v2148_v39 = vld [vmem:[#allocation11 + $0x58] sm:$0xff]  ;;  %v2145_v40 = vld [vmem:[#allocation11 + $0x40] sm:$0xff] }
 0x609   :  { %v2141_v63 = vld [vmem:[#allocation11 + $0x20] sm:$0xff] }
 0x60a   :  { %v1888_v60 = vmul.f32 %v1880_v41, %v3519_v52  ;;  %v1887_v59 = vadd.f32 0.5, %v1886_v56  ;;  %v2190_v52 = vld [vmem:[#allocation11 + $0x1a8] sm:$0xff]  ;;  %v2147_v41 = vld [vmem:[#allocation11 + $0x50] sm:$0xff] }
 0x60b   :  { %v2143_v56 = vld [vmem:[#allocation11 + $0x30] sm:$0xff] }
 0x60c   :  { %v3591_v47 = vadd.f32 %v1889_v42, %v1888_v60  ;;  %v2142_v42 = vld [vmem:[#allocation11 + $0x28] sm:$0xff]  ;;  %v2144_v60 = vld [vmem:[#allocation11 + $0x38] sm:$0xff] }
 0x60e   :  { %2481 = vtanh.f32 %v3591_v47 }
 0x61b   :  { %v2482_v46 = vpop.eup %2481 }
 0x61c   :  { %v1892_v50 = vmul.f32 %v2482_v46, %v1887_v59  ;;  %v2138_v59 = vld [vmem:[#allocation11 + $0x8] sm:$0xff]  ;;  %v2140_v46 = vld [vmem:[#allocation11 + $0x18] sm:$0xff] }
 0x61e   :  { %2026 = vmatmul.mubr.f32.vlgmr.msra.gmra.mxu0 %v1892_v50  ;;  %2097 = vmatmul.mubr.f32.vlgmr.msra.gmra.mxu1 %v1892_v50  ;;  %v2137_v50 = vld [vmem:[#allocation11] sm:$0xff] }
 0x61f   :  { %2265 = vmatprep.mubr.f32.mxu0 %v3860_v14  ;;  %2336 = vmatprep.mubr.f32.mxu1 %v3860_v14  ;;  %v2166_v14 = vld [vmem:[#allocation11 + $0xe8] sm:$0xff] }
 0x620   :  { %2202 = vmatpush1.msra.mxu0 %v2197_v48  ;;  %2273 = vmatpush1.msra.mxu1 %v2199_v0  ;;  %v3866_v48 = vld [vmem:[#allocation63_spill] sm:$0xff] }
 0x621   :  { %2203 = vmatprep.subr.mxu0 %v2194_v62  ;;  %2274 = vmatprep.subr.mxu1 %v2196_v58 }
 0x622   :  { %2204 = vmatpush1.msra.mxu0 %v2193_v26  ;;  %2275 = vmatpush1.msra.mxu1 %v2195_v49  ;;  %v3867_v49 = vld [vmem:[#allocation65_spill] sm:$0xff] }
 0x623   :  { %2205 = vmatprep.subr.mxu0 %v2190_v52  ;;  %2276 = vmatprep.subr.mxu1 %v2192_v53  ;;  %v3868_v53 = vld [vmem:[#allocation64_spill] sm:$0xff] }
 0x624   :  { %2206 = vmatpush1.msra.mxu0 %v2189_v11  ;;  %2277 = vmatpush1.msra.mxu1 %v2191_v51 }
 0x625   :  { %2207 = vmatprep.subr.mxu0 %v2186_v45  ;;  %2278 = vmatprep.subr.mxu1 %v2188_v43  ;;  %v3869_v43 = vld [vmem:[#allocation66_spill] sm:$0xff] }
 0x626   :  { %2208 = vmatpush1.msra.mxu0 %v2185_v61  ;;  %2279 = vmatpush1.msra.mxu1 %v2187_v38 }
 0x627   :  { %2209 = vmatprep.subr.mxu0 %v2182_v3  ;;  %2280 = vmatprep.subr.mxu1 %v2184_v1 }
 0x628   :  { %2210 = vmatpush1.msra.mxu0 %v2181_v57  ;;  %2281 = vmatpush1.msra.mxu1 %v2183_v54 }
 0x629   :  { %2211 = vmatprep.subr.mxu0 %v2178_v2  ;;  %2282 = vmatprep.subr.mxu1 %v2180_v20 }
 0x62a   :  { %2212 = vmatpush1.msra.mxu0 %v2177_v55  ;;  %2283 = vmatpush1.msra.mxu1 %v2179_v29 }
 0x62b   :  { %2213 = vmatprep.subr.mxu0 %v2174_v5  ;;  %2284 = vmatprep.subr.mxu1 %v2176_v6 }
 0x62c   :  { %2214 = vmatpush1.msra.mxu0 %v2173_v7  ;;  %2285 = vmatpush1.msra.mxu1 %v2175_v8 }
 0x62d   :  { %2215 = vmatprep.subr.mxu0 %v2170_v9  ;;  %2286 = vmatprep.subr.mxu1 %v2172_v10 }
 0x62e   :  { %2216 = vmatpush1.msra.mxu0 %v2169_v12  ;;  %2287 = vmatpush1.msra.mxu1 %v2171_v13 }
 0x62f   :  { %2217 = vmatprep.subr.mxu0 %v2166_v14  ;;  %2288 = vmatprep.subr.mxu1 %v2168_v15  ;;  %v3870_v14 = vld [vmem:[#allocation67_spill] sm:$0xff] }
 0x630   :  { %2218 = vmatpush1.msra.mxu0 %v2165_v16  ;;  %2289 = vmatpush1.msra.mxu1 %v2167_v17 }
 0x631   :  { %2219 = vmatprep.subr.mxu0 %v2162_v18  ;;  %2290 = vmatprep.subr.mxu1 %v2164_v19  ;;  %v3871_v19 = vld [vmem:[#allocation69_spill] sm:$0xff] }
 0x632   :  { %2220 = vmatpush1.msra.mxu0 %v2161_v21  ;;  %2291 = vmatpush1.msra.mxu1 %v2163_v22  ;;  %v3872_v22 = vld [vmem:[#allocation68_spill] sm:$0xff] }
 0x633   :  { %2221 = vmatprep.subr.mxu0 %v2158_v23  ;;  %2292 = vmatprep.subr.mxu1 %v2160_v24 }
 0x634   :  { %2222 = vmatpush1.msra.mxu0 %v2157_v25  ;;  %2293 = vmatpush1.msra.mxu1 %v2159_v27  ;;  %v3873_v25 = vld [vmem:[#allocation70_spill] sm:$0xff] }
 0x635   :  { %2223 = vmatprep.subr.mxu0 %v2154_v28  ;;  %2294 = vmatprep.subr.mxu1 %v2156_v30 }
 0x636   :  { %2224 = vmatpush1.msra.mxu0 %v2153_v31  ;;  %2295 = vmatpush1.msra.mxu1 %v2155_v32 }
 0x637   :  { %2225 = vmatprep.subr.mxu0 %v2150_v33  ;;  %2296 = vmatprep.subr.mxu1 %v2152_v34 }
 0x638   :  { %2226 = vmatpush1.msra.mxu0 %v2149_v35  ;;  %2297 = vmatpush1.msra.mxu1 %v2151_v36 }
 0x639   :  { %2227 = vmatprep.subr.mxu0 %v2146_v37  ;;  %2298 = vmatprep.subr.mxu1 %v2148_v39 }
 0x63a   :  { %2228 = vmatpush1.msra.mxu0 %v2145_v40  ;;  %2299 = vmatpush1.msra.mxu1 %v2147_v41 }
 0x63b   :  { %2229 = vmatprep.subr.mxu0 %v2142_v42  ;;  %2300 = vmatprep.subr.mxu1 %v2144_v60 }
 0x63c   :  { %2230 = vmatpush1.msra.mxu0 %v2141_v63  ;;  %2301 = vmatpush1.msra.mxu1 %v2143_v56 }
 0x63d   :  { %2231 = vmatprep.subr.mxu0 %v2138_v59  ;;  %2302 = vmatprep.subr.mxu1 %v2140_v46 }
 0x63e   :  { %2232 = vmatpush1.msra.mxu0 %v2137_v50  ;;  %2303 = vmatpush1.msra.mxu1 %v2139_v4 }
 0x6de   :  { %v2027_v44 = vpop.f32.mrf.mxu0  ;;  %v2098_v62 = vpop.f32.mrf.mxu1 }
 0x6df   :  { %v2103_v0 = vadd.f32 %v2027_v44, %v3866_v48  ;;  %v2105_v11 = vadd.f32 %v2098_v62, %v3868_v53 }
 0x6e0   :  { %v2029_v58 = vpop.f32.mrf.mxu0  ;;  %v2100_v45 = vpop.f32.mrf.mxu1 }
 0x6e1   :  { %v2112_v26 = vmul.f32 0.5, %v2103_v0  ;;  %v2104_v52 = vadd.f32 %v2029_v58, %v3867_v49  ;;  %v2106_v61 = vadd.f32 %v2100_v45, %v3869_v43 }
 0x6e3   :  { %2483 = vtanh.f32 %v2112_v26  ;;  %v2117_v51 = vmul.f32 0.5, %v2104_v52  ;;  %v2124_v38 = vmul.f32 0.5, %v2106_v61 }
 0x6e5   :  { %2485 = vtanh.f32 %v2117_v51 }
 0x6e6   :  { %2487 = vtanh.f32 %v2105_v11 }
 0x6e7   :  { %2489 = vtanh.f32 %v2124_v38 }
 0x6f0   :  { %v2484_v3 = vpop.eup %2483 }
 0x6f1   :  { %v2114_v1 = vmul.f32 0.5, %v2484_v3 }
 0x6f2   :  { %v2486_v57 = vpop.eup %2485 }
 0x6f3   :  { %v2115_v54 = vadd.f32 0.5, %v2114_v1  ;;  %v2119_v2 = vmul.f32 0.5, %v2486_v57  ;;  %v2488_v20 = vpop.eup %2487 }
 0x6f4   :  { %v2490_v7 = vpop.eup %2489 }
 0x6f5   :  { %v2120_v55 = vadd.f32 0.5, %v2119_v2  ;;  %v2129_v29 = vmul.f32 %v2488_v20, %v2115_v54  ;;  %v2126_v8 = vmul.f32 0.5, %v2490_v7 }
 0x6f7   :  { %v2128_v5 = vmul.f32 %v2120_v55, %v3591_v47  ;;  %v2127_v9 = vadd.f32 0.5, %v2126_v8 }
 0x6f9   :  { %v2130_v6 = vadd.f32 %v2129_v29, %v2128_v5 }
 0x6fb   :  { %2491 = vtanh.f32 %v2130_v6 }
 0x708   :  { %v2492_v10 = vpop.eup %2491 }
 0x709   :  { %v2132_v12 = vmul.f32 %v2492_v10, %v2127_v9 }
 0x70b   :  { %2266 = vmatmul.mubr.f32.vlgmr.msra.gmra.mxu0 %v2132_v12  ;;  %2337 = vmatmul.mubr.f32.vlgmr.msra.gmra.mxu1 %v2132_v12 }
 0x7cb   :  { %v2267_v13 = vpop.f32.mrf.mxu0  ;;  %v2338_v16 = vpop.f32.mrf.mxu1 }
 0x7cc   :  { %v2343_v15 = vadd.f32 %v2267_v13, %v3870_v14  ;;  %v2345_v47 = vadd.f32 %v2338_v16, %v3872_v22 }
 0x7cd   :  { %v2269_v17 = vpop.f32.mrf.mxu0  ;;  %v2340_v24 = vpop.f32.mrf.mxu1 }
 0x7ce   :  { %v2352_v18 = vmul.f32 0.5, %v2343_v15  ;;  %v2344_v21 = vadd.f32 %v2269_v17, %v3871_v19  ;;  %v2346_v27 = vadd.f32 %v2340_v24, %v3873_v25 }
 0x7d0   :  { %2493 = vtanh.f32 %v2352_v18  ;;  %v2357_v23 = vmul.f32 0.5, %v2344_v21  ;;  %v2364_v28 = vmul.f32 0.5, %v2346_v27 }
 0x7d2   :  { %2495 = vtanh.f32 %v2357_v23 }
 0x7d3   :  { %2497 = vtanh.f32 %v2345_v47 }
 0x7d4   :  { %2499 = vtanh.f32 %v2364_v28 }
 0x7dd   :  { %v2494_v30 = vpop.eup %2493 }
 0x7de   :  { %v2354_v31 = vmul.f32 0.5, %v2494_v30 }
 0x7df   :  { %v2496_v32 = vpop.eup %2495 }
 0x7e0   :  { %v2355_v33 = vadd.f32 0.5, %v2354_v31  ;;  %v2359_v34 = vmul.f32 0.5, %v2496_v32  ;;  %v2498_v35 = vpop.eup %2497 }
 0x7e2   :  { %v2360_v36 = vadd.f32 0.5, %v2359_v34  ;;  %v2369_v37 = vmul.f32 %v2498_v35, %v2355_v33 }
 0x7e4   :  { %v2368_v39 = vmul.f32 %v2360_v36, %v2130_v6 }
 0x7e6   :  { %v2370_v40 = vadd.f32 %v2369_v37, %v2368_v39 }
 0x7e8   :  { %2501 = vtanh.f32 %v2370_v40  ;;  %2379 = vst [vmem:[#allocation16] sm:$0xff] %v2370_v40 }
 0x7e9   :  { %2614 = shalt.err (!%p2611_p1)
}
 0x7ea   :  { %2399 = dma.vmem_to_hbm [thread:$0]  %s2397_s27, 128, %s3618_s7, [#allocation17]   ;;  %v2500_v41 = vpop.eup %2499 }
 0x7eb   :  { %v2366_v42 = vmul.f32 0.5, %v2500_v41  ;;  %s2664_s8 = smov [#allocation15]  }
 0x7ec   :  { %s2386_s9 = sshll.u32 %s2664_s8, 4  ;;  %s2387_s9 = int_to_ptr.vmem [resolvable:$true] %s2386_s9 }
 0x7ed   :  { %v2367_v60 = vadd.f32 0.5, %v2366_v42  ;;  %s2623_s10 = scalar_lea.vmem %s2387_s9, 128  ;;  %p2628_p3 = scmp.lt.s32.totalorder %s2387_s9, %s2387_s9 }
 0x7ee   :  { %p2624_p2 = scmp.ne.s32.totalorder %s2387_s9, %s2623_s10  ;;  %p2629_p4 = scmp.lt.s32.totalorder %s2623_s10, %s2623_s10 }
 0x7f0   :  { %p2630_p5 = por %p2629_p4, %p2628_p3 }
 0x7f2   :  { %p2631_p6 = pnand %p2630_p5, %p2624_p2 }
 0x7f5   :  { %v2502_v63 = vpop.eup %2501 }
 0x7f6   :  { %v2372_v56 = vmul.f32 %v2502_v63, %v2367_v60 }
 0x7f8   :  { %2378 = vst [vmem:[#allocation15] sm:$0xff] %v2372_v56 }
 0x7f9   :  { %2634 = shalt.err (!%p2631_p6)
}
 0x7fa   :  { %2389 = dma.vmem_to_hbm [thread:$0]  %s2387_s9, 128, %s3617_s6, [#allocation8]  }
 0x7fb   :  { %2649 = dma.done.wait [#allocation8], 128  }
 0x7fc   :  { %2650 = vsyncadd [#allocation8], 4294967168 }
 0x7fd   :  { %2651 = dma.done.wait [#allocation17], 128  }
 0x7fe   :  { %2652 = vsyncadd [#allocation17], 4294967168 }
 0x7ff   :  { %2406 = vsyncpa [#allocation7], 1 }
 0x800   :  { %2407 = vsyncpa [#allocation10], 1 }
 0x801   :  { %2408 = vsyncpa [#allocation13], 1 }
 0x802   :  { %2409 = vsyncpa [#allocation8], 1 }
 0x803   :  { %2410 = vsyncpa [#allocation17], 1 }

</bundles_post_ra>
